<compile_context>
chip_gen: v7x
topology: tpu7x:2x2x1
jax: 0.10.0
libtpu: 0.0.40
codegen_flags: <defaults>
</compile_context>

<pallas_src>
import functools

import numpy as np

import jax
import jax.numpy as jnp
from jax import lax
from jax.experimental import pallas as pl
from jax.experimental.pallas import tpu as pltpu

H = 50              # LSTM hidden size per direction
LANE = 128          # TPU lane width / packed bidirectional hidden width / gate slot
DP = LANE           # 128: packed hidden width  [fwd 0:50 | rev 50:100 | pad]
GW = 4 * LANE       # 512: fused gate width (4 slots of 128 lanes: i, f, o, g)
EMB = 20            # embedding size (emb_size)
IN0 = 102           # layer-0 input size: 100 glove dims + verb tag + entity tag
IN0P = 128          # layer-0 input padded to one full vreg lane group
NCLS = 4            # number of state-change classes

# natural PyTorch gate order (i, f, g, o) -> packed slot index
#   slot 0 = i, slot 1 = f, slot 2 = o  (sigmoid block, lanes 0:384)
#   slot 3 = g                          (tanh block,    lanes 384:512)
_GATE_SLOT = (0, 1, 3, 2)

# natural-layout parameter names produced by init_params / consumed by the ref
PARAM_ORDER = [
    "wih0f", "whh0f", "b0f",
    "wih0r", "whh0r", "b0r",
    "wih1f", "whh1f", "b1f",
    "wih1r", "whh1r", "b1r",
    "wbil", "bbil",
    "wemb", "bemb",
    "wcls", "bcls",
]

# slotted/padded parameter names in kernel argument order (after x, tags)
KERNEL_PARAM_ORDER = [
    "gw0f", "gw0r", "gb0", "whh0",
    "gw1f", "gw1r", "gb1", "whh1",
    "wbe", "wbv", "bbil",
    "wemb", "bemb", "wcls", "bcls",
]

# natural params stored through bf16 (weights only; biases stay f32)
_BF16_NATURAL = ("wih0f", "whh0f", "wih0r", "whh0r",
                 "wih1f", "whh1f", "wih1r", "whh1r", "wbil", "wemb")
# slotted params stored as bf16 on device
_BF16_SLOTTED = ("gw0f", "gw0r", "whh0", "gw1f", "gw1r", "whh1",
                 "wbe", "wbv", "wemb")


# --------------------------------------------------------------------------- #
#                                   kernel                                    #
# --------------------------------------------------------------------------- #
def _bidir_lstm_layer(inp, gwf_ref, gwr_ref, gb_ref, whh_ref,
                      g_scr, gr_scr, hf_scr, hr_scr, seq_len):
    """One fused bidirectional LSTM layer with packed fwd/rev gate slots.

    inp: (T_pad, In_pad) layer-input value.  Input->gate projections for BOTH
    directions are hoisted out of the recurrence as full-sequence MXU matmuls
    and pre-combined so each serial step reads one (1, 512) gate row; the fused
    time loop runs fwd at t=i and rev at t=T-1-i with a single (1,128)@(128,512)
    block-diagonal recurrent matmul.  All slices are 128-lane aligned.
    """
    f32 = jnp.float32

    # Hoisted projections (off the serial path).  gb_ref holds both directions'
    # biases in disjoint lane ranges of each slot.
    g_scr[...] = (jnp.dot(inp, gwf_ref[...].astype(f32),
                          preferred_element_type=f32) + gb_ref[...])
    gr_scr[...] = jnp.dot(inp, gwr_ref[...].astype(f32),
                          preferred_element_type=f32)

    # Pre-combine: g[i] += gr[T-1-i].  Static, exact, fully parallel adds that
    # remove one dynamic-row load + one full-width add from every serial step.
    for i in range(seq_len):
        tr = seq_len - 1 - i
        g_scr[pl.ds(i, 1), :] = g_scr[pl.ds(i, 1), :] + gr_scr[pl.ds(tr, 1), :]

    whh = whh_ref[...].astype(f32)                       # (128, 512) block-diag

    def step(i, carry):
        h, c = carry                                     # (1, 128) packed [fwd|rev]
        g = (g_scr[pl.ds(i, 1), :]
             + jnp.dot(h, whh, preferred_element_type=f32))          # (1, 512)
        sg = jax.nn.sigmoid(g[:, 0:3 * DP])              # [i | f | o] slots
        gg = jnp.tanh(g[:, 3 * DP:4 * DP])               # [g] slot
        c_n = sg[:, DP:2 * DP] * c + sg[:, 0:DP] * gg
        h_n = sg[:, 2 * DP:3 * DP] * jnp.tanh(c_n)
        # Full lane-dense row stores; fwd halves land in hf, rev halves in hr.
        hf_scr[pl.ds(i, 1), :] = h_n
        hr_scr[pl.ds(seq_len - 1 - i, 1), :] = h_n
        return (h_n, c_n)

    zeros = jnp.zeros((1, DP), f32)
    lax.fori_loop(0, seq_len, step, (zeros, zeros),
                  unroll=True if seq_len <= 32 else 8)

    # Merge: row t <- [fwd(t) lanes 0:50 from hf | rev(t) lanes 50:100 from hr | 0].
    lane = lax.broadcasted_iota(jnp.int32, (hf_scr.shape[0], DP), 1)
    hf_scr[...] = jnp.where(lane < H, hf_scr[...], hr_scr[...])


def prolocal_kernel(x_ref, tag_ref,
                    gw0f_ref, gw0r_ref, gb0_ref, whh0_ref,
                    gw1f_ref, gw1r_ref, gb1_ref, whh1_ref,
                    wbe_ref, wbv_ref, bbil_ref,
                    wemb_ref, bemb_ref, wcls_ref, bcls_ref,
                    prob_ref,
                    g_scr, gr_scr, hf_scr, hr_scr,
                    *, seq_len, seq_pad):
    f32 = jnp.float32

    # Zero padded tail rows of the hidden scratches so downstream full-buffer
    # matmuls / reductions never see stale VMEM.
    if seq_pad > seq_len:
        pad = seq_pad - seq_len
        zrows = jnp.zeros((pad, DP), f32)
        hf_scr[pl.ds(seq_len, pad), :] = zrows
        hr_scr[pl.ds(seq_len, pad), :] = zrows

    # ---- 2-layer bidirectional LSTM (fused fwd+rev per layer) ----
    _bidir_lstm_layer(x_ref[...], gw0f_ref, gw0r_ref, gb0_ref, whh0_ref,
                      g_scr, gr_scr, hf_scr, hr_scr, seq_len)
    _bidir_lstm_layer(hf_scr[...], gw1f_ref, gw1r_ref, gb1_ref, whh1_ref,
                      g_scr, gr_scr, hf_scr, hr_scr, seq_len)
    hidden = hf_scr[...]                                   # (T_pad, 128) packed

    # ---- verb / entity masked pooling: one (2,T)@(T,128) MXU op ----
    tags = tag_ref[...]                                    # (2, T_pad): [entity; verb]
    tw = tags / (tags + 1e-13)                             # matches v/(v+1e-13)
    pooled = jnp.dot(tw, hidden, preferred_element_type=f32)          # (2, 128)

    # ---- bilinear attention: scores = hidden . (Wbil @ ev^T) + b ----
    u = (jnp.dot(pooled[0:1, :], wbe_ref[...].astype(f32),
                 preferred_element_type=f32)
         + jnp.dot(pooled[1:2, :], wbv_ref[...].astype(f32),
                   preferred_element_type=f32))                       # (1, 128)
    scores = jnp.sum(hidden * u, axis=-1, keepdims=True) + bbil_ref[...]
    if seq_pad > seq_len:
        rows = lax.broadcasted_iota(jnp.int32, (seq_pad, 1), 0)
        scores = jnp.where(rows < seq_len, scores, -1e30)
    m = jnp.max(scores, axis=0, keepdims=True)
    e = jnp.exp(scores - m)
    att = e / jnp.sum(e, axis=0, keepdims=True)            # softmax over time
    hidden_agg = jnp.sum(hidden * att, axis=0, keepdims=True)         # (1, 128)

    # ---- Linear+ReLU embedding, classifier, softmax(dim=1) ----
    emb = jnp.maximum(
        jnp.dot(hidden_agg, wemb_ref[...].astype(f32),
                preferred_element_type=f32) + bemb_ref[...], 0.0)     # (1, 20)
    logits = (jnp.dot(emb, wcls_ref[...], preferred_element_type=f32)
              + bcls_ref[...])                                        # (1, 4)
    lm = jnp.max(logits, axis=-1, keepdims=True)
    le = jnp.exp(logits - lm)
    prob_ref[...] = le / jnp.sum(le, axis=-1, keepdims=True)


# --------------------------------------------------------------------------- #
#                         host-side weight re-layout                          #
# --------------------------------------------------------------------------- #
def quantize_params(p):
    """Round the large natural weights through bf16 (biases stay f32)."""
    q = dict(p)
    for k in _BF16_NATURAL:
        q[k] = jnp.asarray(p[k], jnp.bfloat16).astype(jnp.float32)
    return q


def prepare_params(p):
    """Re-arrange natural PyTorch-style params into the packed slot layout."""
    def a(k):
        return np.asarray(p[k], np.float32)

    def slot_cols(w, doff):           # (R, 4H) natural [i|f|g|o] -> (R, 512) packed
        out = np.zeros((w.shape[0], GW), np.float32)
        for gi, slot in enumerate(_GATE_SLOT):
            s = slot * LANE + doff * H                   # doff: 0 fwd, 1 rev
            out[:, s:s + H] = w[:, gi * H:(gi + 1) * H]
        return out

    def pad_rows(w, n):               # zero-pad leading rows to n
        out = np.zeros((n, w.shape[1]), np.float32)
        out[:w.shape[0]] = w
        return out

    def pad_h_rows(w):                # natural 100 hidden rows -> 128 padded rows
        out = np.zeros((DP, w.shape[1]), np.float32)
        out[:2 * H] = w
        return out

    def pad_h_cols(w):                # natural 100 hidden cols -> 128 padded cols
        out = np.zeros((w.shape[0], DP), np.float32)
        out[:, :2 * H] = w
        return out

    def whh_block(wf, wr):            # block-diagonal recurrent weight (128, 512)
        out = np.zeros((DP, GW), np.float32)
        out[0:H] = slot_cols(wf, 0)                      # fwd hidden rows 0:50
        out[H:2 * H] = slot_cols(wr, 1)                  # rev hidden rows 50:100
        return out

    wbil = a("wbil")                  # (100, 200): cols 0:100 entity, 100:200 verb
    raw = {
        "gw0f": slot_cols(pad_rows(a("wih0f"), IN0P), 0),
        "gw0r": slot_cols(pad_rows(a("wih0r"), IN0P), 1),
        "gb0":  slot_cols(a("b0f"), 0) + slot_cols(a("b0r"), 1),
        "whh0": whh_block(a("whh0f"), a("whh0r")),
        "gw1f": slot_cols(pad_h_rows(a("wih1f")), 0),
        "gw1r": slot_cols(pad_h_rows(a("wih1r")), 1),
        "gb1":  slot_cols(a("b1f"), 0) + slot_cols(a("b1r"), 1),
        "whh1": whh_block(a("whh1f"), a("whh1r")),
        # wbe[pad(j), pad(i)] = wbil[i, j] (entity part); wbv analogous (verb part)
        "wbe":  pad_h_cols(pad_h_rows(wbil[:, :2 * H].T)),
        "wbv":  pad_h_cols(pad_h_rows(wbil[:, 2 * H:].T)),
        "bbil": a("bbil"),
        "wemb": pad_h_rows(a("wemb")),
        "bemb": a("bemb"),
        "wcls": a("wcls"),
        "bcls": a("bcls"),
    }
    return {k: jnp.asarray(v, jnp.bfloat16 if k in _BF16_SLOTTED else jnp.float32)
            for k, v in raw.items()}


# --------------------------------------------------------------------------- #
#                                   wrapper                                   #
# --------------------------------------------------------------------------- #
def prolocal_forward(gloves_b, verb_tags_b, entity_tags_b, slotted_params):
    """Batched forward: gloves_b (B,T,100), verb/entity tags (B,T) -> (B,4)."""
    B, T, _ = gloves_b.shape
    TP = ((T + 7) // 8) * 8                                # sublane-aligned time pad

    x = jnp.zeros((B, TP, IN0P), jnp.float32)
    x = x.at[:, :T, :100].set(gloves_b.astype(jnp.float32))
    x = x.at[:, :T, 100].set(verb_tags_b.astype(jnp.float32))
    x = x.at[:, :T, 101].set(entity_tags_b.astype(jnp.float32))

    tags = jnp.zeros((B, 2, TP), jnp.float32)              # row 0 entity, row 1 verb
    tags = tags.at[:, 0, :T].set(entity_tags_b.astype(jnp.float32))
    tags = tags.at[:, 1, :T].set(verb_tags_b.astype(jnp.float32))

    inputs = [x, tags] + [slotted_params[k] for k in KERNEL_PARAM_ORDER]
    kernel = functools.partial(prolocal_kernel, seq_len=T, seq_pad=TP)

    def batch_spec(shape):            # per-sequence block, batch dim squeezed
        ndim = len(shape)
        idx = lambda b: (b,) + (0,) * (ndim - 1)
        return pl.BlockSpec((None,) + tuple(shape[1:]), idx)

    def weight_spec(shape):           # constant block index -> fetched once
        ndim = len(shape)
        idx = lambda b: (0,) * ndim
        return pl.BlockSpec(tuple(shape), idx)

    in_specs = ([batch_spec(x.shape), batch_spec(tags.shape)]
                + [weight_spec(tuple(slotted_params[k].shape))
                   for k in KERNEL_PARAM_ORDER])

    out = pl.pallas_call(
        kernel,
        grid=(B,),
        out_shape=jax.ShapeDtypeStruct((B, 1, NCLS), jnp.float32),
        in_specs=in_specs,
        out_specs=pl.BlockSpec((None, 1, NCLS), lambda b: (b, 0, 0)),
        scratch_shapes=[
            pltpu.VMEM((TP, GW), jnp.float32),   # combined hoisted gates
            pltpu.VMEM((TP, GW), jnp.float32),   # hoisted reverse-direction gates
            pltpu.VMEM((TP, DP), jnp.float32),   # fwd hidden rows / merged hidden
            pltpu.VMEM((TP, DP), jnp.float32),   # rev hidden rows
        ],
        compiler_params=pltpu.CompilerParams(
            dimension_semantics=("parallel",)),  # 2 TensorCores on v7x
    )(*inputs)
    return out[:, 0, :]                                    # (B, 4)


# ----------------------- pure-JAX reference (for checking) ----------------------- #
def prolocal_ref(gloves, verb_tags, entity_tags, p):
    x = jnp.concatenate(
        [gloves, verb_tags[:, None], entity_tags[:, None]], axis=1
    ).astype(jnp.float32)

    def lstm_dir(inp, wih, whh, b, reverse):
        gin = inp @ wih + b                                            # (T, 4H)
        ts = jnp.arange(inp.shape[0])
        if reverse:
            ts = ts[::-1]

        def step(carry, t):
            h, c = carry
            g = gin[t] + h @ whh
            i_g = jax.nn.sigmoid(g[0:H])
            f_g = jax.nn.sigmoid(g[H:2 * H])
            g_g = jnp.tanh(g[2 * H:3 * H])
            o_g = jax.nn.sigmoid(g[3 * H:4 * H])
            c_n = f_g * c + i_g * g_g
            h_n = o_g * jnp.tanh(c_n)
            return (h_n, c_n), h_n

        _, hs = lax.scan(step, (jnp.zeros(H), jnp.zeros(H)), ts)
        if reverse:
            hs = hs[::-1]
        return hs                                                      # (T, H)

    h0 = jnp.concatenate(
        [lstm_dir(x, p["wih0f"], p["whh0f"], p["b0f"], False),
         lstm_dir(x, p["wih0r"], p["whh0r"], p["b0r"], True)], axis=1)
    hid = jnp.concatenate(
        [lstm_dir(h0, p["wih1f"], p["whh1f"], p["b1f"], False),
         lstm_dir(h0, p["wih1r"], p["whh1r"], p["b1r"], True)], axis=1)

    vt = verb_tags[:, None].astype(jnp.float32)
    et = entity_tags[:, None].astype(jnp.float32)
    verb_hidden = jnp.sum(hid * (vt / (vt + 1e-13)), axis=0, keepdims=True)
    entity_hidden = jnp.sum(hid * (et / (et + 1e-13)), axis=0, keepdims=True)
    ev = jnp.concatenate([entity_hidden, verb_hidden], axis=1)

    scores = jnp.sum((hid @ p["wbil"]) * ev, axis=1, keepdims=True) + p["bbil"]
    att = jax.nn.softmax(scores, axis=0)
    hidden_agg = jnp.sum(hid * att, axis=0, keepdims=True)
    emb = jnp.maximum(hidden_agg @ p["wemb"] + p["bemb"], 0.0)
    logits = emb @ p["wcls"] + p["bcls"]
    return jax.nn.softmax(logits, axis=1)


# ----------------------------- deterministic init -------------------------------- #
def init_params(key):
    ks = jax.random.split(key, len(PARAM_ORDER))
    kd = dict(zip(PARAM_ORDER, ks))

    def u(k, shape, bound):
        return jax.random.uniform(k, shape, jnp.float32, -bound, bound)

    s_lstm = 1.0 / (H ** 0.5)
    s_100 = 1.0 / (100.0 ** 0.5)
    s_emb = 1.0 / (EMB ** 0.5)
    return {
        "wih0f": u(kd["wih0f"], (IN0, 4 * H), s_lstm),
        "whh0f": u(kd["whh0f"], (H, 4 * H), s_lstm),
        "b0f":   u(kd["b0f"], (1, 4 * H), s_lstm),
        "wih0r": u(kd["wih0r"], (IN0, 4 * H), s_lstm),
        "whh0r": u(kd["whh0r"], (H, 4 * H), s_lstm),
        "b0r":   u(kd["b0r"], (1, 4 * H), s_lstm),
        "wih1f": u(kd["wih1f"], (2 * H, 4 * H), s_lstm),
        "whh1f": u(kd["whh1f"], (H, 4 * H), s_lstm),
        "b1f":   u(kd["b1f"], (1, 4 * H), s_lstm),
        "wih1r": u(kd["wih1r"], (2 * H, 4 * H), s_lstm),
        "whh1r": u(kd["whh1r"], (H, 4 * H), s_lstm),
        "b1r":   u(kd["b1r"], (1, 4 * H), s_lstm),
        "wbil":  u(kd["wbil"], (2 * H, 4 * H), s_100),   # Bilinear(100, 200, 1) weight[0]
        "bbil":  u(kd["bbil"], (1, 1), s_100),
        "wemb":  u(kd["wemb"], (2 * H, EMB), s_100),     # Linear(100, 20), transposed
        "bemb":  u(kd["bemb"], (1, EMB), s_100),
        "wcls":  u(kd["wcls"], (EMB, NCLS), s_emb),      # Linear(20, 4), transposed
        "bcls":  u(kd["bcls"], (1, NCLS), s_emb),
    }


if __name__ == "__main__":
    key = jax.random.PRNGKey(0)
    k_g1, k_g2, k_params = jax.random.split(key, 3)

    params = init_params(k_params)
    params_q = quantize_params(params)          # bf16-rounded weights (shared by
    slotted = prepare_params(params_q)          # kernel and reference -> tight check)

    # --- batched call: B=2 sequences of T=8 (weights DMA'd once, grid reuse) ---
    B, T = 2, 8
    gloves = jax.random.normal(k_g1, (B, T, 100), jnp.float32)
    verb_tags = jnp.zeros((B, T), jnp.float32).at[:, 2].set(1.0)
    entity_tags = jnp.zeros((B, T), jnp.float32).at[:, 4].set(1.0).at[:, 5].set(1.0)

    prob = jax.block_until_ready(
        prolocal_forward(gloves, verb_tags, entity_tags, slotted))
    assert prob.shape == (B, NCLS)
    for b in range(B):
        ref = prolocal_ref(gloves[b], verb_tags[b], entity_tags[b], params_q)
        assert bool(jnp.all(jnp.isfinite(prob[b])))
        assert bool(jnp.allclose(jnp.sum(prob[b]), 1.0, atol=1e-4))
        assert bool(jnp.allclose(prob[b:b + 1], ref, atol=5e-4, rtol=5e-3)), \
            (b, prob[b], ref)

    # --- B=1, T=11: exercises the sublane padding + score-mask path ---
    T = 11
    gloves = jax.random.normal(k_g2, (1, T, 100), jnp.float32)
    verb_tags = jnp.zeros((1, T), jnp.float32).at[:, 3].set(1.0)
    entity_tags = jnp.zeros((1, T), jnp.float32).at[:, 6].set(1.0).at[:, 7].set(1.0)

    prob = jax.block_until_ready(
        prolocal_forward(gloves, verb_tags, entity_tags, slotted))
    ref = prolocal_ref(gloves[0], verb_tags[0], entity_tags[0], params_q)
    assert prob.shape == (1, NCLS)
    assert bool(jnp.all(jnp.isfinite(prob)))
    assert bool(jnp.allclose(jnp.sum(prob), 1.0, atol=1e-4))
    assert bool(jnp.allclose(prob, ref, atol=5e-4, rtol=5e-3)), (prob, ref)

    print("KERNEL_OK")
</pallas_src>

<mosaic_0001>
module attributes {stable_mosaic.version = 11 : i64} {
  func.func @prolocal_kernel(%arg0: i32, %arg1: memref<1x8x128xf32, #tpu.memory_space<vmem>>, %arg2: memref<1x2x8xf32, #tpu.memory_space<vmem>>, %arg3: memref<128x512xbf16, #tpu.memory_space<vmem>>, %arg4: memref<128x512xbf16, #tpu.memory_space<vmem>>, %arg5: memref<1x512xf32, #tpu.memory_space<vmem>>, %arg6: memref<128x512xbf16, #tpu.memory_space<vmem>>, %arg7: memref<128x512xbf16, #tpu.memory_space<vmem>>, %arg8: memref<128x512xbf16, #tpu.memory_space<vmem>>, %arg9: memref<1x512xf32, #tpu.memory_space<vmem>>, %arg10: memref<128x512xbf16, #tpu.memory_space<vmem>>, %arg11: memref<128x128xbf16, #tpu.memory_space<vmem>>, %arg12: memref<128x128xbf16, #tpu.memory_space<vmem>>, %arg13: memref<1x1xf32, #tpu.memory_space<vmem>>, %arg14: memref<128x20xbf16, #tpu.memory_space<vmem>>, %arg15: memref<1x20xf32, #tpu.memory_space<vmem>>, %arg16: memref<20x4xf32, #tpu.memory_space<vmem>>, %arg17: memref<1x4xf32, #tpu.memory_space<vmem>>, %arg18: memref<1x1x4xf32, #tpu.memory_space<vmem>>, %arg19: memref<8x512xf32, #tpu.memory_space<vmem>>, %arg20: memref<8x512xf32, #tpu.memory_space<vmem>>, %arg21: memref<8x128xf32, #tpu.memory_space<vmem>>, %arg22: memref<8x128xf32, #tpu.memory_space<vmem>>) attributes {dimension_semantics = [#tpu.dimension_semantics<parallel>], iteration_bounds = array<i64: 2>, scalar_prefetch = 0 : i64, scratch_operands = 4 : i64, tpu.core_type = #tpu.core_type<tc>, window_params = [{transform_indices = @transform_0, window_bounds = array<i64: 1, 8, 128>}, {transform_indices = @transform_1, window_bounds = array<i64: 1, 2, 8>}, {pipeline_mode = #tpu.pipeline_mode<synchronous>, transform_indices = @transform_2, window_bounds = array<i64: 128, 512>}, {pipeline_mode = #tpu.pipeline_mode<synchronous>, transform_indices = @transform_3, window_bounds = array<i64: 128, 512>}, {pipeline_mode = #tpu.pipeline_mode<synchronous>, transform_indices = @transform_4, window_bounds = array<i64: 1, 512>}, {pipeline_mode = #tpu.pipeline_mode<synchronous>, transform_indices = @transform_5, window_bounds = array<i64: 128, 512>}, {pipeline_mode = #tpu.pipeline_mode<synchronous>, transform_indices = @transform_6, window_bounds = array<i64: 128, 512>}, {pipeline_mode = #tpu.pipeline_mode<synchronous>, transform_indices = @transform_7, window_bounds = array<i64: 128, 512>}, {pipeline_mode = #tpu.pipeline_mode<synchronous>, transform_indices = @transform_8, window_bounds = array<i64: 1, 512>}, {pipeline_mode = #tpu.pipeline_mode<synchronous>, transform_indices = @transform_9, window_bounds = array<i64: 128, 512>}, {pipeline_mode = #tpu.pipeline_mode<synchronous>, transform_indices = @transform_10, window_bounds = array<i64: 128, 128>}, {pipeline_mode = #tpu.pipeline_mode<synchronous>, transform_indices = @transform_11, window_bounds = array<i64: 128, 128>}, {pipeline_mode = #tpu.pipeline_mode<synchronous>, transform_indices = @transform_12, window_bounds = array<i64: 1, 1>}, {pipeline_mode = #tpu.pipeline_mode<synchronous>, transform_indices = @transform_13, window_bounds = array<i64: 128, 20>}, {pipeline_mode = #tpu.pipeline_mode<synchronous>, transform_indices = @transform_14, window_bounds = array<i64: 1, 20>}, {pipeline_mode = #tpu.pipeline_mode<synchronous>, transform_indices = @transform_15, window_bounds = array<i64: 20, 4>}, {pipeline_mode = #tpu.pipeline_mode<synchronous>, transform_indices = @transform_16, window_bounds = array<i64: 1, 4>}, {transform_indices = @transform_17, window_bounds = array<i64: 1, 1, 4>}]} {
    %c0 = arith.constant 0 : index
    %c0_0 = arith.constant 0 : index
    %c0_1 = arith.constant 0 : index
    %0 = vector.load %arg1[%c0, %c0_0, %c0_1] : memref<1x8x128xf32, #tpu.memory_space<vmem>>, vector<1x8x128xf32>
    %1 = vector.shape_cast %0 : vector<1x8x128xf32> to vector<8x128xf32>
    %c0_2 = arith.constant 0 : index
    %c0_3 = arith.constant 0 : index
    %2 = vector.load %arg3[%c0_2, %c0_3] : memref<128x512xbf16, #tpu.memory_space<vmem>>, vector<128x512xbf16>
    %3 = arith.extf %2 : vector<128x512xbf16> to vector<128x512xf32>
    %cst = arith.constant dense<0.000000e+00> : vector<8x512xf32>
    %4 = tpu.matmul %1, %3, %cst {dimension_numbers = #tpu.dot_dimension_numbers<[1], [0], [0], [1], [0, 0, 1, 1], [], []>} : vector<8x128xf32>, vector<128x512xf32>, vector<8x512xf32> -> vector<8x512xf32>
    %c0_4 = arith.constant 0 : index
    %c0_5 = arith.constant 0 : index
    %5 = vector.load %arg5[%c0_4, %c0_5] : memref<1x512xf32, #tpu.memory_space<vmem>>, vector<1x512xf32>
    %6 = vector.broadcast %5 : vector<1x512xf32> to vector<8x512xf32>
    %7 = arith.addf %4, %6 : vector<8x512xf32>
    %c0_6 = arith.constant 0 : index
    %c0_7 = arith.constant 0 : index
    %8 = vector.load %arg19[%c0_6, %c0_7] : memref<8x512xf32, #tpu.memory_space<vmem>>, vector<8x512xf32>
    tpu.vector_store %arg19[%c0_6, %c0_7], %7 {strides = array<i32>} : memref<8x512xf32, #tpu.memory_space<vmem>>, vector<8x512xf32>,
    %c0_8 = arith.constant 0 : index
    %c0_9 = arith.constant 0 : index
    %9 = vector.load %arg4[%c0_8, %c0_9] : memref<128x512xbf16, #tpu.memory_space<vmem>>, vector<128x512xbf16>
    %10 = arith.extf %9 : vector<128x512xbf16> to vector<128x512xf32>
    %cst_10 = arith.constant dense<0.000000e+00> : vector<8x512xf32>
    %11 = tpu.matmul %1, %10, %cst_10 {dimension_numbers = #tpu.dot_dimension_numbers<[1], [0], [0], [1], [0, 0, 1, 1], [], []>} : vector<8x128xf32>, vector<128x512xf32>, vector<8x512xf32> -> vector<8x512xf32>
    %c0_11 = arith.constant 0 : index
    %c0_12 = arith.constant 0 : index
    %12 = vector.load %arg20[%c0_11, %c0_12] : memref<8x512xf32, #tpu.memory_space<vmem>>, vector<8x512xf32>
    tpu.vector_store %arg20[%c0_11, %c0_12], %11 {strides = array<i32>} : memref<8x512xf32, #tpu.memory_space<vmem>>, vector<8x512xf32>,
    %c0_13 = arith.constant 0 : index
    %c0_14 = arith.constant 0 : index
    %13 = vector.load %arg19[%c0_13, %c0_14] : memref<8x512xf32, #tpu.memory_space<vmem>>, vector<1x512xf32>
    %c7 = arith.constant 7 : index
    %c0_15 = arith.constant 0 : index
    %14 = vector.load %arg20[%c7, %c0_15] : memref<8x512xf32, #tpu.memory_space<vmem>>, vector<1x512xf32>
    %15 = arith.addf %13, %14 : vector<1x512xf32>
    %c0_16 = arith.constant 0 : index
    %c0_17 = arith.constant 0 : index
    %16 = vector.load %arg19[%c0_16, %c0_17] : memref<8x512xf32, #tpu.memory_space<vmem>>, vector<1x512xf32>
    tpu.vector_store %arg19[%c0_16, %c0_17], %15 {strides = array<i32>} : memref<8x512xf32, #tpu.memory_space<vmem>>, vector<1x512xf32>,
    %c1 = arith.constant 1 : index
    %c0_18 = arith.constant 0 : index
    %17 = vector.load %arg19[%c1, %c0_18] : memref<8x512xf32, #tpu.memory_space<vmem>>, vector<1x512xf32>
    %c6 = arith.constant 6 : index
    %c0_19 = arith.constant 0 : index
    %18 = vector.load %arg20[%c6, %c0_19] : memref<8x512xf32, #tpu.memory_space<vmem>>, vector<1x512xf32>
    %19 = arith.addf %17, %18 : vector<1x512xf32>
    %c1_20 = arith.constant 1 : index
    %c0_21 = arith.constant 0 : index
    %20 = vector.load %arg19[%c1_20, %c0_21] : memref<8x512xf32, #tpu.memory_space<vmem>>, vector<1x512xf32>
    tpu.vector_store %arg19[%c1_20, %c0_21], %19 {strides = array<i32>} : memref<8x512xf32, #tpu.memory_space<vmem>>, vector<1x512xf32>,
    %c2 = arith.constant 2 : index
    %c0_22 = arith.constant 0 : index
    %21 = vector.load %arg19[%c2, %c0_22] : memref<8x512xf32, #tpu.memory_space<vmem>>, vector<1x512xf32>
    %c5 = arith.constant 5 : index
    %c0_23 = arith.constant 0 : index
    %22 = vector.load %arg20[%c5, %c0_23] : memref<8x512xf32, #tpu.memory_space<vmem>>, vector<1x512xf32>
    %23 = arith.addf %21, %22 : vector<1x512xf32>
    %c2_24 = arith.constant 2 : index
    %c0_25 = arith.constant 0 : index
    %24 = vector.load %arg19[%c2_24, %c0_25] : memref<8x512xf32, #tpu.memory_space<vmem>>, vector<1x512xf32>
    tpu.vector_store %arg19[%c2_24, %c0_25], %23 {strides = array<i32>} : memref<8x512xf32, #tpu.memory_space<vmem>>, vector<1x512xf32>,
    %c3 = arith.constant 3 : index
    %c0_26 = arith.constant 0 : index
    %25 = vector.load %arg19[%c3, %c0_26] : memref<8x512xf32, #tpu.memory_space<vmem>>, vector<1x512xf32>
    %c4 = arith.constant 4 : index
    %c0_27 = arith.constant 0 : index
    %26 = vector.load %arg20[%c4, %c0_27] : memref<8x512xf32, #tpu.memory_space<vmem>>, vector<1x512xf32>
    %27 = arith.addf %25, %26 : vector<1x512xf32>
    %c3_28 = arith.constant 3 : index
    %c0_29 = arith.constant 0 : index
    %28 = vector.load %arg19[%c3_28, %c0_29] : memref<8x512xf32, #tpu.memory_space<vmem>>, vector<1x512xf32>
    tpu.vector_store %arg19[%c3_28, %c0_29], %27 {strides = array<i32>} : memref<8x512xf32, #tpu.memory_space<vmem>>, vector<1x512xf32>,
    %c4_30 = arith.constant 4 : index
    %c0_31 = arith.constant 0 : index
    %29 = vector.load %arg19[%c4_30, %c0_31] : memref<8x512xf32, #tpu.memory_space<vmem>>, vector<1x512xf32>
    %c3_32 = arith.constant 3 : index
    %c0_33 = arith.constant 0 : index
    %30 = vector.load %arg20[%c3_32, %c0_33] : memref<8x512xf32, #tpu.memory_space<vmem>>, vector<1x512xf32>
    %31 = arith.addf %29, %30 : vector<1x512xf32>
    %c4_34 = arith.constant 4 : index
    %c0_35 = arith.constant 0 : index
    %32 = vector.load %arg19[%c4_34, %c0_35] : memref<8x512xf32, #tpu.memory_space<vmem>>, vector<1x512xf32>
    tpu.vector_store %arg19[%c4_34, %c0_35], %31 {strides = array<i32>} : memref<8x512xf32, #tpu.memory_space<vmem>>, vector<1x512xf32>,
    %c5_36 = arith.constant 5 : index
    %c0_37 = arith.constant 0 : index
    %33 = vector.load %arg19[%c5_36, %c0_37] : memref<8x512xf32, #tpu.memory_space<vmem>>, vector<1x512xf32>
    %c2_38 = arith.constant 2 : index
    %c0_39 = arith.constant 0 : index
    %34 = vector.load %arg20[%c2_38, %c0_39] : memref<8x512xf32, #tpu.memory_space<vmem>>, vector<1x512xf32>
    %35 = arith.addf %33, %34 : vector<1x512xf32>
    %c5_40 = arith.constant 5 : index
    %c0_41 = arith.constant 0 : index
    %36 = vector.load %arg19[%c5_40, %c0_41] : memref<8x512xf32, #tpu.memory_space<vmem>>, vector<1x512xf32>
    tpu.vector_store %arg19[%c5_40, %c0_41], %35 {strides = array<i32>} : memref<8x512xf32, #tpu.memory_space<vmem>>, vector<1x512xf32>,
    %c6_42 = arith.constant 6 : index
    %c0_43 = arith.constant 0 : index
    %37 = vector.load %arg19[%c6_42, %c0_43] : memref<8x512xf32, #tpu.memory_space<vmem>>, vector<1x512xf32>
    %c1_44 = arith.constant 1 : index
    %c0_45 = arith.constant 0 : index
    %38 = vector.load %arg20[%c1_44, %c0_45] : memref<8x512xf32, #tpu.memory_space<vmem>>, vector<1x512xf32>
    %39 = arith.addf %37, %38 : vector<1x512xf32>
    %c6_46 = arith.constant 6 : index
    %c0_47 = arith.constant 0 : index
    %40 = vector.load %arg19[%c6_46, %c0_47] : memref<8x512xf32, #tpu.memory_space<vmem>>, vector<1x512xf32>
    tpu.vector_store %arg19[%c6_46, %c0_47], %39 {strides = array<i32>} : memref<8x512xf32, #tpu.memory_space<vmem>>, vector<1x512xf32>,
    %c7_48 = arith.constant 7 : index
    %c0_49 = arith.constant 0 : index
    %41 = vector.load %arg19[%c7_48, %c0_49] : memref<8x512xf32, #tpu.memory_space<vmem>>, vector<1x512xf32>
    %c0_50 = arith.constant 0 : index
    %c0_51 = arith.constant 0 : index
    %42 = vector.load %arg20[%c0_50, %c0_51] : memref<8x512xf32, #tpu.memory_space<vmem>>, vector<1x512xf32>
    %43 = arith.addf %41, %42 : vector<1x512xf32>
    %c7_52 = arith.constant 7 : index
    %c0_53 = arith.constant 0 : index
    %44 = vector.load %arg19[%c7_52, %c0_53] : memref<8x512xf32, #tpu.memory_space<vmem>>, vector<1x512xf32>
    tpu.vector_store %arg19[%c7_52, %c0_53], %43 {strides = array<i32>} : memref<8x512xf32, #tpu.memory_space<vmem>>, vector<1x512xf32>,
    %c0_54 = arith.constant 0 : index
    %c0_55 = arith.constant 0 : index
    %45 = vector.load %arg6[%c0_54, %c0_55] : memref<128x512xbf16, #tpu.memory_space<vmem>>, vector<128x512xbf16>
    %46 = arith.extf %45 : vector<128x512xbf16> to vector<128x512xf32>
    %cst_56 = arith.constant 0.000000e+00 : f32
    %47 = vector.broadcast %cst_56 : f32 to vector<1x128xf32>
    %c0_i32 = arith.constant 0 : i32
    %48 = arith.index_cast %c0_i32 : i32 to index
    %c0_57 = arith.constant 0 : index
    %49 = vector.load %arg19[%48, %c0_57] : memref<8x512xf32, #tpu.memory_space<vmem>>, vector<1x512xf32>
    %cst_58 = arith.constant dense<0.000000e+00> : vector<1x512xf32>
    %50 = tpu.matmul %47, %46, %cst_58 {dimension_numbers = #tpu.dot_dimension_numbers<[1], [0], [0], [1], [0, 0, 1, 1], [], []>} : vector<1x128xf32>, vector<128x512xf32>, vector<1x512xf32> -> vector<1x512xf32>
    %51 = arith.addf %49, %50 : vector<1x512xf32>
    %52 = vector.extract_strided_slice %51 {offsets = [0, 0], sizes = [1, 384], strides = [1, 1]} : vector<1x512xf32> to vector<1x384xf32>
    %53 = arith.negf %52 : vector<1x384xf32>
    %54 = math.exp %53 : vector<1x384xf32>
    %cst_59 = arith.constant 1.000000e+00 : f32
    %55 = vector.broadcast %cst_59 : f32 to vector<1x384xf32>
    %56 = arith.addf %55, %54 : vector<1x384xf32>
    %57 = arith.divf %55, %56 : vector<1x384xf32>
    %58 = vector.extract_strided_slice %51 {offsets = [0, 384], sizes = [1, 128], strides = [1, 1]} : vector<1x512xf32> to vector<1x128xf32>
    %59 = math.tanh %58 : vector<1x128xf32>
    %60 = vector.extract_strided_slice %57 {offsets = [0, 128], sizes = [1, 128], strides = [1, 1]} : vector<1x384xf32> to vector<1x128xf32>
    %61 = arith.mulf %60, %47 : vector<1x128xf32>
    %62 = vector.extract_strided_slice %57 {offsets = [0, 0], sizes = [1, 128], strides = [1, 1]} : vector<1x384xf32> to vector<1x128xf32>
    %63 = arith.mulf %62, %59 : vector<1x128xf32>
    %64 = arith.addf %61, %63 : vector<1x128xf32>
    %65 = vector.extract_strided_slice %57 {offsets = [0, 256], sizes = [1, 128], strides = [1, 1]} : vector<1x384xf32> to vector<1x128xf32>
    %66 = math.tanh %64 : vector<1x128xf32>
    %67 = arith.mulf %65, %66 : vector<1x128xf32>
    %68 = arith.index_cast %c0_i32 : i32 to index
    %c0_60 = arith.constant 0 : index
    %69 = vector.load %arg21[%68, %c0_60] : memref<8x128xf32, #tpu.memory_space<vmem>>, vector<1x128xf32>
    tpu.vector_store %arg21[%68, %c0_60], %67 {strides = array<i32>} : memref<8x128xf32, #tpu.memory_space<vmem>>, vector<1x128xf32>,
    %c7_i32 = arith.constant 7 : i32
    %70 = arith.subi %c7_i32, %c0_i32 : i32
    %71 = arith.index_cast %70 : i32 to index
    %c0_61 = arith.constant 0 : index
    %72 = vector.load %arg22[%71, %c0_61] : memref<8x128xf32, #tpu.memory_space<vmem>>, vector<1x128xf32>
    tpu.vector_store %arg22[%71, %c0_61], %67 {strides = array<i32>} : memref<8x128xf32, #tpu.memory_space<vmem>>, vector<1x128xf32>,
    %c1_i32 = arith.constant 1 : i32
    %73 = arith.index_cast %c1_i32 : i32 to index
    %c0_62 = arith.constant 0 : index
    %74 = vector.load %arg19[%73, %c0_62] : memref<8x512xf32, #tpu.memory_space<vmem>>, vector<1x512xf32>
    %cst_63 = arith.constant dense<0.000000e+00> : vector<1x512xf32>
    %75 = tpu.matmul %67, %46, %cst_63 {dimension_numbers = #tpu.dot_dimension_numbers<[1], [0], [0], [1], [0, 0, 1, 1], [], []>} : vector<1x128xf32>, vector<128x512xf32>, vector<1x512xf32> -> vector<1x512xf32>
    %76 = arith.addf %74, %75 : vector<1x512xf32>
    %77 = vector.extract_strided_slice %76 {offsets = [0, 0], sizes = [1, 384], strides = [1, 1]} : vector<1x512xf32> to vector<1x384xf32>
    %78 = arith.negf %77 : vector<1x384xf32>
    %79 = math.exp %78 : vector<1x384xf32>
    %cst_64 = arith.constant 1.000000e+00 : f32
    %80 = vector.broadcast %cst_64 : f32 to vector<1x384xf32>
    %81 = arith.addf %80, %79 : vector<1x384xf32>
    %82 = arith.divf %80, %81 : vector<1x384xf32>
    %83 = vector.extract_strided_slice %76 {offsets = [0, 384], sizes = [1, 128], strides = [1, 1]} : vector<1x512xf32> to vector<1x128xf32>
    %84 = math.tanh %83 : vector<1x128xf32>
    %85 = vector.extract_strided_slice %82 {offsets = [0, 128], sizes = [1, 128], strides = [1, 1]} : vector<1x384xf32> to vector<1x128xf32>
    %86 = arith.mulf %85, %64 : vector<1x128xf32>
    %87 = vector.extract_strided_slice %82 {offsets = [0, 0], sizes = [1, 128], strides = [1, 1]} : vector<1x384xf32> to vector<1x128xf32>
    %88 = arith.mulf %87, %84 : vector<1x128xf32>
    %89 = arith.addf %86, %88 : vector<1x128xf32>
    %90 = vector.extract_strided_slice %82 {offsets = [0, 256], sizes = [1, 128], strides = [1, 1]} : vector<1x384xf32> to vector<1x128xf32>
    %91 = math.tanh %89 : vector<1x128xf32>
    %92 = arith.mulf %90, %91 : vector<1x128xf32>
    %93 = arith.index_cast %c1_i32 : i32 to index
    %c0_65 = arith.constant 0 : index
    %94 = vector.load %arg21[%93, %c0_65] : memref<8x128xf32, #tpu.memory_space<vmem>>, vector<1x128xf32>
    tpu.vector_store %arg21[%93, %c0_65], %92 {strides = array<i32>} : memref<8x128xf32, #tpu.memory_space<vmem>>, vector<1x128xf32>,
    %c7_i32_66 = arith.constant 7 : i32
    %95 = arith.subi %c7_i32_66, %c1_i32 : i32
    %96 = arith.index_cast %95 : i32 to index
    %c0_67 = arith.constant 0 : index
    %97 = vector.load %arg22[%96, %c0_67] : memref<8x128xf32, #tpu.memory_space<vmem>>, vector<1x128xf32>
    tpu.vector_store %arg22[%96, %c0_67], %92 {strides = array<i32>} : memref<8x128xf32, #tpu.memory_space<vmem>>, vector<1x128xf32>,
    %c2_i32 = arith.constant 2 : i32
    %98 = arith.index_cast %c2_i32 : i32 to index
    %c0_68 = arith.constant 0 : index
    %99 = vector.load %arg19[%98, %c0_68] : memref<8x512xf32, #tpu.memory_space<vmem>>, vector<1x512xf32>
    %cst_69 = arith.constant dense<0.000000e+00> : vector<1x512xf32>
    %100 = tpu.matmul %92, %46, %cst_69 {dimension_numbers = #tpu.dot_dimension_numbers<[1], [0], [0], [1], [0, 0, 1, 1], [], []>} : vector<1x128xf32>, vector<128x512xf32>, vector<1x512xf32> -> vector<1x512xf32>
    %101 = arith.addf %99, %100 : vector<1x512xf32>
    %102 = vector.extract_strided_slice %101 {offsets = [0, 0], sizes = [1, 384], strides = [1, 1]} : vector<1x512xf32> to vector<1x384xf32>
    %103 = arith.negf %102 : vector<1x384xf32>
    %104 = math.exp %103 : vector<1x384xf32>
    %cst_70 = arith.constant 1.000000e+00 : f32
    %105 = vector.broadcast %cst_70 : f32 to vector<1x384xf32>
    %106 = arith.addf %105, %104 : vector<1x384xf32>
    %107 = arith.divf %105, %106 : vector<1x384xf32>
    %108 = vector.extract_strided_slice %101 {offsets = [0, 384], sizes = [1, 128], strides = [1, 1]} : vector<1x512xf32> to vector<1x128xf32>
    %109 = math.tanh %108 : vector<1x128xf32>
    %110 = vector.extract_strided_slice %107 {offsets = [0, 128], sizes = [1, 128], strides = [1, 1]} : vector<1x384xf32> to vector<1x128xf32>
    %111 = arith.mulf %110, %89 : vector<1x128xf32>
    %112 = vector.extract_strided_slice %107 {offsets = [0, 0], sizes = [1, 128], strides = [1, 1]} : vector<1x384xf32> to vector<1x128xf32>
    %113 = arith.mulf %112, %109 : vector<1x128xf32>
    %114 = arith.addf %111, %113 : vector<1x128xf32>
    %115 = vector.extract_strided_slice %107 {offsets = [0, 256], sizes = [1, 128], strides = [1, 1]} : vector<1x384xf32> to vector<1x128xf32>
    %116 = math.tanh %114 : vector<1x128xf32>
    %117 = arith.mulf %115, %116 : vector<1x128xf32>
    %118 = arith.index_cast %c2_i32 : i32 to index
    %c0_71 = arith.constant 0 : index
    %119 = vector.load %arg21[%118, %c0_71] : memref<8x128xf32, #tpu.memory_space<vmem>>, vector<1x128xf32>
    tpu.vector_store %arg21[%118, %c0_71], %117 {strides = array<i32>} : memref<8x128xf32, #tpu.memory_space<vmem>>, vector<1x128xf32>,
    %c7_i32_72 = arith.constant 7 : i32
    %120 = arith.subi %c7_i32_72, %c2_i32 : i32
    %121 = arith.index_cast %120 : i32 to index
    %c0_73 = arith.constant 0 : index
    %122 = vector.load %arg22[%121, %c0_73] : memref<8x128xf32, #tpu.memory_space<vmem>>, vector<1x128xf32>
    tpu.vector_store %arg22[%121, %c0_73], %117 {strides = array<i32>} : memref<8x128xf32, #tpu.memory_space<vmem>>, vector<1x128xf32>,
    %c3_i32 = arith.constant 3 : i32
    %123 = arith.index_cast %c3_i32 : i32 to index
    %c0_74 = arith.constant 0 : index
    %124 = vector.load %arg19[%123, %c0_74] : memref<8x512xf32, #tpu.memory_space<vmem>>, vector<1x512xf32>
    %cst_75 = arith.constant dense<0.000000e+00> : vector<1x512xf32>
    %125 = tpu.matmul %117, %46, %cst_75 {dimension_numbers = #tpu.dot_dimension_numbers<[1], [0], [0], [1], [0, 0, 1, 1], [], []>} : vector<1x128xf32>, vector<128x512xf32>, vector<1x512xf32> -> vector<1x512xf32>
    %126 = arith.addf %124, %125 : vector<1x512xf32>
    %127 = vector.extract_strided_slice %126 {offsets = [0, 0], sizes = [1, 384], strides = [1, 1]} : vector<1x512xf32> to vector<1x384xf32>
    %128 = arith.negf %127 : vector<1x384xf32>
    %129 = math.exp %128 : vector<1x384xf32>
    %cst_76 = arith.constant 1.000000e+00 : f32
    %130 = vector.broadcast %cst_76 : f32 to vector<1x384xf32>
    %131 = arith.addf %130, %129 : vector<1x384xf32>
    %132 = arith.divf %130, %131 : vector<1x384xf32>
    %133 = vector.extract_strided_slice %126 {offsets = [0, 384], sizes = [1, 128], strides = [1, 1]} : vector<1x512xf32> to vector<1x128xf32>
    %134 = math.tanh %133 : vector<1x128xf32>
    %135 = vector.extract_strided_slice %132 {offsets = [0, 128], sizes = [1, 128], strides = [1, 1]} : vector<1x384xf32> to vector<1x128xf32>
    %136 = arith.mulf %135, %114 : vector<1x128xf32>
    %137 = vector.extract_strided_slice %132 {offsets = [0, 0], sizes = [1, 128], strides = [1, 1]} : vector<1x384xf32> to vector<1x128xf32>
    %138 = arith.mulf %137, %134 : vector<1x128xf32>
    %139 = arith.addf %136, %138 : vector<1x128xf32>
    %140 = vector.extract_strided_slice %132 {offsets = [0, 256], sizes = [1, 128], strides = [1, 1]} : vector<1x384xf32> to vector<1x128xf32>
    %141 = math.tanh %139 : vector<1x128xf32>
    %142 = arith.mulf %140, %141 : vector<1x128xf32>
    %143 = arith.index_cast %c3_i32 : i32 to index
    %c0_77 = arith.constant 0 : index
    %144 = vector.load %arg21[%143, %c0_77] : memref<8x128xf32, #tpu.memory_space<vmem>>, vector<1x128xf32>
    tpu.vector_store %arg21[%143, %c0_77], %142 {strides = array<i32>} : memref<8x128xf32, #tpu.memory_space<vmem>>, vector<1x128xf32>,
    %c7_i32_78 = arith.constant 7 : i32
    %145 = arith.subi %c7_i32_78, %c3_i32 : i32
    %146 = arith.index_cast %145 : i32 to index
    %c0_79 = arith.constant 0 : index
    %147 = vector.load %arg22[%146, %c0_79] : memref<8x128xf32, #tpu.memory_space<vmem>>, vector<1x128xf32>
    tpu.vector_store %arg22[%146, %c0_79], %142 {strides = array<i32>} : memref<8x128xf32, #tpu.memory_space<vmem>>, vector<1x128xf32>,
    %c4_i32 = arith.constant 4 : i32
    %148 = arith.index_cast %c4_i32 : i32 to index
    %c0_80 = arith.constant 0 : index
    %149 = vector.load %arg19[%148, %c0_80] : memref<8x512xf32, #tpu.memory_space<vmem>>, vector<1x512xf32>
    %cst_81 = arith.constant dense<0.000000e+00> : vector<1x512xf32>
    %150 = tpu.matmul %142, %46, %cst_81 {dimension_numbers = #tpu.dot_dimension_numbers<[1], [0], [0], [1], [0, 0, 1, 1], [], []>} : vector<1x128xf32>, vector<128x512xf32>, vector<1x512xf32> -> vector<1x512xf32>
    %151 = arith.addf %149, %150 : vector<1x512xf32>
    %152 = vector.extract_strided_slice %151 {offsets = [0, 0], sizes = [1, 384], strides = [1, 1]} : vector<1x512xf32> to vector<1x384xf32>
    %153 = arith.negf %152 : vector<1x384xf32>
    %154 = math.exp %153 : vector<1x384xf32>
    %cst_82 = arith.constant 1.000000e+00 : f32
    %155 = vector.broadcast %cst_82 : f32 to vector<1x384xf32>
    %156 = arith.addf %155, %154 : vector<1x384xf32>
    %157 = arith.divf %155, %156 : vector<1x384xf32>
    %158 = vector.extract_strided_slice %151 {offsets = [0, 384], sizes = [1, 128], strides = [1, 1]} : vector<1x512xf32> to vector<1x128xf32>
    %159 = math.tanh %158 : vector<1x128xf32>
    %160 = vector.extract_strided_slice %157 {offsets = [0, 128], sizes = [1, 128], strides = [1, 1]} : vector<1x384xf32> to vector<1x128xf32>
    %161 = arith.mulf %160, %139 : vector<1x128xf32>
    %162 = vector.extract_strided_slice %157 {offsets = [0, 0], sizes = [1, 128], strides = [1, 1]} : vector<1x384xf32> to vector<1x128xf32>
    %163 = arith.mulf %162, %159 : vector<1x128xf32>
    %164 = arith.addf %161, %163 : vector<1x128xf32>
    %165 = vector.extract_strided_slice %157 {offsets = [0, 256], sizes = [1, 128], strides = [1, 1]} : vector<1x384xf32> to vector<1x128xf32>
    %166 = math.tanh %164 : vector<1x128xf32>
    %167 = arith.mulf %165, %166 : vector<1x128xf32>
    %168 = arith.index_cast %c4_i32 : i32 to index
    %c0_83 = arith.constant 0 : index
    %169 = vector.load %arg21[%168, %c0_83] : memref<8x128xf32, #tpu.memory_space<vmem>>, vector<1x128xf32>
    tpu.vector_store %arg21[%168, %c0_83], %167 {strides = array<i32>} : memref<8x128xf32, #tpu.memory_space<vmem>>, vector<1x128xf32>,
    %c7_i32_84 = arith.constant 7 : i32
    %170 = arith.subi %c7_i32_84, %c4_i32 : i32
    %171 = arith.index_cast %170 : i32 to index
    %c0_85 = arith.constant 0 : index
    %172 = vector.load %arg22[%171, %c0_85] : memref<8x128xf32, #tpu.memory_space<vmem>>, vector<1x128xf32>
    tpu.vector_store %arg22[%171, %c0_85], %167 {strides = array<i32>} : memref<8x128xf32, #tpu.memory_space<vmem>>, vector<1x128xf32>,
    %c5_i32 = arith.constant 5 : i32
    %173 = arith.index_cast %c5_i32 : i32 to index
    %c0_86 = arith.constant 0 : index
    %174 = vector.load %arg19[%173, %c0_86] : memref<8x512xf32, #tpu.memory_space<vmem>>, vector<1x512xf32>
    %cst_87 = arith.constant dense<0.000000e+00> : vector<1x512xf32>
    %175 = tpu.matmul %167, %46, %cst_87 {dimension_numbers = #tpu.dot_dimension_numbers<[1], [0], [0], [1], [0, 0, 1, 1], [], []>} : vector<1x128xf32>, vector<128x512xf32>, vector<1x512xf32> -> vector<1x512xf32>
    %176 = arith.addf %174, %175 : vector<1x512xf32>
    %177 = vector.extract_strided_slice %176 {offsets = [0, 0], sizes = [1, 384], strides = [1, 1]} : vector<1x512xf32> to vector<1x384xf32>
    %178 = arith.negf %177 : vector<1x384xf32>
    %179 = math.exp %178 : vector<1x384xf32>
    %cst_88 = arith.constant 1.000000e+00 : f32
    %180 = vector.broadcast %cst_88 : f32 to vector<1x384xf32>
    %181 = arith.addf %180, %179 : vector<1x384xf32>
    %182 = arith.divf %180, %181 : vector<1x384xf32>
    %183 = vector.extract_strided_slice %176 {offsets = [0, 384], sizes = [1, 128], strides = [1, 1]} : vector<1x512xf32> to vector<1x128xf32>
    %184 = math.tanh %183 : vector<1x128xf32>
    %185 = vector.extract_strided_slice %182 {offsets = [0, 128], sizes = [1, 128], strides = [1, 1]} : vector<1x384xf32> to vector<1x128xf32>
    %186 = arith.mulf %185, %164 : vector<1x128xf32>
    %187 = vector.extract_strided_slice %182 {offsets = [0, 0], sizes = [1, 128], strides = [1, 1]} : vector<1x384xf32> to vector<1x128xf32>
    %188 = arith.mulf %187, %184 : vector<1x128xf32>
    %189 = arith.addf %186, %188 : vector<1x128xf32>
    %190 = vector.extract_strided_slice %182 {offsets = [0, 256], sizes = [1, 128], strides = [1, 1]} : vector<1x384xf32> to vector<1x128xf32>
    %191 = math.tanh %189 : vector<1x128xf32>
    %192 = arith.mulf %190, %191 : vector<1x128xf32>
    %193 = arith.index_cast %c5_i32 : i32 to index
    %c0_89 = arith.constant 0 : index
    %194 = vector.load %arg21[%193, %c0_89] : memref<8x128xf32, #tpu.memory_space<vmem>>, vector<1x128xf32>
    tpu.vector_store %arg21[%193, %c0_89], %192 {strides = array<i32>} : memref<8x128xf32, #tpu.memory_space<vmem>>, vector<1x128xf32>,
    %c7_i32_90 = arith.constant 7 : i32
    %195 = arith.subi %c7_i32_90, %c5_i32 : i32
    %196 = arith.index_cast %195 : i32 to index
    %c0_91 = arith.constant 0 : index
    %197 = vector.load %arg22[%196, %c0_91] : memref<8x128xf32, #tpu.memory_space<vmem>>, vector<1x128xf32>
    tpu.vector_store %arg22[%196, %c0_91], %192 {strides = array<i32>} : memref<8x128xf32, #tpu.memory_space<vmem>>, vector<1x128xf32>,
    %c6_i32 = arith.constant 6 : i32
    %198 = arith.index_cast %c6_i32 : i32 to index
    %c0_92 = arith.constant 0 : index
    %199 = vector.load %arg19[%198, %c0_92] : memref<8x512xf32, #tpu.memory_space<vmem>>, vector<1x512xf32>
    %cst_93 = arith.constant dense<0.000000e+00> : vector<1x512xf32>
    %200 = tpu.matmul %192, %46, %cst_93 {dimension_numbers = #tpu.dot_dimension_numbers<[1], [0], [0], [1], [0, 0, 1, 1], [], []>} : vector<1x128xf32>, vector<128x512xf32>, vector<1x512xf32> -> vector<1x512xf32>
    %201 = arith.addf %199, %200 : vector<1x512xf32>
    %202 = vector.extract_strided_slice %201 {offsets = [0, 0], sizes = [1, 384], strides = [1, 1]} : vector<1x512xf32> to vector<1x384xf32>
    %203 = arith.negf %202 : vector<1x384xf32>
    %204 = math.exp %203 : vector<1x384xf32>
    %cst_94 = arith.constant 1.000000e+00 : f32
    %205 = vector.broadcast %cst_94 : f32 to vector<1x384xf32>
    %206 = arith.addf %205, %204 : vector<1x384xf32>
    %207 = arith.divf %205, %206 : vector<1x384xf32>
    %208 = vector.extract_strided_slice %201 {offsets = [0, 384], sizes = [1, 128], strides = [1, 1]} : vector<1x512xf32> to vector<1x128xf32>
    %209 = math.tanh %208 : vector<1x128xf32>
    %210 = vector.extract_strided_slice %207 {offsets = [0, 128], sizes = [1, 128], strides = [1, 1]} : vector<1x384xf32> to vector<1x128xf32>
    %211 = arith.mulf %210, %189 : vector<1x128xf32>
    %212 = vector.extract_strided_slice %207 {offsets = [0, 0], sizes = [1, 128], strides = [1, 1]} : vector<1x384xf32> to vector<1x128xf32>
    %213 = arith.mulf %212, %209 : vector<1x128xf32>
    %214 = arith.addf %211, %213 : vector<1x128xf32>
    %215 = vector.extract_strided_slice %207 {offsets = [0, 256], sizes = [1, 128], strides = [1, 1]} : vector<1x384xf32> to vector<1x128xf32>
    %216 = math.tanh %214 : vector<1x128xf32>
    %217 = arith.mulf %215, %216 : vector<1x128xf32>
    %218 = arith.index_cast %c6_i32 : i32 to index
    %c0_95 = arith.constant 0 : index
    %219 = vector.load %arg21[%218, %c0_95] : memref<8x128xf32, #tpu.memory_space<vmem>>, vector<1x128xf32>
    tpu.vector_store %arg21[%218, %c0_95], %217 {strides = array<i32>} : memref<8x128xf32, #tpu.memory_space<vmem>>, vector<1x128xf32>,
    %c7_i32_96 = arith.constant 7 : i32
    %220 = arith.subi %c7_i32_96, %c6_i32 : i32
    %221 = arith.index_cast %220 : i32 to index
    %c0_97 = arith.constant 0 : index
    %222 = vector.load %arg22[%221, %c0_97] : memref<8x128xf32, #tpu.memory_space<vmem>>, vector<1x128xf32>
    tpu.vector_store %arg22[%221, %c0_97], %217 {strides = array<i32>} : memref<8x128xf32, #tpu.memory_space<vmem>>, vector<1x128xf32>,
    %c7_i32_98 = arith.constant 7 : i32
    %223 = arith.index_cast %c7_i32_98 : i32 to index
    %c0_99 = arith.constant 0 : index
    %224 = vector.load %arg19[%223, %c0_99] : memref<8x512xf32, #tpu.memory_space<vmem>>, vector<1x512xf32>
    %cst_100 = arith.constant dense<0.000000e+00> : vector<1x512xf32>
    %225 = tpu.matmul %217, %46, %cst_100 {dimension_numbers = #tpu.dot_dimension_numbers<[1], [0], [0], [1], [0, 0, 1, 1], [], []>} : vector<1x128xf32>, vector<128x512xf32>, vector<1x512xf32> -> vector<1x512xf32>
    %226 = arith.addf %224, %225 : vector<1x512xf32>
    %227 = vector.extract_strided_slice %226 {offsets = [0, 0], sizes = [1, 384], strides = [1, 1]} : vector<1x512xf32> to vector<1x384xf32>
    %228 = arith.negf %227 : vector<1x384xf32>
    %229 = math.exp %228 : vector<1x384xf32>
    %cst_101 = arith.constant 1.000000e+00 : f32
    %230 = vector.broadcast %cst_101 : f32 to vector<1x384xf32>
    %231 = arith.addf %230, %229 : vector<1x384xf32>
    %232 = arith.divf %230, %231 : vector<1x384xf32>
    %233 = vector.extract_strided_slice %226 {offsets = [0, 384], sizes = [1, 128], strides = [1, 1]} : vector<1x512xf32> to vector<1x128xf32>
    %234 = math.tanh %233 : vector<1x128xf32>
    %235 = vector.extract_strided_slice %232 {offsets = [0, 128], sizes = [1, 128], strides = [1, 1]} : vector<1x384xf32> to vector<1x128xf32>
    %236 = arith.mulf %235, %214 : vector<1x128xf32>
    %237 = vector.extract_strided_slice %232 {offsets = [0, 0], sizes = [1, 128], strides = [1, 1]} : vector<1x384xf32> to vector<1x128xf32>
    %238 = arith.mulf %237, %234 : vector<1x128xf32>
    %239 = arith.addf %236, %238 : vector<1x128xf32>
    %240 = vector.extract_strided_slice %232 {offsets = [0, 256], sizes = [1, 128], strides = [1, 1]} : vector<1x384xf32> to vector<1x128xf32>
    %241 = math.tanh %239 : vector<1x128xf32>
    %242 = arith.mulf %240, %241 : vector<1x128xf32>
    %243 = arith.index_cast %c7_i32_98 : i32 to index
    %c0_102 = arith.constant 0 : index
    %244 = vector.load %arg21[%243, %c0_102] : memref<8x128xf32, #tpu.memory_space<vmem>>, vector<1x128xf32>
    tpu.vector_store %arg21[%243, %c0_102], %242 {strides = array<i32>} : memref<8x128xf32, #tpu.memory_space<vmem>>, vector<1x128xf32>,
    %c7_i32_103 = arith.constant 7 : i32
    %245 = arith.subi %c7_i32_103, %c7_i32_98 : i32
    %246 = arith.index_cast %245 : i32 to index
    %c0_104 = arith.constant 0 : index
    %247 = vector.load %arg22[%246, %c0_104] : memref<8x128xf32, #tpu.memory_space<vmem>>, vector<1x128xf32>
    tpu.vector_store %arg22[%246, %c0_104], %242 {strides = array<i32>} : memref<8x128xf32, #tpu.memory_space<vmem>>, vector<1x128xf32>,
    %c8_i32 = arith.constant 8 : i32
    %248 = tpu.iota {dimensions = array<i32: 1>} : vector<8x128xi32>
    %c50_i32 = arith.constant 50 : i32
    %249 = vector.broadcast %c50_i32 : i32 to vector<8x128xi32>
    %250 = arith.cmpi slt, %248, %249 : vector<8x128xi32>
    %c0_105 = arith.constant 0 : index
    %c0_106 = arith.constant 0 : index
    %251 = vector.load %arg21[%c0_105, %c0_106] : memref<8x128xf32, #tpu.memory_space<vmem>>, vector<8x128xf32>
    %c0_107 = arith.constant 0 : index
    %c0_108 = arith.constant 0 : index
    %252 = vector.load %arg22[%c0_107, %c0_108] : memref<8x128xf32, #tpu.memory_space<vmem>>, vector<8x128xf32>
    %253 = arith.select %250, %251, %252 : vector<8x128xi1>, vector<8x128xf32>
    %c0_109 = arith.constant 0 : index
    %c0_110 = arith.constant 0 : index
    %254 = vector.load %arg21[%c0_109, %c0_110] : memref<8x128xf32, #tpu.memory_space<vmem>>, vector<8x128xf32>
    tpu.vector_store %arg21[%c0_109, %c0_110], %253 {strides = array<i32>} : memref<8x128xf32, #tpu.memory_space<vmem>>, vector<8x128xf32>,
    %c0_111 = arith.constant 0 : index
    %c0_112 = arith.constant 0 : index
    %255 = vector.load %arg21[%c0_111, %c0_112] : memref<8x128xf32, #tpu.memory_space<vmem>>, vector<8x128xf32>
    %c0_113 = arith.constant 0 : index
    %c0_114 = arith.constant 0 : index
    %256 = vector.load %arg7[%c0_113, %c0_114] : memref<128x512xbf16, #tpu.memory_space<vmem>>, vector<128x512xbf16>
    %257 = arith.extf %256 : vector<128x512xbf16> to vector<128x512xf32>
    %cst_115 = arith.constant dense<0.000000e+00> : vector<8x512xf32>
    %258 = tpu.matmul %255, %257, %cst_115 {dimension_numbers = #tpu.dot_dimension_numbers<[1], [0], [0], [1], [0, 0, 1, 1], [], []>} : vector<8x128xf32>, vector<128x512xf32>, vector<8x512xf32> -> vector<8x512xf32>
    %c0_116 = arith.constant 0 : index
    %c0_117 = arith.constant 0 : index
    %259 = vector.load %arg9[%c0_116, %c0_117] : memref<1x512xf32, #tpu.memory_space<vmem>>, vector<1x512xf32>
    %260 = vector.broadcast %259 : vector<1x512xf32> to vector<8x512xf32>
    %261 = arith.addf %258, %260 : vector<8x512xf32>
    %c0_118 = arith.constant 0 : index
    %c0_119 = arith.constant 0 : index
    %262 = vector.load %arg19[%c0_118, %c0_119] : memref<8x512xf32, #tpu.memory_space<vmem>>, vector<8x512xf32>
    tpu.vector_store %arg19[%c0_118, %c0_119], %261 {strides = array<i32>} : memref<8x512xf32, #tpu.memory_space<vmem>>, vector<8x512xf32>,
    %c0_120 = arith.constant 0 : index
    %c0_121 = arith.constant 0 : index
    %263 = vector.load %arg8[%c0_120, %c0_121] : memref<128x512xbf16, #tpu.memory_space<vmem>>, vector<128x512xbf16>
    %264 = arith.extf %263 : vector<128x512xbf16> to vector<128x512xf32>
    %cst_122 = arith.constant dense<0.000000e+00> : vector<8x512xf32>
    %265 = tpu.matmul %255, %264, %cst_122 {dimension_numbers = #tpu.dot_dimension_numbers<[1], [0], [0], [1], [0, 0, 1, 1], [], []>} : vector<8x128xf32>, vector<128x512xf32>, vector<8x512xf32> -> vector<8x512xf32>
    %c0_123 = arith.constant 0 : index
    %c0_124 = arith.constant 0 : index
    %266 = vector.load %arg20[%c0_123, %c0_124] : memref<8x512xf32, #tpu.memory_space<vmem>>, vector<8x512xf32>
    tpu.vector_store %arg20[%c0_123, %c0_124], %265 {strides = array<i32>} : memref<8x512xf32, #tpu.memory_space<vmem>>, vector<8x512xf32>,
    %c0_125 = arith.constant 0 : index
    %c0_126 = arith.constant 0 : index
    %267 = vector.load %arg19[%c0_125, %c0_126] : memref<8x512xf32, #tpu.memory_space<vmem>>, vector<1x512xf32>
    %c7_127 = arith.constant 7 : index
    %c0_128 = arith.constant 0 : index
    %268 = vector.load %arg20[%c7_127, %c0_128] : memref<8x512xf32, #tpu.memory_space<vmem>>, vector<1x512xf32>
    %269 = arith.addf %267, %268 : vector<1x512xf32>
    %c0_129 = arith.constant 0 : index
    %c0_130 = arith.constant 0 : index
    %270 = vector.load %arg19[%c0_129, %c0_130] : memref<8x512xf32, #tpu.memory_space<vmem>>, vector<1x512xf32>
    tpu.vector_store %arg19[%c0_129, %c0_130], %269 {strides = array<i32>} : memref<8x512xf32, #tpu.memory_space<vmem>>, vector<1x512xf32>,
    %c1_131 = arith.constant 1 : index
    %c0_132 = arith.constant 0 : index
    %271 = vector.load %arg19[%c1_131, %c0_132] : memref<8x512xf32, #tpu.memory_space<vmem>>, vector<1x512xf32>
    %c6_133 = arith.constant 6 : index
    %c0_134 = arith.constant 0 : index
    %272 = vector.load %arg20[%c6_133, %c0_134] : memref<8x512xf32, #tpu.memory_space<vmem>>, vector<1x512xf32>
    %273 = arith.addf %271, %272 : vector<1x512xf32>
    %c1_135 = arith.constant 1 : index
    %c0_136 = arith.constant 0 : index
    %274 = vector.load %arg19[%c1_135, %c0_136] : memref<8x512xf32, #tpu.memory_space<vmem>>, vector<1x512xf32>
    tpu.vector_store %arg19[%c1_135, %c0_136], %273 {strides = array<i32>} : memref<8x512xf32, #tpu.memory_space<vmem>>, vector<1x512xf32>,
    %c2_137 = arith.constant 2 : index
    %c0_138 = arith.constant 0 : index
    %275 = vector.load %arg19[%c2_137, %c0_138] : memref<8x512xf32, #tpu.memory_space<vmem>>, vector<1x512xf32>
    %c5_139 = arith.constant 5 : index
    %c0_140 = arith.constant 0 : index
    %276 = vector.load %arg20[%c5_139, %c0_140] : memref<8x512xf32, #tpu.memory_space<vmem>>, vector<1x512xf32>
    %277 = arith.addf %275, %276 : vector<1x512xf32>
    %c2_141 = arith.constant 2 : index
    %c0_142 = arith.constant 0 : index
    %278 = vector.load %arg19[%c2_141, %c0_142] : memref<8x512xf32, #tpu.memory_space<vmem>>, vector<1x512xf32>
    tpu.vector_store %arg19[%c2_141, %c0_142], %277 {strides = array<i32>} : memref<8x512xf32, #tpu.memory_space<vmem>>, vector<1x512xf32>,
    %c3_143 = arith.constant 3 : index
    %c0_144 = arith.constant 0 : index
    %279 = vector.load %arg19[%c3_143, %c0_144] : memref<8x512xf32, #tpu.memory_space<vmem>>, vector<1x512xf32>
    %c4_145 = arith.constant 4 : index
    %c0_146 = arith.constant 0 : index
    %280 = vector.load %arg20[%c4_145, %c0_146] : memref<8x512xf32, #tpu.memory_space<vmem>>, vector<1x512xf32>
    %281 = arith.addf %279, %280 : vector<1x512xf32>
    %c3_147 = arith.constant 3 : index
    %c0_148 = arith.constant 0 : index
    %282 = vector.load %arg19[%c3_147, %c0_148] : memref<8x512xf32, #tpu.memory_space<vmem>>, vector<1x512xf32>
    tpu.vector_store %arg19[%c3_147, %c0_148], %281 {strides = array<i32>} : memref<8x512xf32, #tpu.memory_space<vmem>>, vector<1x512xf32>,
    %c4_149 = arith.constant 4 : index
    %c0_150 = arith.constant 0 : index
    %283 = vector.load %arg19[%c4_149, %c0_150] : memref<8x512xf32, #tpu.memory_space<vmem>>, vector<1x512xf32>
    %c3_151 = arith.constant 3 : index
    %c0_152 = arith.constant 0 : index
    %284 = vector.load %arg20[%c3_151, %c0_152] : memref<8x512xf32, #tpu.memory_space<vmem>>, vector<1x512xf32>
    %285 = arith.addf %283, %284 : vector<1x512xf32>
    %c4_153 = arith.constant 4 : index
    %c0_154 = arith.constant 0 : index
    %286 = vector.load %arg19[%c4_153, %c0_154] : memref<8x512xf32, #tpu.memory_space<vmem>>, vector<1x512xf32>
    tpu.vector_store %arg19[%c4_153, %c0_154], %285 {strides = array<i32>} : memref<8x512xf32, #tpu.memory_space<vmem>>, vector<1x512xf32>,
    %c5_155 = arith.constant 5 : index
    %c0_156 = arith.constant 0 : index
    %287 = vector.load %arg19[%c5_155, %c0_156] : memref<8x512xf32, #tpu.memory_space<vmem>>, vector<1x512xf32>
    %c2_157 = arith.constant 2 : index
    %c0_158 = arith.constant 0 : index
    %288 = vector.load %arg20[%c2_157, %c0_158] : memref<8x512xf32, #tpu.memory_space<vmem>>, vector<1x512xf32>
    %289 = arith.addf %287, %288 : vector<1x512xf32>
    %c5_159 = arith.constant 5 : index
    %c0_160 = arith.constant 0 : index
    %290 = vector.load %arg19[%c5_159, %c0_160] : memref<8x512xf32, #tpu.memory_space<vmem>>, vector<1x512xf32>
    tpu.vector_store %arg19[%c5_159, %c0_160], %289 {strides = array<i32>} : memref<8x512xf32, #tpu.memory_space<vmem>>, vector<1x512xf32>,
    %c6_161 = arith.constant 6 : index
    %c0_162 = arith.constant 0 : index
    %291 = vector.load %arg19[%c6_161, %c0_162] : memref<8x512xf32, #tpu.memory_space<vmem>>, vector<1x512xf32>
    %c1_163 = arith.constant 1 : index
    %c0_164 = arith.constant 0 : index
    %292 = vector.load %arg20[%c1_163, %c0_164] : memref<8x512xf32, #tpu.memory_space<vmem>>, vector<1x512xf32>
    %293 = arith.addf %291, %292 : vector<1x512xf32>
    %c6_165 = arith.constant 6 : index
    %c0_166 = arith.constant 0 : index
    %294 = vector.load %arg19[%c6_165, %c0_166] : memref<8x512xf32, #tpu.memory_space<vmem>>, vector<1x512xf32>
    tpu.vector_store %arg19[%c6_165, %c0_166], %293 {strides = array<i32>} : memref<8x512xf32, #tpu.memory_space<vmem>>, vector<1x512xf32>,
    %c7_167 = arith.constant 7 : index
    %c0_168 = arith.constant 0 : index
    %295 = vector.load %arg19[%c7_167, %c0_168] : memref<8x512xf32, #tpu.memory_space<vmem>>, vector<1x512xf32>
    %c0_169 = arith.constant 0 : index
    %c0_170 = arith.constant 0 : index
    %296 = vector.load %arg20[%c0_169, %c0_170] : memref<8x512xf32, #tpu.memory_space<vmem>>, vector<1x512xf32>
    %297 = arith.addf %295, %296 : vector<1x512xf32>
    %c7_171 = arith.constant 7 : index
    %c0_172 = arith.constant 0 : index
    %298 = vector.load %arg19[%c7_171, %c0_172] : memref<8x512xf32, #tpu.memory_space<vmem>>, vector<1x512xf32>
    tpu.vector_store %arg19[%c7_171, %c0_172], %297 {strides = array<i32>} : memref<8x512xf32, #tpu.memory_space<vmem>>, vector<1x512xf32>,
    %c0_173 = arith.constant 0 : index
    %c0_174 = arith.constant 0 : index
    %299 = vector.load %arg10[%c0_173, %c0_174] : memref<128x512xbf16, #tpu.memory_space<vmem>>, vector<128x512xbf16>
    %300 = arith.extf %299 : vector<128x512xbf16> to vector<128x512xf32>
    %cst_175 = arith.constant 0.000000e+00 : f32
    %301 = vector.broadcast %cst_175 : f32 to vector<1x128xf32>
    %c0_i32_176 = arith.constant 0 : i32
    %302 = arith.index_cast %c0_i32_176 : i32 to index
    %c0_177 = arith.constant 0 : index
    %303 = vector.load %arg19[%302, %c0_177] : memref<8x512xf32, #tpu.memory_space<vmem>>, vector<1x512xf32>
    %cst_178 = arith.constant dense<0.000000e+00> : vector<1x512xf32>
    %304 = tpu.matmul %301, %300, %cst_178 {dimension_numbers = #tpu.dot_dimension_numbers<[1], [0], [0], [1], [0, 0, 1, 1], [], []>} : vector<1x128xf32>, vector<128x512xf32>, vector<1x512xf32> -> vector<1x512xf32>
    %305 = arith.addf %303, %304 : vector<1x512xf32>
    %306 = vector.extract_strided_slice %305 {offsets = [0, 0], sizes = [1, 384], strides = [1, 1]} : vector<1x512xf32> to vector<1x384xf32>
    %307 = arith.negf %306 : vector<1x384xf32>
    %308 = math.exp %307 : vector<1x384xf32>
    %cst_179 = arith.constant 1.000000e+00 : f32
    %309 = vector.broadcast %cst_179 : f32 to vector<1x384xf32>
    %310 = arith.addf %309, %308 : vector<1x384xf32>
    %311 = arith.divf %309, %310 : vector<1x384xf32>
    %312 = vector.extract_strided_slice %305 {offsets = [0, 384], sizes = [1, 128], strides = [1, 1]} : vector<1x512xf32> to vector<1x128xf32>
    %313 = math.tanh %312 : vector<1x128xf32>
    %314 = vector.extract_strided_slice %311 {offsets = [0, 128], sizes = [1, 128], strides = [1, 1]} : vector<1x384xf32> to vector<1x128xf32>
    %315 = arith.mulf %314, %301 : vector<1x128xf32>
    %316 = vector.extract_strided_slice %311 {offsets = [0, 0], sizes = [1, 128], strides = [1, 1]} : vector<1x384xf32> to vector<1x128xf32>
    %317 = arith.mulf %316, %313 : vector<1x128xf32>
    %318 = arith.addf %315, %317 : vector<1x128xf32>
    %319 = vector.extract_strided_slice %311 {offsets = [0, 256], sizes = [1, 128], strides = [1, 1]} : vector<1x384xf32> to vector<1x128xf32>
    %320 = math.tanh %318 : vector<1x128xf32>
    %321 = arith.mulf %319, %320 : vector<1x128xf32>
    %322 = arith.index_cast %c0_i32_176 : i32 to index
    %c0_180 = arith.constant 0 : index
    %323 = vector.load %arg21[%322, %c0_180] : memref<8x128xf32, #tpu.memory_space<vmem>>, vector<1x128xf32>
    tpu.vector_store %arg21[%322, %c0_180], %321 {strides = array<i32>} : memref<8x128xf32, #tpu.memory_space<vmem>>, vector<1x128xf32>,
    %c7_i32_181 = arith.constant 7 : i32
    %324 = arith.subi %c7_i32_181, %c0_i32_176 : i32
    %325 = arith.index_cast %324 : i32 to index
    %c0_182 = arith.constant 0 : index
    %326 = vector.load %arg22[%325, %c0_182] : memref<8x128xf32, #tpu.memory_space<vmem>>, vector<1x128xf32>
    tpu.vector_store %arg22[%325, %c0_182], %321 {strides = array<i32>} : memref<8x128xf32, #tpu.memory_space<vmem>>, vector<1x128xf32>,
    %c1_i32_183 = arith.constant 1 : i32
    %327 = arith.index_cast %c1_i32_183 : i32 to index
    %c0_184 = arith.constant 0 : index
    %328 = vector.load %arg19[%327, %c0_184] : memref<8x512xf32, #tpu.memory_space<vmem>>, vector<1x512xf32>
    %cst_185 = arith.constant dense<0.000000e+00> : vector<1x512xf32>
    %329 = tpu.matmul %321, %300, %cst_185 {dimension_numbers = #tpu.dot_dimension_numbers<[1], [0], [0], [1], [0, 0, 1, 1], [], []>} : vector<1x128xf32>, vector<128x512xf32>, vector<1x512xf32> -> vector<1x512xf32>
    %330 = arith.addf %328, %329 : vector<1x512xf32>
    %331 = vector.extract_strided_slice %330 {offsets = [0, 0], sizes = [1, 384], strides = [1, 1]} : vector<1x512xf32> to vector<1x384xf32>
    %332 = arith.negf %331 : vector<1x384xf32>
    %333 = math.exp %332 : vector<1x384xf32>
    %cst_186 = arith.constant 1.000000e+00 : f32
    %334 = vector.broadcast %cst_186 : f32 to vector<1x384xf32>
    %335 = arith.addf %334, %333 : vector<1x384xf32>
    %336 = arith.divf %334, %335 : vector<1x384xf32>
    %337 = vector.extract_strided_slice %330 {offsets = [0, 384], sizes = [1, 128], strides = [1, 1]} : vector<1x512xf32> to vector<1x128xf32>
    %338 = math.tanh %337 : vector<1x128xf32>
    %339 = vector.extract_strided_slice %336 {offsets = [0, 128], sizes = [1, 128], strides = [1, 1]} : vector<1x384xf32> to vector<1x128xf32>
    %340 = arith.mulf %339, %318 : vector<1x128xf32>
    %341 = vector.extract_strided_slice %336 {offsets = [0, 0], sizes = [1, 128], strides = [1, 1]} : vector<1x384xf32> to vector<1x128xf32>
    %342 = arith.mulf %341, %338 : vector<1x128xf32>
    %343 = arith.addf %340, %342 : vector<1x128xf32>
    %344 = vector.extract_strided_slice %336 {offsets = [0, 256], sizes = [1, 128], strides = [1, 1]} : vector<1x384xf32> to vector<1x128xf32>
    %345 = math.tanh %343 : vector<1x128xf32>
    %346 = arith.mulf %344, %345 : vector<1x128xf32>
    %347 = arith.index_cast %c1_i32_183 : i32 to index
    %c0_187 = arith.constant 0 : index
    %348 = vector.load %arg21[%347, %c0_187] : memref<8x128xf32, #tpu.memory_space<vmem>>, vector<1x128xf32>
    tpu.vector_store %arg21[%347, %c0_187], %346 {strides = array<i32>} : memref<8x128xf32, #tpu.memory_space<vmem>>, vector<1x128xf32>,
    %c7_i32_188 = arith.constant 7 : i32
    %349 = arith.subi %c7_i32_188, %c1_i32_183 : i32
    %350 = arith.index_cast %349 : i32 to index
    %c0_189 = arith.constant 0 : index
    %351 = vector.load %arg22[%350, %c0_189] : memref<8x128xf32, #tpu.memory_space<vmem>>, vector<1x128xf32>
    tpu.vector_store %arg22[%350, %c0_189], %346 {strides = array<i32>} : memref<8x128xf32, #tpu.memory_space<vmem>>, vector<1x128xf32>,
    %c2_i32_190 = arith.constant 2 : i32
    %352 = arith.index_cast %c2_i32_190 : i32 to index
    %c0_191 = arith.constant 0 : index
    %353 = vector.load %arg19[%352, %c0_191] : memref<8x512xf32, #tpu.memory_space<vmem>>, vector<1x512xf32>
    %cst_192 = arith.constant dense<0.000000e+00> : vector<1x512xf32>
    %354 = tpu.matmul %346, %300, %cst_192 {dimension_numbers = #tpu.dot_dimension_numbers<[1], [0], [0], [1], [0, 0, 1, 1], [], []>} : vector<1x128xf32>, vector<128x512xf32>, vector<1x512xf32> -> vector<1x512xf32>
    %355 = arith.addf %353, %354 : vector<1x512xf32>
    %356 = vector.extract_strided_slice %355 {offsets = [0, 0], sizes = [1, 384], strides = [1, 1]} : vector<1x512xf32> to vector<1x384xf32>
    %357 = arith.negf %356 : vector<1x384xf32>
    %358 = math.exp %357 : vector<1x384xf32>
    %cst_193 = arith.constant 1.000000e+00 : f32
    %359 = vector.broadcast %cst_193 : f32 to vector<1x384xf32>
    %360 = arith.addf %359, %358 : vector<1x384xf32>
    %361 = arith.divf %359, %360 : vector<1x384xf32>
    %362 = vector.extract_strided_slice %355 {offsets = [0, 384], sizes = [1, 128], strides = [1, 1]} : vector<1x512xf32> to vector<1x128xf32>
    %363 = math.tanh %362 : vector<1x128xf32>
    %364 = vector.extract_strided_slice %361 {offsets = [0, 128], sizes = [1, 128], strides = [1, 1]} : vector<1x384xf32> to vector<1x128xf32>
    %365 = arith.mulf %364, %343 : vector<1x128xf32>
    %366 = vector.extract_strided_slice %361 {offsets = [0, 0], sizes = [1, 128], strides = [1, 1]} : vector<1x384xf32> to vector<1x128xf32>
    %367 = arith.mulf %366, %363 : vector<1x128xf32>
    %368 = arith.addf %365, %367 : vector<1x128xf32>
    %369 = vector.extract_strided_slice %361 {offsets = [0, 256], sizes = [1, 128], strides = [1, 1]} : vector<1x384xf32> to vector<1x128xf32>
    %370 = math.tanh %368 : vector<1x128xf32>
    %371 = arith.mulf %369, %370 : vector<1x128xf32>
    %372 = arith.index_cast %c2_i32_190 : i32 to index
    %c0_194 = arith.constant 0 : index
    %373 = vector.load %arg21[%372, %c0_194] : memref<8x128xf32, #tpu.memory_space<vmem>>, vector<1x128xf32>
    tpu.vector_store %arg21[%372, %c0_194], %371 {strides = array<i32>} : memref<8x128xf32, #tpu.memory_space<vmem>>, vector<1x128xf32>,
    %c7_i32_195 = arith.constant 7 : i32
    %374 = arith.subi %c7_i32_195, %c2_i32_190 : i32
    %375 = arith.index_cast %374 : i32 to index
    %c0_196 = arith.constant 0 : index
    %376 = vector.load %arg22[%375, %c0_196] : memref<8x128xf32, #tpu.memory_space<vmem>>, vector<1x128xf32>
    tpu.vector_store %arg22[%375, %c0_196], %371 {strides = array<i32>} : memref<8x128xf32, #tpu.memory_space<vmem>>, vector<1x128xf32>,
    %c3_i32_197 = arith.constant 3 : i32
    %377 = arith.index_cast %c3_i32_197 : i32 to index
    %c0_198 = arith.constant 0 : index
    %378 = vector.load %arg19[%377, %c0_198] : memref<8x512xf32, #tpu.memory_space<vmem>>, vector<1x512xf32>
    %cst_199 = arith.constant dense<0.000000e+00> : vector<1x512xf32>
    %379 = tpu.matmul %371, %300, %cst_199 {dimension_numbers = #tpu.dot_dimension_numbers<[1], [0], [0], [1], [0, 0, 1, 1], [], []>} : vector<1x128xf32>, vector<128x512xf32>, vector<1x512xf32> -> vector<1x512xf32>
    %380 = arith.addf %378, %379 : vector<1x512xf32>
    %381 = vector.extract_strided_slice %380 {offsets = [0, 0], sizes = [1, 384], strides = [1, 1]} : vector<1x512xf32> to vector<1x384xf32>
    %382 = arith.negf %381 : vector<1x384xf32>
    %383 = math.exp %382 : vector<1x384xf32>
    %cst_200 = arith.constant 1.000000e+00 : f32
    %384 = vector.broadcast %cst_200 : f32 to vector<1x384xf32>
    %385 = arith.addf %384, %383 : vector<1x384xf32>
    %386 = arith.divf %384, %385 : vector<1x384xf32>
    %387 = vector.extract_strided_slice %380 {offsets = [0, 384], sizes = [1, 128], strides = [1, 1]} : vector<1x512xf32> to vector<1x128xf32>
    %388 = math.tanh %387 : vector<1x128xf32>
    %389 = vector.extract_strided_slice %386 {offsets = [0, 128], sizes = [1, 128], strides = [1, 1]} : vector<1x384xf32> to vector<1x128xf32>
    %390 = arith.mulf %389, %368 : vector<1x128xf32>
    %391 = vector.extract_strided_slice %386 {offsets = [0, 0], sizes = [1, 128], strides = [1, 1]} : vector<1x384xf32> to vector<1x128xf32>
    %392 = arith.mulf %391, %388 : vector<1x128xf32>
    %393 = arith.addf %390, %392 : vector<1x128xf32>
    %394 = vector.extract_strided_slice %386 {offsets = [0, 256], sizes = [1, 128], strides = [1, 1]} : vector<1x384xf32> to vector<1x128xf32>
    %395 = math.tanh %393 : vector<1x128xf32>
    %396 = arith.mulf %394, %395 : vector<1x128xf32>
    %397 = arith.index_cast %c3_i32_197 : i32 to index
    %c0_201 = arith.constant 0 : index
    %398 = vector.load %arg21[%397, %c0_201] : memref<8x128xf32, #tpu.memory_space<vmem>>, vector<1x128xf32>
    tpu.vector_store %arg21[%397, %c0_201], %396 {strides = array<i32>} : memref<8x128xf32, #tpu.memory_space<vmem>>, vector<1x128xf32>,
    %c7_i32_202 = arith.constant 7 : i32
    %399 = arith.subi %c7_i32_202, %c3_i32_197 : i32
    %400 = arith.index_cast %399 : i32 to index
    %c0_203 = arith.constant 0 : index
    %401 = vector.load %arg22[%400, %c0_203] : memref<8x128xf32, #tpu.memory_space<vmem>>, vector<1x128xf32>
    tpu.vector_store %arg22[%400, %c0_203], %396 {strides = array<i32>} : memref<8x128xf32, #tpu.memory_space<vmem>>, vector<1x128xf32>,
    %c4_i32_204 = arith.constant 4 : i32
    %402 = arith.index_cast %c4_i32_204 : i32 to index
    %c0_205 = arith.constant 0 : index
    %403 = vector.load %arg19[%402, %c0_205] : memref<8x512xf32, #tpu.memory_space<vmem>>, vector<1x512xf32>
    %cst_206 = arith.constant dense<0.000000e+00> : vector<1x512xf32>
    %404 = tpu.matmul %396, %300, %cst_206 {dimension_numbers = #tpu.dot_dimension_numbers<[1], [0], [0], [1], [0, 0, 1, 1], [], []>} : vector<1x128xf32>, vector<128x512xf32>, vector<1x512xf32> -> vector<1x512xf32>
    %405 = arith.addf %403, %404 : vector<1x512xf32>
    %406 = vector.extract_strided_slice %405 {offsets = [0, 0], sizes = [1, 384], strides = [1, 1]} : vector<1x512xf32> to vector<1x384xf32>
    %407 = arith.negf %406 : vector<1x384xf32>
    %408 = math.exp %407 : vector<1x384xf32>
    %cst_207 = arith.constant 1.000000e+00 : f32
    %409 = vector.broadcast %cst_207 : f32 to vector<1x384xf32>
    %410 = arith.addf %409, %408 : vector<1x384xf32>
    %411 = arith.divf %409, %410 : vector<1x384xf32>
    %412 = vector.extract_strided_slice %405 {offsets = [0, 384], sizes = [1, 128], strides = [1, 1]} : vector<1x512xf32> to vector<1x128xf32>
    %413 = math.tanh %412 : vector<1x128xf32>
    %414 = vector.extract_strided_slice %411 {offsets = [0, 128], sizes = [1, 128], strides = [1, 1]} : vector<1x384xf32> to vector<1x128xf32>
    %415 = arith.mulf %414, %393 : vector<1x128xf32>
    %416 = vector.extract_strided_slice %411 {offsets = [0, 0], sizes = [1, 128], strides = [1, 1]} : vector<1x384xf32> to vector<1x128xf32>
    %417 = arith.mulf %416, %413 : vector<1x128xf32>
    %418 = arith.addf %415, %417 : vector<1x128xf32>
    %419 = vector.extract_strided_slice %411 {offsets = [0, 256], sizes = [1, 128], strides = [1, 1]} : vector<1x384xf32> to vector<1x128xf32>
    %420 = math.tanh %418 : vector<1x128xf32>
    %421 = arith.mulf %419, %420 : vector<1x128xf32>
    %422 = arith.index_cast %c4_i32_204 : i32 to index
    %c0_208 = arith.constant 0 : index
    %423 = vector.load %arg21[%422, %c0_208] : memref<8x128xf32, #tpu.memory_space<vmem>>, vector<1x128xf32>
    tpu.vector_store %arg21[%422, %c0_208], %421 {strides = array<i32>} : memref<8x128xf32, #tpu.memory_space<vmem>>, vector<1x128xf32>,
    %c7_i32_209 = arith.constant 7 : i32
    %424 = arith.subi %c7_i32_209, %c4_i32_204 : i32
    %425 = arith.index_cast %424 : i32 to index
    %c0_210 = arith.constant 0 : index
    %426 = vector.load %arg22[%425, %c0_210] : memref<8x128xf32, #tpu.memory_space<vmem>>, vector<1x128xf32>
    tpu.vector_store %arg22[%425, %c0_210], %421 {strides = array<i32>} : memref<8x128xf32, #tpu.memory_space<vmem>>, vector<1x128xf32>,
    %c5_i32_211 = arith.constant 5 : i32
    %427 = arith.index_cast %c5_i32_211 : i32 to index
    %c0_212 = arith.constant 0 : index
    %428 = vector.load %arg19[%427, %c0_212] : memref<8x512xf32, #tpu.memory_space<vmem>>, vector<1x512xf32>
    %cst_213 = arith.constant dense<0.000000e+00> : vector<1x512xf32>
    %429 = tpu.matmul %421, %300, %cst_213 {dimension_numbers = #tpu.dot_dimension_numbers<[1], [0], [0], [1], [0, 0, 1, 1], [], []>} : vector<1x128xf32>, vector<128x512xf32>, vector<1x512xf32> -> vector<1x512xf32>
    %430 = arith.addf %428, %429 : vector<1x512xf32>
    %431 = vector.extract_strided_slice %430 {offsets = [0, 0], sizes = [1, 384], strides = [1, 1]} : vector<1x512xf32> to vector<1x384xf32>
    %432 = arith.negf %431 : vector<1x384xf32>
    %433 = math.exp %432 : vector<1x384xf32>
    %cst_214 = arith.constant 1.000000e+00 : f32
    %434 = vector.broadcast %cst_214 : f32 to vector<1x384xf32>
    %435 = arith.addf %434, %433 : vector<1x384xf32>
    %436 = arith.divf %434, %435 : vector<1x384xf32>
    %437 = vector.extract_strided_slice %430 {offsets = [0, 384], sizes = [1, 128], strides = [1, 1]} : vector<1x512xf32> to vector<1x128xf32>
    %438 = math.tanh %437 : vector<1x128xf32>
    %439 = vector.extract_strided_slice %436 {offsets = [0, 128], sizes = [1, 128], strides = [1, 1]} : vector<1x384xf32> to vector<1x128xf32>
    %440 = arith.mulf %439, %418 : vector<1x128xf32>
    %441 = vector.extract_strided_slice %436 {offsets = [0, 0], sizes = [1, 128], strides = [1, 1]} : vector<1x384xf32> to vector<1x128xf32>
    %442 = arith.mulf %441, %438 : vector<1x128xf32>
    %443 = arith.addf %440, %442 : vector<1x128xf32>
    %444 = vector.extract_strided_slice %436 {offsets = [0, 256], sizes = [1, 128], strides = [1, 1]} : vector<1x384xf32> to vector<1x128xf32>
    %445 = math.tanh %443 : vector<1x128xf32>
    %446 = arith.mulf %444, %445 : vector<1x128xf32>
    %447 = arith.index_cast %c5_i32_211 : i32 to index
    %c0_215 = arith.constant 0 : index
    %448 = vector.load %arg21[%447, %c0_215] : memref<8x128xf32, #tpu.memory_space<vmem>>, vector<1x128xf32>
    tpu.vector_store %arg21[%447, %c0_215], %446 {strides = array<i32>} : memref<8x128xf32, #tpu.memory_space<vmem>>, vector<1x128xf32>,
    %c7_i32_216 = arith.constant 7 : i32
    %449 = arith.subi %c7_i32_216, %c5_i32_211 : i32
    %450 = arith.index_cast %449 : i32 to index
    %c0_217 = arith.constant 0 : index
    %451 = vector.load %arg22[%450, %c0_217] : memref<8x128xf32, #tpu.memory_space<vmem>>, vector<1x128xf32>
    tpu.vector_store %arg22[%450, %c0_217], %446 {strides = array<i32>} : memref<8x128xf32, #tpu.memory_space<vmem>>, vector<1x128xf32>,
    %c6_i32_218 = arith.constant 6 : i32
    %452 = arith.index_cast %c6_i32_218 : i32 to index
    %c0_219 = arith.constant 0 : index
    %453 = vector.load %arg19[%452, %c0_219] : memref<8x512xf32, #tpu.memory_space<vmem>>, vector<1x512xf32>
    %cst_220 = arith.constant dense<0.000000e+00> : vector<1x512xf32>
    %454 = tpu.matmul %446, %300, %cst_220 {dimension_numbers = #tpu.dot_dimension_numbers<[1], [0], [0], [1], [0, 0, 1, 1], [], []>} : vector<1x128xf32>, vector<128x512xf32>, vector<1x512xf32> -> vector<1x512xf32>
    %455 = arith.addf %453, %454 : vector<1x512xf32>
    %456 = vector.extract_strided_slice %455 {offsets = [0, 0], sizes = [1, 384], strides = [1, 1]} : vector<1x512xf32> to vector<1x384xf32>
    %457 = arith.negf %456 : vector<1x384xf32>
    %458 = math.exp %457 : vector<1x384xf32>
    %cst_221 = arith.constant 1.000000e+00 : f32
    %459 = vector.broadcast %cst_221 : f32 to vector<1x384xf32>
    %460 = arith.addf %459, %458 : vector<1x384xf32>
    %461 = arith.divf %459, %460 : vector<1x384xf32>
    %462 = vector.extract_strided_slice %455 {offsets = [0, 384], sizes = [1, 128], strides = [1, 1]} : vector<1x512xf32> to vector<1x128xf32>
    %463 = math.tanh %462 : vector<1x128xf32>
    %464 = vector.extract_strided_slice %461 {offsets = [0, 128], sizes = [1, 128], strides = [1, 1]} : vector<1x384xf32> to vector<1x128xf32>
    %465 = arith.mulf %464, %443 : vector<1x128xf32>
    %466 = vector.extract_strided_slice %461 {offsets = [0, 0], sizes = [1, 128], strides = [1, 1]} : vector<1x384xf32> to vector<1x128xf32>
    %467 = arith.mulf %466, %463 : vector<1x128xf32>
    %468 = arith.addf %465, %467 : vector<1x128xf32>
    %469 = vector.extract_strided_slice %461 {offsets = [0, 256], sizes = [1, 128], strides = [1, 1]} : vector<1x384xf32> to vector<1x128xf32>
    %470 = math.tanh %468 : vector<1x128xf32>
    %471 = arith.mulf %469, %470 : vector<1x128xf32>
    %472 = arith.index_cast %c6_i32_218 : i32 to index
    %c0_222 = arith.constant 0 : index
    %473 = vector.load %arg21[%472, %c0_222] : memref<8x128xf32, #tpu.memory_space<vmem>>, vector<1x128xf32>
    tpu.vector_store %arg21[%472, %c0_222], %471 {strides = array<i32>} : memref<8x128xf32, #tpu.memory_space<vmem>>, vector<1x128xf32>,
    %c7_i32_223 = arith.constant 7 : i32
    %474 = arith.subi %c7_i32_223, %c6_i32_218 : i32
    %475 = arith.index_cast %474 : i32 to index
    %c0_224 = arith.constant 0 : index
    %476 = vector.load %arg22[%475, %c0_224] : memref<8x128xf32, #tpu.memory_space<vmem>>, vector<1x128xf32>
    tpu.vector_store %arg22[%475, %c0_224], %471 {strides = array<i32>} : memref<8x128xf32, #tpu.memory_space<vmem>>, vector<1x128xf32>,
    %c7_i32_225 = arith.constant 7 : i32
    %477 = arith.index_cast %c7_i32_225 : i32 to index
    %c0_226 = arith.constant 0 : index
    %478 = vector.load %arg19[%477, %c0_226] : memref<8x512xf32, #tpu.memory_space<vmem>>, vector<1x512xf32>
    %cst_227 = arith.constant dense<0.000000e+00> : vector<1x512xf32>
    %479 = tpu.matmul %471, %300, %cst_227 {dimension_numbers = #tpu.dot_dimension_numbers<[1], [0], [0], [1], [0, 0, 1, 1], [], []>} : vector<1x128xf32>, vector<128x512xf32>, vector<1x512xf32> -> vector<1x512xf32>
    %480 = arith.addf %478, %479 : vector<1x512xf32>
    %481 = vector.extract_strided_slice %480 {offsets = [0, 0], sizes = [1, 384], strides = [1, 1]} : vector<1x512xf32> to vector<1x384xf32>
    %482 = arith.negf %481 : vector<1x384xf32>
    %483 = math.exp %482 : vector<1x384xf32>
    %cst_228 = arith.constant 1.000000e+00 : f32
    %484 = vector.broadcast %cst_228 : f32 to vector<1x384xf32>
    %485 = arith.addf %484, %483 : vector<1x384xf32>
    %486 = arith.divf %484, %485 : vector<1x384xf32>
    %487 = vector.extract_strided_slice %480 {offsets = [0, 384], sizes = [1, 128], strides = [1, 1]} : vector<1x512xf32> to vector<1x128xf32>
    %488 = math.tanh %487 : vector<1x128xf32>
    %489 = vector.extract_strided_slice %486 {offsets = [0, 128], sizes = [1, 128], strides = [1, 1]} : vector<1x384xf32> to vector<1x128xf32>
    %490 = arith.mulf %489, %468 : vector<1x128xf32>
    %491 = vector.extract_strided_slice %486 {offsets = [0, 0], sizes = [1, 128], strides = [1, 1]} : vector<1x384xf32> to vector<1x128xf32>
    %492 = arith.mulf %491, %488 : vector<1x128xf32>
    %493 = arith.addf %490, %492 : vector<1x128xf32>
    %494 = vector.extract_strided_slice %486 {offsets = [0, 256], sizes = [1, 128], strides = [1, 1]} : vector<1x384xf32> to vector<1x128xf32>
    %495 = math.tanh %493 : vector<1x128xf32>
    %496 = arith.mulf %494, %495 : vector<1x128xf32>
    %497 = arith.index_cast %c7_i32_225 : i32 to index
    %c0_229 = arith.constant 0 : index
    %498 = vector.load %arg21[%497, %c0_229] : memref<8x128xf32, #tpu.memory_space<vmem>>, vector<1x128xf32>
    tpu.vector_store %arg21[%497, %c0_229], %496 {strides = array<i32>} : memref<8x128xf32, #tpu.memory_space<vmem>>, vector<1x128xf32>,
    %c7_i32_230 = arith.constant 7 : i32
    %499 = arith.subi %c7_i32_230, %c7_i32_225 : i32
    %500 = arith.index_cast %499 : i32 to index
    %c0_231 = arith.constant 0 : index
    %501 = vector.load %arg22[%500, %c0_231] : memref<8x128xf32, #tpu.memory_space<vmem>>, vector<1x128xf32>
    tpu.vector_store %arg22[%500, %c0_231], %496 {strides = array<i32>} : memref<8x128xf32, #tpu.memory_space<vmem>>, vector<1x128xf32>,
    %c8_i32_232 = arith.constant 8 : i32
    %502 = tpu.iota {dimensions = array<i32: 1>} : vector<8x128xi32>
    %c50_i32_233 = arith.constant 50 : i32
    %503 = vector.broadcast %c50_i32_233 : i32 to vector<8x128xi32>
    %504 = arith.cmpi slt, %502, %503 : vector<8x128xi32>
    %c0_234 = arith.constant 0 : index
    %c0_235 = arith.constant 0 : index
    %505 = vector.load %arg21[%c0_234, %c0_235] : memref<8x128xf32, #tpu.memory_space<vmem>>, vector<8x128xf32>
    %c0_236 = arith.constant 0 : index
    %c0_237 = arith.constant 0 : index
    %506 = vector.load %arg22[%c0_236, %c0_237] : memref<8x128xf32, #tpu.memory_space<vmem>>, vector<8x128xf32>
    %507 = arith.select %504, %505, %506 : vector<8x128xi1>, vector<8x128xf32>
    %c0_238 = arith.constant 0 : index
    %c0_239 = arith.constant 0 : index
    %508 = vector.load %arg21[%c0_238, %c0_239] : memref<8x128xf32, #tpu.memory_space<vmem>>, vector<8x128xf32>
    tpu.vector_store %arg21[%c0_238, %c0_239], %507 {strides = array<i32>} : memref<8x128xf32, #tpu.memory_space<vmem>>, vector<8x128xf32>,
    %c0_240 = arith.constant 0 : index
    %c0_241 = arith.constant 0 : index
    %509 = vector.load %arg21[%c0_240, %c0_241] : memref<8x128xf32, #tpu.memory_space<vmem>>, vector<8x128xf32>
    %c0_242 = arith.constant 0 : index
    %c0_243 = arith.constant 0 : index
    %c0_244 = arith.constant 0 : index
    %510 = vector.load %arg2[%c0_242, %c0_243, %c0_244] : memref<1x2x8xf32, #tpu.memory_space<vmem>>, vector<1x2x8xf32>
    %511 = vector.shape_cast %510 : vector<1x2x8xf32> to vector<2x8xf32>
    %cst_245 = arith.constant 9.99999982E-14 : f32
    %512 = vector.broadcast %cst_245 : f32 to vector<2x8xf32>
    %513 = arith.addf %511, %512 : vector<2x8xf32>
    %514 = arith.divf %511, %513 : vector<2x8xf32>
    %cst_246 = arith.constant dense<0.000000e+00> : vector<2x128xf32>
    %515 = tpu.matmul %514, %509, %cst_246 {dimension_numbers = #tpu.dot_dimension_numbers<[1], [0], [0], [1], [0, 0, 1, 1], [], []>} : vector<2x8xf32>, vector<8x128xf32>, vector<2x128xf32> -> vector<2x128xf32>
    %516 = vector.extract_strided_slice %515 {offsets = [0, 0], sizes = [1, 128], strides = [1, 1]} : vector<2x128xf32> to vector<1x128xf32>
    %c0_247 = arith.constant 0 : index
    %c0_248 = arith.constant 0 : index
    %517 = vector.load %arg11[%c0_247, %c0_248] : memref<128x128xbf16, #tpu.memory_space<vmem>>, vector<128x128xbf16>
    %518 = arith.extf %517 : vector<128x128xbf16> to vector<128x128xf32>
    %cst_249 = arith.constant dense<0.000000e+00> : vector<1x128xf32>
    %519 = tpu.matmul %516, %518, %cst_249 {dimension_numbers = #tpu.dot_dimension_numbers<[1], [0], [0], [1], [0, 0, 1, 1], [], []>} : vector<1x128xf32>, vector<128x128xf32>, vector<1x128xf32> -> vector<1x128xf32>
    %520 = vector.extract_strided_slice %515 {offsets = [1, 0], sizes = [1, 128], strides = [1, 1]} : vector<2x128xf32> to vector<1x128xf32>
    %c0_250 = arith.constant 0 : index
    %c0_251 = arith.constant 0 : index
    %521 = vector.load %arg12[%c0_250, %c0_251] : memref<128x128xbf16, #tpu.memory_space<vmem>>, vector<128x128xbf16>
    %522 = arith.extf %521 : vector<128x128xbf16> to vector<128x128xf32>
    %cst_252 = arith.constant dense<0.000000e+00> : vector<1x128xf32>
    %523 = tpu.matmul %520, %522, %cst_252 {dimension_numbers = #tpu.dot_dimension_numbers<[1], [0], [0], [1], [0, 0, 1, 1], [], []>} : vector<1x128xf32>, vector<128x128xf32>, vector<1x128xf32> -> vector<1x128xf32>
    %524 = arith.addf %519, %523 : vector<1x128xf32>
    %525 = vector.broadcast %524 : vector<1x128xf32> to vector<8x128xf32>
    %526 = arith.mulf %509, %525 : vector<8x128xf32>
    %cst_253 = arith.constant dense<0.000000e+00> : vector<8xf32>
    %527 = vector.multi_reduction <add>, %526, %cst_253 [1] : vector<8x128xf32> to vector<8xf32>
    %528 = vector.shape_cast %527 : vector<8xf32> to vector<8x1xf32>
    %c0_254 = arith.constant 0 : index
    %c0_255 = arith.constant 0 : index
    %529 = vector.load %arg13[%c0_254, %c0_255] : memref<1x1xf32, #tpu.memory_space<vmem>>, vector<1x1xf32>
    %530 = vector.broadcast %529 : vector<1x1xf32> to vector<8x1xf32>
    %531 = arith.addf %528, %530 : vector<8x1xf32>
    %cst_256 = arith.constant dense<0xFF800000> : vector<1xf32>
    %532 = vector.multi_reduction <maximumf>, %531, %cst_256 [0] : vector<8x1xf32> to vector<1xf32>
    %533 = vector.shape_cast %532 : vector<1xf32> to vector<1x1xf32>
    %534 = vector.broadcast %533 : vector<1x1xf32> to vector<8x1xf32>
    %535 = arith.subf %531, %534 : vector<8x1xf32>
    %536 = math.exp %535 : vector<8x1xf32>
    %cst_257 = arith.constant dense<0.000000e+00> : vector<1xf32>
    %537 = vector.multi_reduction <add>, %536, %cst_257 [0] : vector<8x1xf32> to vector<1xf32>
    %538 = vector.shape_cast %537 : vector<1xf32> to vector<1x1xf32>
    %539 = vector.broadcast %538 : vector<1x1xf32> to vector<8x1xf32>
    %540 = arith.divf %536, %539 : vector<8x1xf32>
    %541 = vector.broadcast %540 : vector<8x1xf32> to vector<8x128xf32>
    %542 = arith.mulf %509, %541 : vector<8x128xf32>
    %cst_258 = arith.constant dense<0.000000e+00> : vector<128xf32>
    %543 = vector.multi_reduction <add>, %542, %cst_258 [0] : vector<8x128xf32> to vector<128xf32>
    %544 = vector.shape_cast %543 : vector<128xf32> to vector<1x128xf32>
    %c0_259 = arith.constant 0 : index
    %c0_260 = arith.constant 0 : index
    %545 = vector.load %arg14[%c0_259, %c0_260] : memref<128x20xbf16, #tpu.memory_space<vmem>>, vector<128x20xbf16>
    %546 = arith.extf %545 : vector<128x20xbf16> to vector<128x20xf32>
    %cst_261 = arith.constant dense<0.000000e+00> : vector<1x20xf32>
    %547 = tpu.matmul %544, %546, %cst_261 {dimension_numbers = #tpu.dot_dimension_numbers<[1], [0], [0], [1], [0, 0, 1, 1], [], []>} : vector<1x128xf32>, vector<128x20xf32>, vector<1x20xf32> -> vector<1x20xf32>
    %c0_262 = arith.constant 0 : index
    %c0_263 = arith.constant 0 : index
    %548 = vector.load %arg15[%c0_262, %c0_263] : memref<1x20xf32, #tpu.memory_space<vmem>>, vector<1x20xf32>
    %549 = arith.addf %547, %548 : vector<1x20xf32>
    %cst_264 = arith.constant 0.000000e+00 : f32
    %550 = vector.broadcast %cst_264 : f32 to vector<1x20xf32>
    %551 = arith.maximumf %549, %550 : vector<1x20xf32>
    %c0_265 = arith.constant 0 : index
    %c0_266 = arith.constant 0 : index
    %552 = vector.load %arg16[%c0_265, %c0_266] : memref<20x4xf32, #tpu.memory_space<vmem>>, vector<20x4xf32>
    %cst_267 = arith.constant dense<0.000000e+00> : vector<1x4xf32>
    %553 = tpu.matmul %551, %552, %cst_267 {dimension_numbers = #tpu.dot_dimension_numbers<[1], [0], [0], [1], [0, 0, 1, 1], [], []>} : vector<1x20xf32>, vector<20x4xf32>, vector<1x4xf32> -> vector<1x4xf32>
    %c0_268 = arith.constant 0 : index
    %c0_269 = arith.constant 0 : index
    %554 = vector.load %arg17[%c0_268, %c0_269] : memref<1x4xf32, #tpu.memory_space<vmem>>, vector<1x4xf32>
    %555 = arith.addf %553, %554 : vector<1x4xf32>
    %cst_270 = arith.constant dense<0xFF800000> : vector<1xf32>
    %556 = vector.multi_reduction <maximumf>, %555, %cst_270 [1] : vector<1x4xf32> to vector<1xf32>
    %557 = vector.shape_cast %556 : vector<1xf32> to vector<1x1xf32>
    %558 = vector.broadcast %557 : vector<1x1xf32> to vector<1x4xf32>
    %559 = arith.subf %555, %558 : vector<1x4xf32>
    %560 = math.exp %559 : vector<1x4xf32>
    %cst_271 = arith.constant dense<0.000000e+00> : vector<1xf32>
    %561 = vector.multi_reduction <add>, %560, %cst_271 [1] : vector<1x4xf32> to vector<1xf32>
    %562 = vector.shape_cast %561 : vector<1xf32> to vector<1x1xf32>
    %563 = vector.broadcast %562 : vector<1x1xf32> to vector<1x4xf32>
    %564 = arith.divf %560, %563 : vector<1x4xf32>
    %c0_272 = arith.constant 0 : index
    %c0_273 = arith.constant 0 : index
    %c0_274 = arith.constant 0 : index
    %565 = vector.load %arg18[%c0_272, %c0_273, %c0_274] : memref<1x1x4xf32, #tpu.memory_space<vmem>>, vector<1x1x4xf32>
    %566 = vector.shape_cast %565 : vector<1x1x4xf32> to vector<1x4xf32>
    %567 = vector.shape_cast %564 : vector<1x4xf32> to vector<1x1x4xf32>
    tpu.vector_store %arg18[%c0_272, %c0_273, %c0_274], %567 {strides = array<i32>} : memref<1x1x4xf32, #tpu.memory_space<vmem>>, vector<1x1x4xf32>,
    return
  }
  func.func @transform_0(%arg0: i32) -> (i32, i32, i32) {
    %c0_i32 = arith.constant 0 : i32
    %c0_i32_0 = arith.constant 0 : i32
    %c0_i32_1 = arith.constant 0 : i32
    return %arg0, %c0_i32, %c0_i32_0 : i32, i32, i32
  }
  func.func @transform_1(%arg0: i32) -> (i32, i32, i32) {
    %c0_i32 = arith.constant 0 : i32
    %c0_i32_0 = arith.constant 0 : i32
    %c0_i32_1 = arith.constant 0 : i32
    return %arg0, %c0_i32, %c0_i32_0 : i32, i32, i32
  }
  func.func @transform_2(%arg0: i32) -> (i32, i32) {
    %c0_i32 = arith.constant 0 : i32
    %c0_i32_0 = arith.constant 0 : i32
    %c0_i32_1 = arith.constant 0 : i32
    return %c0_i32, %c0_i32_0 : i32, i32
  }
  func.func @transform_3(%arg0: i32) -> (i32, i32) {
    %c0_i32 = arith.constant 0 : i32
    %c0_i32_0 = arith.constant 0 : i32
    %c0_i32_1 = arith.constant 0 : i32
    return %c0_i32, %c0_i32_0 : i32, i32
  }
  func.func @transform_4(%arg0: i32) -> (i32, i32) {
    %c0_i32 = arith.constant 0 : i32
    %c0_i32_0 = arith.constant 0 : i32
    %c0_i32_1 = arith.constant 0 : i32
    return %c0_i32, %c0_i32_0 : i32, i32
  }
  func.func @transform_5(%arg0: i32) -> (i32, i32) {
    %c0_i32 = arith.constant 0 : i32
    %c0_i32_0 = arith.constant 0 : i32
    %c0_i32_1 = arith.constant 0 : i32
    return %c0_i32, %c0_i32_0 : i32, i32
  }
  func.func @transform_6(%arg0: i32) -> (i32, i32) {
    %c0_i32 = arith.constant 0 : i32
    %c0_i32_0 = arith.constant 0 : i32
    %c0_i32_1 = arith.constant 0 : i32
    return %c0_i32, %c0_i32_0 : i32, i32
  }
  func.func @transform_7(%arg0: i32) -> (i32, i32) {
    %c0_i32 = arith.constant 0 : i32
    %c0_i32_0 = arith.constant 0 : i32
    %c0_i32_1 = arith.constant 0 : i32
    return %c0_i32, %c0_i32_0 : i32, i32
  }
  func.func @transform_8(%arg0: i32) -> (i32, i32) {
    %c0_i32 = arith.constant 0 : i32
    %c0_i32_0 = arith.constant 0 : i32
    %c0_i32_1 = arith.constant 0 : i32
    return %c0_i32, %c0_i32_0 : i32, i32
  }
  func.func @transform_9(%arg0: i32) -> (i32, i32) {
    %c0_i32 = arith.constant 0 : i32
    %c0_i32_0 = arith.constant 0 : i32
    %c0_i32_1 = arith.constant 0 : i32
    return %c0_i32, %c0_i32_0 : i32, i32
  }
  func.func @transform_10(%arg0: i32) -> (i32, i32) {
    %c0_i32 = arith.constant 0 : i32
    %c0_i32_0 = arith.constant 0 : i32
    %c0_i32_1 = arith.constant 0 : i32
    return %c0_i32, %c0_i32_0 : i32, i32
  }
  func.func @transform_11(%arg0: i32) -> (i32, i32) {
    %c0_i32 = arith.constant 0 : i32
    %c0_i32_0 = arith.constant 0 : i32
    %c0_i32_1 = arith.constant 0 : i32
    return %c0_i32, %c0_i32_0 : i32, i32
  }
  func.func @transform_12(%arg0: i32) -> (i32, i32) {
    %c0_i32 = arith.constant 0 : i32
    %c0_i32_0 = arith.constant 0 : i32
    %c0_i32_1 = arith.constant 0 : i32
    return %c0_i32, %c0_i32_0 : i32, i32
  }
  func.func @transform_13(%arg0: i32) -> (i32, i32) {
    %c0_i32 = arith.constant 0 : i32
    %c0_i32_0 = arith.constant 0 : i32
    %c0_i32_1 = arith.constant 0 : i32
    return %c0_i32, %c0_i32_0 : i32, i32
  }
  func.func @transform_14(%arg0: i32) -> (i32, i32) {
    %c0_i32 = arith.constant 0 : i32
    %c0_i32_0 = arith.constant 0 : i32
    %c0_i32_1 = arith.constant 0 : i32
    return %c0_i32, %c0_i32_0 : i32, i32
  }
  func.func @transform_15(%arg0: i32) -> (i32, i32) {
    %c0_i32 = arith.constant 0 : i32
    %c0_i32_0 = arith.constant 0 : i32
    %c0_i32_1 = arith.constant 0 : i32
    return %c0_i32, %c0_i32_0 : i32, i32
  }
  func.func @transform_16(%arg0: i32) -> (i32, i32) {
    %c0_i32 = arith.constant 0 : i32
    %c0_i32_0 = arith.constant 0 : i32
    %c0_i32_1 = arith.constant 0 : i32
    return %c0_i32, %c0_i32_0 : i32, i32
  }
  func.func @transform_17(%arg0: i32) -> (i32, i32, i32) {
    %c0_i32 = arith.constant 0 : i32
    %c0_i32_0 = arith.constant 0 : i32
    %c0_i32_1 = arith.constant 0 : i32
    return %arg0, %c0_i32, %c0_i32_0 : i32, i32, i32
  }
}

</mosaic_0001>

<bundles_post_ra>
// kernel: tpu_custom_call.1
= control target key start
LH: loop header
LB: loop body
LE: loop exit
PB: predicated region body
PF: predicated region fallthrough
CT: control target
= control target key end

     0   :  { %s10743_s0 = inlined_call_operand.hbm [shape: f32[2,8,128], index: 0, kind: input, shape index: {}]   ;;  %s10744_s1 = inlined_call_operand.hbm [shape: f32[2,2,8], index: 1, kind: input, shape index: {}]   ;;  %s10745_s2 = inlined_call_operand.hbm [shape: bf16[128,512], index: 2, kind: input, shape index: {}]   ;;  %s10746_s3 = inlined_call_operand.hbm [shape: bf16[128,512], index: 3, kind: input, shape index: {}]   ;;  %s10747_s4 = inlined_call_operand.hbm [shape: f32[1,512], index: 4, kind: input, shape index: {}]   ;;  %s10748_s5 = inlined_call_operand.hbm [shape: bf16[128,512], index: 5, kind: input, shape index: {}]   ;;  %s10749_s6 = inlined_call_operand.hbm [shape: bf16[128,512], index: 6, kind: input, shape index: {}]   ;;  %s10750_s7 = inlined_call_operand.hbm [shape: bf16[128,512], index: 7, kind: input, shape index: {}]   ;;  %s10751_s8 = inlined_call_operand.hbm [shape: f32[1,512], index: 8, kind: input, shape index: {}]   ;;  %s10752_s9 = inlined_call_operand.hbm [shape: bf16[128,512], index: 9, kind: input, shape index: {}]   ;;  %s10753_s10 = inlined_call_operand.vmem [shape: bf16[128,128], index: 10, kind: input, shape index: {}]   ;;  %s10754_s11 = inlined_call_operand.vmem [shape: bf16[128,128], index: 11, kind: input, shape index: {}]   ;;  %s10755_s12 = inlined_call_operand.<no memory space> [shape: f32[1,1], index: 12, kind: input, shape index: {}]   ;;  %s10756_s13 = inlined_call_operand.vmem [shape: bf16[128,20], index: 13, kind: input, shape index: {}]   ;;  %s10757_s14 = inlined_call_operand.vmem [shape: f32[1,20], index: 14, kind: input, shape index: {}]   ;;  %s10758_s15 = inlined_call_operand.vmem [shape: f32[20,4], index: 15, kind: input, shape index: {}]   ;;  %s10759_s16 = inlined_call_operand.vmem [shape: f32[1,4], index: 16, kind: input, shape index: {}]   ;;  %s10760_s17 = inlined_call_operand.hbm [shape: f32[2,1,4], index: 17, kind: output, shape index: {}]  }
   0x1   :  { %10771 = sst [smem:[#allocation33_spill]] %s10743_s0  ;;  %v22_v0 = vstv %s10755_s12 }
   0x2   :  { %10772 = sst [smem:[#allocation34_spill]] %s10744_s1  ;;  %23 = vst [vmem:[#allocation6] sm:$0x1] %v22_v0 }
   0x3   :  { %10773 = sst [smem:[#allocation35_spill]] %s10745_s2 }
   0x4   :  { %10774 = sst [smem:[#allocation36_spill]] %s10746_s3 }
   0x5   :  { %10775 = sst [smem:[#allocation37_spill]] %s10747_s4 }
   0x6   :  { %10776 = sst [smem:[#allocation38_spill]] %s10748_s5 }
   0x7   :  { %10777 = sst [smem:[#allocation39_spill]] %s10749_s6 }
   0x8   :  { %10778 = sst [smem:[#allocation40_spill]] %s10750_s7 }
   0x9   :  { %10779 = sst [smem:[#allocation41_spill]] %s10753_s10 }
   0xa   :  { %10780 = sst [smem:[#allocation42_spill]] %s10756_s13 }
   0xb   :  { %10781 = sst [smem:[#allocation43_spill]] %s10757_s14 }
   0xc   :  { %10782 = sst [smem:[#allocation44_spill]] %s10758_s15 }
   0xd   :  { %10783 = sst [smem:[#allocation45_spill]] %s10759_s16 }
   0xe   :  { %10784 = sst [smem:[#allocation46_spill]] %s10760_s17 }
   0xf   :  { %24 = vsyncpa [#allocation8], 0 }
  0x10   :  { %26 = vsyncpa [#allocation8 + $0x1], 0 }
  0x11   :  { %27 = vsyncpa [#allocation11], 0 }
  0x12   :  { %29 = vsyncpa [#allocation11 + $0x1], 0 }
  0x13   :  { %30 = vsyncpa [#allocation14], 0 }
  0x14   :  { %31 = vsyncpa [#allocation17], 0 }
  0x15   :  { %32 = vsyncpa [#allocation20], 0 }
  0x16   :  { %33 = vsyncpa [#allocation23], 0 }
  0x17   :  { %34 = vsyncpa [#allocation9], 0 }
  0x18   :  { %36 = vsyncpa [#allocation9 + $0x1], 0  ;;  %s9299_s26 = smov 0   ;;  %s9301_s27 = smov 0  }
  0x19   :  { %s9303_s28 = smov 0   ;;  %s9305_s29 = smov 0  }
  0x1a LB: > { %s9188_s12 = smov [#allocation12]   ;;  %s9320_s30 = sadd.s32 4294967295, %s9186_s29   ;;  %s9186_s29 = sphi %s9305_s29, %s10830_s29   ;;  %s9182_s28 = sphi %s9303_s28, %s10829_s28   ;;  %s9178_s27 = sphi %s9301_s27, %s10828_s27   ;;  %s9174_s26 = sphi %s9299_s26, %s10827_s26  }
  0x1b   : > { %s452_s0 = sshll.u32 %s9188_s12, 4  ;;  %p5860_p0 = scmp.ge.s32.totalorder %s9186_s29, 1  ;;  %s9325_s0 = int_to_ptr.vmem [resolvable:$true] %s452_s0 }
  0x1c   : > { %p10767_p1 = scmp.eq.s32.totalorder %s9320_s30, 0  ;;  %p440_p2 = scmp.lt.s32.totalorder %s9186_s29, 3 }
  0x1d   : > { %s9189_s19 = smov [#allocation13]   ;;  %s9190_s21 = smov [#allocation16]  }
  0x1e   : > { %p9327_p3 = pnand %p5860_p0, %p440_p2  ;;  %s465_s1 = sshll.u32 %s9189_s19, 4  ;;  %s9340_s1 = int_to_ptr.vmem [resolvable:$true] %s465_s1 }
  0x1f   : > { %s489_s22 = sshll.u32 %s9190_s21, 4  ;;  %s10787_s2 = sld [smem:[#allocation35_spill]]  ;;  %s9342_s22 = int_to_ptr.vmem [resolvable:$true] %s489_s22 }
  0x20   : > { %s10785_s18 = scalar_select %p9327_p3, 1, 0 }
  0x21   : > { %p8236_p5 = pneg %p9327_p3 }
  0x23   : > { %p9336_p6 = pnand %p8236_p5, %p10767_p1 }
  0x25   : > { %s8812_s25 = scalar_lea.hbm %s10787_s2, 4096  ;;  %p9352_p8 = pneg %p9336_p6 }
  0x26   : > { %p8813_p7 = scmp.ne.s32.totalorder %s10787_s2, %s8812_s25  ;;  %p8819_p11 = scmp.lt.u32.totalorder %s8812_s25, %s10787_s2 }
  0x28   : > { %p8815_p9 = pnand %p9352_p8, %p8813_p7 }
  0x2a   : > { %p8816_p10 = pneg %p8815_p9 }
  0x2c   : > { %p8821_p12 = pnand %p8819_p11, %p8816_p10 }
  0x2e   : > { %8824 = shalt.err (!%p8821_p12)
}
  0x2f   : > { %s8825_s17 = scalar_lea.vmem %s9325_s0, 4096  ;;  %p8833_p5 = scmp.lt.s32.totalorder %s9325_s0, %s9325_s0 }
  0x30   : > { %p8826_p13 = scmp.ne.s32.totalorder %s9325_s0, %s8825_s17  ;;  %p8834_p4 = scmp.lt.s32.totalorder %s8825_s17, %s8825_s17 }
  0x32   : > { %p8828_p0 = pnand %p8826_p13, %p9352_p8  ;;  %p8835_p7 = por %p8834_p4, %p8833_p5 }
  0x34   : > { %p8829_p2 = pneg %p8828_p0 }
  0x36   : > { %p8836_p9 = pnand %p8835_p7, %p8829_p2 }
  0x38   : > { %8839 = shalt.err (!%p8836_p9)
}
  0x39   : > { %s9191_s23 = smov 256   ;;  %s9192_s16 = smov 16  }
  0x3a   : > { %8239 = dma.hbm_to_vmem [thread:$0]  (!%p9336_p6), %s10787_s2, 4096, %s9325_s0, [#allocation11], %s9191_s23, %s9191_s23, %s9192_s16  }
  0x3b   : > { %s10789_s3 = sld [smem:[#allocation36_spill]] }
  0x41   : > { %s8840_s17 = scalar_lea.hbm %s10789_s3, 4096 }
  0x42   : > { %p8841_p4 = scmp.ne.s32.totalorder %s10789_s3, %s8840_s17  ;;  %p8847_p12 = scmp.lt.u32.totalorder %s8840_s17, %s10789_s3 }
  0x44   : > { %p8843_p10 = pnand %p8841_p4, %p9352_p8 }
  0x46   : > { %p8844_p11 = pneg %p8843_p10 }
  0x48   : > { %p8849_p13 = pnand %p8847_p12, %p8844_p11 }
  0x4a   : > { %8852 = shalt.err (!%p8849_p13)
}
  0x4b   : > { %s8853_s0 = scalar_lea.vmem %s9340_s1, 4096  ;;  %p8861_p7 = scmp.lt.s32.totalorder %s9340_s1, %s9340_s1 }
  0x4c   : > { %p8854_p0 = scmp.ne.s32.totalorder %s9340_s1, %s8853_s0  ;;  %p8862_p9 = scmp.lt.s32.totalorder %s8853_s0, %s8853_s0 }
  0x4e   : > { %p8856_p2 = pnand %p8854_p0, %p9352_p8  ;;  %p8863_p4 = por %p8862_p9, %p8861_p7 }
  0x50   : > { %p8857_p5 = pneg %p8856_p2 }
  0x52   : > { %p8864_p10 = pnand %p8863_p4, %p8857_p5 }
  0x54   : > { %8867 = shalt.err (!%p8864_p10)
}
  0x55   : > { %8242 = dma.hbm_to_vmem [thread:$0]  (!%p9336_p6), %s10789_s3, 4096, %s9340_s1, [#allocation14], %s9191_s23, %s9191_s23, %s9192_s16  }
  0x56   : > { %s10790_s5 = sld [smem:[#allocation38_spill]] }
  0x5c   : > { %s8868_s24 = scalar_lea.hbm %s10790_s5, 4096 }
  0x5d   : > { %p8869_p11 = scmp.ne.s32.totalorder %s10790_s5, %s8868_s24  ;;  %p8875_p0 = scmp.lt.u32.totalorder %s8868_s24, %s10790_s5 }
  0x5f   : > { %p8871_p12 = pnand %p8869_p11, %p9352_p8 }
  0x61   : > { %p8872_p13 = pneg %p8871_p12 }
  0x63   : > { %p8877_p2 = pnand %p8875_p0, %p8872_p13 }
  0x65   : > { %8880 = shalt.err (!%p8877_p2)
}
  0x66   : > { %s8881_s1 = scalar_lea.vmem %s9342_s22, 4096  ;;  %p8889_p4 = scmp.lt.s32.totalorder %s9342_s22, %s9342_s22 }
  0x67   : > { %p8882_p5 = scmp.ne.s32.totalorder %s9342_s22, %s8881_s1  ;;  %p8890_p10 = scmp.lt.s32.totalorder %s8881_s1, %s8881_s1 }
  0x69   : > { %p8884_p7 = pnand %p8882_p5, %p9352_p8  ;;  %p8891_p11 = por %p8890_p10, %p8889_p4 }
  0x6b   : > { %p8885_p9 = pneg %p8884_p7 }
  0x6d   : > { %p8892_p12 = pnand %p8891_p11, %p8885_p9 }
  0x6f   : > { %8895 = shalt.err (!%p8892_p12)
}
  0x70   : > { %8248 = dma.hbm_to_vmem [thread:$0]  (!%p9336_p6), %s10790_s5, 4096, %s9342_s22, [#allocation17], %s9191_s23, %s9191_s23, %s9192_s16  }
  0x71   : > { %s9193_s13 = smov [#allocation19]   ;;  %s9194_s15 = smov [#allocation15]  }
  0x72   : > { %s515_s14 = sshll.u32 %s9193_s13, 4  ;;  %s479_s24 = sshll.u32 %s9194_s15, 4  ;;  %s516_s14 = int_to_ptr.vmem [resolvable:$true] %s515_s14  ;;  %s480_s24 = int_to_ptr.vmem [resolvable:$true] %s479_s24 }
  0x73   : > { %s10791_s7 = sld [smem:[#allocation40_spill]] }
  0x79   : > { %s8896_s21 = scalar_lea.hbm %s10791_s7, 4096 }
  0x7a   : > { %p8897_p13 = scmp.ne.s32.totalorder %s10791_s7, %s8896_s21  ;;  %p8903_p5 = scmp.lt.u32.totalorder %s8896_s21, %s10791_s7 }
  0x7c   : > { %p8899_p0 = pnand %p8897_p13, %p9352_p8 }
  0x7e   : > { %p8900_p2 = pneg %p8899_p0 }
  0x80   : > { %p8905_p7 = pnand %p8903_p5, %p8900_p2 }
  0x82   : > { %8908 = shalt.err (!%p8905_p7)
}
  0x83   : > { %s8909_s22 = scalar_lea.vmem %s516_s14, 4096  ;;  %p8917_p11 = scmp.lt.s32.totalorder %s516_s14, %s516_s14 }
  0x84   : > { %p8910_p9 = scmp.ne.s32.totalorder %s516_s14, %s8909_s22  ;;  %p8918_p12 = scmp.lt.s32.totalorder %s8909_s22, %s8909_s22 }
  0x86   : > { %p8912_p4 = pnand %p8910_p9, %p9352_p8  ;;  %p8919_p1 = por %p8918_p12, %p8917_p11 }
  0x88   : > { %p8913_p10 = pneg %p8912_p4 }
  0x8a   : > { %p8920_p3 = pnand %p8919_p1, %p8913_p10 }
  0x8c   : > { %8923 = shalt.err (!%p8920_p3)
}
  0x8d   : > { %8254 = dma.hbm_to_vmem [thread:$0]  (!%p9336_p6), %s10791_s7, 4096, %s516_s14, [#allocation20], %s9191_s23, %s9191_s23, %s9192_s16  }
  0x8e   : > { %s10792_s4 = sld [smem:[#allocation37_spill]] }
  0x94   : > { %s8924_s25 = scalar_lea.hbm %s10792_s4, 64 }
  0x95   : > { %p8925_p1 = scmp.ne.s32.totalorder %s10792_s4, %s8924_s25  ;;  %p8931_p0 = scmp.lt.u32.totalorder %s8924_s25, %s10792_s4 }
  0x97   : > { %p8927_p3 = pnand %p8925_p1, %p9352_p8 }
  0x99   : > { %p8928_p13 = pneg %p8927_p3 }
  0x9b   : > { %p8933_p2 = pnand %p8931_p0, %p8928_p13 }
  0x9d   : > { %8936 = shalt.err (!%p8933_p2)
}
  0x9e   : > { %s8937_s0 = scalar_lea.vmem %s480_s24, 64  ;;  %p8945_p4 = scmp.lt.s32.totalorder %s480_s24, %s480_s24 }
  0x9f   : > { %p8938_p5 = scmp.ne.s32.totalorder %s480_s24, %s8937_s0  ;;  %p8946_p10 = scmp.lt.s32.totalorder %s8937_s0, %s8937_s0 }
  0xa1   : > { %p8940_p7 = pnand %p8938_p5, %p9352_p8  ;;  %p8947_p11 = por %p8946_p10, %p8945_p4 }
  0xa3   : > { %p8941_p9 = pneg %p8940_p7 }
  0xa5   : > { %p8948_p12 = pnand %p8947_p11, %p8941_p9 }
  0xa7   : > { %8951 = shalt.err (!%p8948_p12)
}
  0xa8   : > { %8245 = dma.hbm_to_vmem [thread:$0]  (!%p9336_p6), %s10792_s4, 64, %s480_s24, [#allocation14]  }
  0xa9   : > { %s9195_s2 = smov [#allocation18]   ;;  %s9196_s13 = smov [#allocation21]  }
  0xaa   : > { %s502_s10 = sshll.u32 %s9195_s2, 4  ;;  %s529_s15 = sshll.u32 %s9196_s13, 4  ;;  %s503_s10 = int_to_ptr.vmem [resolvable:$true] %s502_s10  ;;  %s530_s15 = int_to_ptr.vmem [resolvable:$true] %s529_s15 }
  0xab   : > { %s10793_s6 = sld [smem:[#allocation39_spill]] }
  0xb1   : > { %s8952_s21 = scalar_lea.hbm %s10793_s6, 4096 }
  0xb2   : > { %p8953_p1 = scmp.ne.s32.totalorder %s10793_s6, %s8952_s21  ;;  %p8959_p0 = scmp.lt.u32.totalorder %s8952_s21, %s10793_s6 }
  0xb4   : > { %p8955_p3 = pnand %p8953_p1, %p9352_p8 }
  0xb6   : > { %p8956_p13 = pneg %p8955_p3 }
  0xb8   : > { %p8961_p2 = pnand %p8959_p0, %p8956_p13 }
  0xba   : > { %8964 = shalt.err (!%p8961_p2)
}
  0xbb   : > { %s8965_s24 = scalar_lea.vmem %s503_s10, 4096  ;;  %p8973_p4 = scmp.lt.s32.totalorder %s503_s10, %s503_s10 }
  0xbc   : > { %p8966_p5 = scmp.ne.s32.totalorder %s503_s10, %s8965_s24  ;;  %p8974_p10 = scmp.lt.s32.totalorder %s8965_s24, %s8965_s24 }
  0xbe   : > { %p8968_p7 = pnand %p8966_p5, %p9352_p8  ;;  %p8975_p11 = por %p8974_p10, %p8973_p4 }
  0xc0   : > { %p8969_p9 = pneg %p8968_p7 }
  0xc2   : > { %p8976_p12 = pnand %p8975_p11, %p8969_p9 }
  0xc4   : > { %8979 = shalt.err (!%p8976_p12)
}
  0xc5   : > { %8251 = dma.hbm_to_vmem [thread:$0]  (!%p9336_p6), %s10793_s6, 4096, %s503_s10, [#allocation17], %s9191_s23, %s9191_s23, %s9192_s16  }
  0xc6   : > { %s8980_s12 = scalar_lea.hbm %s10751_s8, 64 }
  0xc7   : > { %p8981_p1 = scmp.ne.s32.totalorder %s10751_s8, %s8980_s12  ;;  %p8987_p0 = scmp.lt.u32.totalorder %s8980_s12, %s10751_s8 }
  0xc9   : > { %p8983_p3 = pnand %p8981_p1, %p9352_p8 }
  0xcb   : > { %p8984_p13 = pneg %p8983_p3 }
  0xcd   : > { %p8989_p2 = pnand %p8987_p0, %p8984_p13 }
  0xcf   : > { %8992 = shalt.err (!%p8989_p2)
}
  0xd0   : > { %s8993_s14 = scalar_lea.vmem %s530_s15, 64  ;;  %p9001_p4 = scmp.lt.s32.totalorder %s530_s15, %s530_s15 }
  0xd1   : > { %p8994_p5 = scmp.ne.s32.totalorder %s530_s15, %s8993_s14  ;;  %p9002_p10 = scmp.lt.s32.totalorder %s8993_s14, %s8993_s14 }
  0xd3   : > { %p8996_p7 = pnand %p8994_p5, %p9352_p8  ;;  %p9003_p11 = por %p9002_p10, %p9001_p4 }
  0xd5   : > { %p8997_p9 = pneg %p8996_p7 }
  0xd7   : > { %p9004_p12 = pnand %p9003_p11, %p8997_p9 }
  0xd9   : > { %9007 = shalt.err (!%p9004_p12)
}
  0xda   : > { %8257 = dma.hbm_to_vmem [thread:$0]  (!%p9336_p6), %s10751_s8, 64, %s530_s15, [#allocation20]  }
  0xdb   : > { %s9197_s22 = smov [#allocation22]   ;;  %s9008_s12 = scalar_lea.hbm %s10752_s9, 4096 }
  0xdc   : > { %s539_s2 = sshll.u32 %s9197_s22, 4  ;;  %p9009_p1 = scmp.ne.s32.totalorder %s10752_s9, %s9008_s12  ;;  %s540_s2 = int_to_ptr.vmem [resolvable:$true] %s539_s2 }
  0xdd   : > { %p9015_p0 = scmp.lt.u32.totalorder %s9008_s12, %s10752_s9 }
  0xde   : > { %p9011_p3 = pnand %p9009_p1, %p9352_p8 }
  0xe0   : > { %p9012_p13 = pneg %p9011_p3 }
  0xe2   : > { %p9017_p2 = pnand %p9015_p0, %p9012_p13 }
  0xe4   : > { %9020 = shalt.err (!%p9017_p2)
}
  0xe5   : > { %s9021_s15 = scalar_lea.vmem %s540_s2, 4096  ;;  %p9029_p4 = scmp.lt.s32.totalorder %s540_s2, %s540_s2 }
  0xe6   : > { %p9022_p5 = scmp.ne.s32.totalorder %s540_s2, %s9021_s15  ;;  %p9030_p10 = scmp.lt.s32.totalorder %s9021_s15, %s9021_s15 }
  0xe8   : > { %p9024_p7 = pnand %p9022_p5, %p9352_p8  ;;  %p9031_p11 = por %p9030_p10, %p9029_p4 }
  0xea   : > { %p9025_p9 = pneg %p9024_p7 }
  0xec   : > { %p9032_p12 = pnand %p9031_p11, %p9025_p9 }
  0xee   : > { %9035 = shalt.err (!%p9032_p12)
}
  0xef   : > { %8260 = dma.hbm_to_vmem [thread:$0]  (!%p9336_p6), %s10752_s9, 4096, %s540_s2, [#allocation23], %s9191_s23, %s9191_s23, %s9192_s16  }
  0xf0   : > { %s5859_s20 = sadd.s32 4294967294, %s9186_s29   ;;  %s9529_s19 = sadd.s32 1, %s9186_s29  }
  0xf1   : > { %s46_s24 = ssub.s32 %s9186_s29, %s9529_s19  ;;  %s49_s22 = sadd.s32 1, %s9182_s28 }
  0xf2   : > { %p47_p8 = scmp.eq.s32.totalorder %s46_s24, 0  ;;  %p56_p1 = scmp.ne.s32.totalorder %s9182_s28, %s9178_s27 }
  0xf3   : > { %p57_p3 = scmp.eq.s32.totalorder %s9186_s29, 0  ;;  %p62_p13 = scmp.ne.s32.totalorder %s9178_s27, %s9174_s26 }
  0xf4   : > { %s9540_s13 = scalar_select %p47_p8, %s9182_s28, %s49_s22  }
  0xf5   : > { %p9542_p0 = por %p57_p3, %p56_p1  ;;  %p10795_p2 = scmp.eq.s32.totalorder %s9320_s30, 0 }
  0xf6   : > { %p427_p5 = scmp.eq.s32.totalorder %s9320_s30, 1  ;;  %p433_p7 = scmp.eq.s32.totalorder %s5859_s20, 1 }
  0xf7   : > { %p9548_p6 = por %p10795_p2, %p62_p13  ;;  %p8280_p9 = scmp.lt.s32.totalorder %s9186_s29, 2 }
  0xf8   : > { %s9555_s16 = sand.u32 1, %s9182_s28   ;;  %p9557_p4 = por %p427_p5, %p56_p1 }
  0xf9   : > { %s10796_s23 = scalar_select %p9548_p6, 1, 0 }
  0xfa   : > { %s10797_s2 = scalar_select %p9557_p4, 1, 0 }
  0xfb   : > { %p9561_p10 = por %p433_p7, %p62_p13  ;;  %s5870_s21 = sshll.u32 %s9555_s16, 3 }
  0xfc   : > { %s5871_s17 = sshll.u32 %s9186_s29, 7  ;;  %s10799_s15 = sld [smem:[#allocation33_spill]] }
  0xfd   : > { %s10798_s12 = scalar_select %p9561_p10, 1, 0 }
  0xfe   : > { %s578_s10 = scalar_lea.vmem [#allocation7], %s5870_s21  ;;  %p9576_p11 = pnand %p8280_p9, %p9542_p0 }
  0xff   : > { %s585_s20 = sshll.u32 %s578_s10, 4  ;;  %s575_s1 = scalar_lea.sflag [#allocation8], %s9555_s16  ;;  %s9572_s20 = int_to_ptr.vmem [resolvable:$true] %s585_s20 }
 0x100   : > { %p9038_p8 = pneg %p9576_p11 }
 0x102   : > { %s9570_s14 = scalar_lea.hbm %s10799_s15, %s5871_s17  ;;  %s9041_s25 = scalar_lea.hbm %s10799_s15, 256 }
 0x103   : > { %s9036_s17 = scalar_lea.hbm %s9570_s14, 128  ;;  %p9042_p13 = scmp.lt.u32.totalorder %s9570_s14, %s10799_s15 }
 0x104   : > { %p9037_p12 = scmp.ne.s32.totalorder %s9570_s14, %s9036_s17  ;;  %p9043_p0 = scmp.lt.u32.totalorder %s9041_s25, %s9036_s17 }
 0x105   : > { %p9045_p5 = scmp.lt.u32.totalorder %s9036_s17, %s9570_s14 }
 0x106   : > { %p9039_p1 = pnand %p9038_p8, %p9037_p12  ;;  %p9044_p2 = por %p9043_p0, %p9042_p13 }
 0x108   : > { %p9040_p3 = pneg %p9039_p1  ;;  %p9046_p7 = por %p9045_p5, %p9044_p2 }
 0x10a   : > { %p9047_p9 = pnand %p9046_p7, %p9040_p3 }
 0x10c   : > { %9050 = shalt.err (!%p9047_p9)
}
 0x10d   : > { %s9051_s22 = scalar_lea.vmem %s9572_s20, 128  ;;  %s9198_s21 = smov [#allocation7]  }
 0x10e   : > { %p9052_p12 = scmp.ne.s32.totalorder %s9572_s20, %s9051_s22  ;;  %s9056_s0 = sshll.u32 %s9198_s21, 4  ;;  %s9057_s0 = int_to_ptr.vmem [resolvable:$false] %s9056_s0 }
 0x10f   : > { %s9058_s4 = scalar_lea.vmem %s9057_s0, 256  ;;  %p9059_p4 = scmp.lt.s32.totalorder %s9572_s20, %s9057_s0 }
 0x110   : > { %p9054_p1 = pnand %p9052_p12, %p9038_p8  ;;  %p9060_p13 = scmp.lt.s32.totalorder %s9058_s4, %s9051_s22 }
 0x112   : > { %p9055_p10 = pneg %p9054_p1  ;;  %p9061_p0 = por %p9060_p13, %p9059_p4 }
 0x114   : > { %p9062_p2 = pnand %p9061_p0, %p9055_p10 }
 0x116   : > { %9065 = shalt.err (!%p9062_p2)
}
 0x117   : > { %8264 = dma.hbm_to_vmem [thread:$0]  (!%p9576_p11), %s9570_s14, 128, %s9572_s20, %s575_s1  }
 0x118   : > { %s5873_s17 = sshll.u32 %s9186_s29, 5  ;;  %s10801_s21 = sld [smem:[#allocation34_spill]] }
 0x119   : > { %s10802_s0 = sshll.u32 %s9555_s16, 1  ;;  %s10803_s5 = sand.u32 1, %s9186_s29  }
 0x11a   : > { %s596_s22 = scalar_lea.vmem [#allocation10], %s10802_s0  ;;  %s593_s6 = scalar_lea.sflag [#allocation11], %s10803_s5 }
 0x11b   : > { %s603_s4 = sshll.u32 %s596_s22, 4  ;;  %s604_s4 = int_to_ptr.vmem [resolvable:$true] %s603_s4 }
 0x11e   : > { %s9612_s3 = scalar_lea.hbm %s10801_s21, %s5873_s17  ;;  %s9071_s1 = scalar_lea.hbm %s10801_s21, 64 }
 0x11f   : > { %s9066_s7 = scalar_lea.hbm %s9612_s3, 32  ;;  %p9072_p5 = scmp.lt.u32.totalorder %s9612_s3, %s10801_s21 }
 0x120   : > { %p9067_p4 = scmp.ne.s32.totalorder %s9612_s3, %s9066_s7  ;;  %p9073_p7 = scmp.lt.u32.totalorder %s9071_s1, %s9066_s7 }
 0x121   : > { %p9075_p12 = scmp.lt.u32.totalorder %s9066_s7, %s9612_s3 }
 0x122   : > { %p9069_p10 = pnand %p9067_p4, %p9038_p8  ;;  %p9074_p9 = por %p9073_p7, %p9072_p5 }
 0x124   : > { %p9070_p3 = pneg %p9069_p10  ;;  %p9076_p1 = por %p9075_p12, %p9074_p9 }
 0x126   : > { %p9077_p13 = pnand %p9076_p1, %p9070_p3 }
 0x128   : > { %9080 = shalt.err (!%p9077_p13)
}
 0x129   : > { %s9081_s5 = scalar_lea.vmem %s604_s4, 32  ;;  %s9199_s25 = smov [#allocation10]  }
 0x12a   : > { %p9082_p0 = scmp.ne.s32.totalorder %s604_s4, %s9081_s5  ;;  %s9086_s10 = sshll.u32 %s9199_s25, 4  ;;  %s9087_s10 = int_to_ptr.vmem [resolvable:$false] %s9086_s10 }
 0x12b   : > { %s9088_s0 = scalar_lea.vmem %s9087_s10, 64  ;;  %p9089_p10 = scmp.lt.s32.totalorder %s604_s4, %s9087_s10 }
 0x12c   : > { %p9084_p2 = pnand %p9082_p0, %p9038_p8  ;;  %p9090_p6 = scmp.lt.s32.totalorder %s9088_s0, %s9081_s5 }
 0x12e   : > { %p9085_p4 = pneg %p9084_p2  ;;  %p9091_p5 = por %p9090_p6, %p9089_p10 }
 0x130   : > { %p9092_p7 = pnand %p9091_p5, %p9085_p4 }
 0x132   : > { %9095 = shalt.err (!%p9092_p7)
}
 0x133   : > { %8267 = dma.hbm_to_vmem [thread:$0]  (!%p9576_p11), %s9612_s3, 32, %s604_s4, %s593_s6  }
 0x134   : > { %p10804_p3 = scmp.ne.s32.totalorder %s10785_s18, 0 }
 0x135   : > { %s9640_s7 = sand.u32 (!%p10804_p3), 1, %s9178_s27   ;;  %p10805_p6 = scmp.ne.s32.totalorder (!%p10804_p3), %s10796_s23, 0 }
 0x136   : > { %612 = sbr.rel (%p10804_p3) target bundleno = 6366 (0x18de), region = 88  ;;  %s5875_s22 = sshll.u32 (!%p10804_p3), %s9640_s7, 3 }
 0x137   : > { %s615_s14 = scalar_lea.sflag (!%p10804_p3), [#allocation8], %s9640_s7  ;;  %s9644_s20 = scalar_lea.vmem (!%p10804_p3), [#allocation7], %s5875_s22 }
 0x13d   : > { %9141 = dma.done.wait (%p10805_p6), %s615_s14, 128  }
 0x13e   : > { %9143 = vsyncadd (%p10805_p6), %s615_s14, 4294967168  ;;  %s623_s3 = sand.u32 1, %s9320_s30   ;;  %s5876_s6 = sshll.u32 %s9640_s7, 1 }
 0x13f   : > { %s624_s18 = scalar_lea.sflag [#allocation11], %s623_s3  ;;  %s9652_s24 = scalar_lea.vmem [#allocation10], %s5876_s6 }
 0x140   : > { %9145 = dma.done.wait (%p10805_p6), %s624_s18, 32  }
 0x141   : > { %9147 = vsyncadd (%p10805_p6), %s624_s18, 4294967264  ;;  %p10806_p11 = scmp.eq.s32.totalorder %s9320_s30, 0 }
 0x143   : > { %9149 = dma.done.wait (%p10806_p11), [#allocation11], 4096   ;;  %p10807_p8 = pmov %p10806_p11 }
 0x145   : > { %9151 = vsyncadd (%p10807_p8), [#allocation11], 4294963200  ;;  %p10808_p9 = pmov %p10807_p8 }
 0x146   : > { %p10809_p12 = pmov %p10807_p8 }
 0x147   : > { %9153 = dma.done.wait (%p10808_p9), [#allocation14], 4160  }
 0x148   : > { %9155 = vsyncadd (%p10809_p12), [#allocation14], 4294963136  ;;  %p10810_p1 = pmov %p10807_p8 }
 0x14a   : > { %9157 = dma.done.wait (%p10810_p1), [#allocation17], 8192   ;;  %p10811_p13 = pmov %p10810_p1 }
 0x14b   : > { %p10812_p0 = pmov %p10810_p1 }
 0x14c   : > { %9159 = vsyncadd (%p10811_p13), [#allocation17], 4294959104 }
 0x14d   : > { %9161 = dma.done.wait (%p10812_p0), [#allocation20], 4160   ;;  %p10813_p2 = pmov %p10812_p0 }
 0x14e   : > { %p10814_p4 = pmov %p10812_p0 }
 0x14f   : > { %9163 = vsyncadd (%p10813_p2), [#allocation20], 4294963136 }
 0x150   : > { %9165 = dma.done.wait (%p10814_p4), [#allocation23], 4096   ;;  %p10815_p10 = pmov %p10812_p0 }
 0x151   : > { %v9200_v1 = vmov 0.0   ;;  %v8338_v2 = vld [vmem:[#allocation12 + $0x4] ss:$16 sps:$4 sm:$0xff]   ;;  %v8340_v3 = vld [vmem:[#allocation12 + $0xc] ss:$16 sps:$4 sm:$0xff]   ;;  %vm9202_vm2 = vmmov 0  }
 0x152   : > { %9167 = vsyncadd (%p10815_p10), [#allocation23], 4294963200  ;;  %897 = vmatprep.mubr.f32.mxu0 %v9200_v1  ;;  %968 = vmatprep.mubr.f32.mxu1 %v9200_v1  ;;  %v8342_v4 = vld [vmem:[#allocation12] ss:$16 sps:$4 sm:$0xff]   ;;  %v8343_v5 = vld [vmem:[#allocation12 + $0x8] ss:$16 sps:$4 sm:$0xff]  }
 0x153   : > { %6202 = vmatprep.subr.bf16.mxu0 %v8338_v2  ;;  %6234 = vmatprep.subr.bf16.mxu1 %v8340_v3  ;;  %v8344_v6 = vld [vmem:[#allocation12 + $0x24] ss:$16 sps:$4 sm:$0xff]   ;;  %v8346_v7 = vld [vmem:[#allocation12 + $0x2c] ss:$16 sps:$4 sm:$0xff]   ;;  %v8348_v8 = vld [vmem:[#allocation12 + $0x20] ss:$16 sps:$4 sm:$0xff]  }
 0x154   : > { %6204 = vmatpush1.bf16.msra.mxu0 %v8342_v4  ;;  %6236 = vmatpush1.bf16.msra.mxu1 %v8343_v5  ;;  %v8349_v9 = vld [vmem:[#allocation12 + $0x28] ss:$16 sps:$4 sm:$0xff]   ;;  %v8350_v10 = vld [vmem:[#allocation12 + $0x44] ss:$16 sps:$4 sm:$0xff]   ;;  %v8352_v11 = vld [vmem:[#allocation12 + $0x4c] ss:$16 sps:$4 sm:$0xff]  }
 0x155   : > { %6206 = vmatprep.subr.bf16.mxu0 %v8344_v6  ;;  %6238 = vmatprep.subr.bf16.mxu1 %v8346_v7  ;;  %v8354_v12 = vld [vmem:[#allocation12 + $0x40] ss:$16 sps:$4 sm:$0xff]   ;;  %v8355_v13 = vld [vmem:[#allocation12 + $0x48] ss:$16 sps:$4 sm:$0xff]   ;;  %v8356_v14 = vld [vmem:[#allocation12 + $0x64] ss:$16 sps:$4 sm:$0xff]  }
 0x156   : > { %v8358_v15 = vld [vmem:[#allocation12 + $0x6c] ss:$16 sps:$4 sm:$0xff]   ;;  %v8360_v16 = vld [vmem:[#allocation12 + $0x60] ss:$16 sps:$4 sm:$0xff]   ;;  %v8361_v17 = vld [vmem:[#allocation12 + $0x68] ss:$16 sps:$4 sm:$0xff]  }
 0x157   : > { %v8362_v18 = vld [vmem:[#allocation12 + $0x84] ss:$16 sps:$4 sm:$0xff]   ;;  %v8364_v19 = vld [vmem:[#allocation12 + $0x8c] ss:$16 sps:$4 sm:$0xff]   ;;  %v8366_v20 = vld [vmem:[#allocation12 + $0x80] ss:$16 sps:$4 sm:$0xff]  }
 0x158   : > { %6208 = vmatpush1.bf16.msra.mxu0 %v8348_v8  ;;  %6240 = vmatpush1.bf16.msra.mxu1 %v8349_v9  ;;  %v8367_v21 = vld [vmem:[#allocation12 + $0x88] ss:$16 sps:$4 sm:$0xff]   ;;  %v8368_v22 = vld [vmem:[#allocation12 + $0xa4] ss:$16 sps:$4 sm:$0xff]   ;;  %v8370_v23 = vld [vmem:[#allocation12 + $0xac] ss:$16 sps:$4 sm:$0xff]  }
 0x159   : > { %6210 = vmatprep.subr.bf16.mxu0 %v8350_v10  ;;  %6242 = vmatprep.subr.bf16.mxu1 %v8352_v11  ;;  %v8372_v24 = vld [vmem:[#allocation12 + $0xa0] ss:$16 sps:$4 sm:$0xff]   ;;  %v8373_v25 = vld [vmem:[#allocation12 + $0xa8] ss:$16 sps:$4 sm:$0xff]   ;;  %v8374_v26 = vld [vmem:[#allocation12 + $0xc4] ss:$16 sps:$4 sm:$0xff]  }
 0x15a   : > { %v8376_v27 = vld [vmem:[#allocation12 + $0xcc] ss:$16 sps:$4 sm:$0xff]   ;;  %v8378_v28 = vld [vmem:[#allocation12 + $0xc0] ss:$16 sps:$4 sm:$0xff]   ;;  %v8379_v29 = vld [vmem:[#allocation12 + $0xc8] ss:$16 sps:$4 sm:$0xff]  }
 0x15b   : > { %v8380_v30 = vld [vmem:[#allocation12 + $0xe4] ss:$16 sps:$4 sm:$0xff]   ;;  %v8382_v31 = vld [vmem:[#allocation12 + $0xec] ss:$16 sps:$4 sm:$0xff]   ;;  %v8384_v32 = vld [vmem:[#allocation12 + $0xe0] ss:$16 sps:$4 sm:$0xff]  }
 0x15c   : > { %6212 = vmatpush1.bf16.msra.mxu0 %v8354_v12  ;;  %6244 = vmatpush1.bf16.msra.mxu1 %v8355_v13  ;;  %v8385_v33 = vld [vmem:[#allocation12 + $0xe8] ss:$16 sps:$4 sm:$0xff]   ;;  %v8386_v34 = vld [vmem:[#allocation13 + $0x4] ss:$16 sps:$4 sm:$0xff]   ;;  %v8389_v35 = vld [vmem:[#allocation13 + $0xc] ss:$16 sps:$4 sm:$0xff]  }
 0x15d   : > { %6214 = vmatprep.subr.bf16.mxu0 %v8356_v14  ;;  %6246 = vmatprep.subr.bf16.mxu1 %v8358_v15  ;;  %v9681_v36 = vld [vmem:[%s9644_s20] sm:$0xff]  ;;  %vm5154_vm3 = vcmask 64512   ;;  %s10818_s1 = sld [smem:[#allocation41_spill]]  ;;  %s10819_s17 = sld [smem:[#allocation42_spill]]  ;;  %vm5450_vm4 = vcmask 7168   ;;  %vm5594_vm5 = vcmask 1043456  }
 0x15e   : > { %v8388_v37 = vld [vmem:[#allocation13] ss:$16 sps:$4 sm:$0xff]   ;;  %v8391_v38 = vld [vmem:[#allocation13 + $0x8] ss:$16 sps:$4 sm:$0xff]   ;;  %v8392_v39 = vld [vmem:[#allocation13 + $0x24] ss:$16 sps:$4 sm:$0xff]  }
 0x15f   : > { %v8395_v40 = vld [vmem:[#allocation13 + $0x2c] ss:$16 sps:$4 sm:$0xff]   ;;  %v8394_v41 = vld [vmem:[#allocation13 + $0x20] ss:$16 sps:$4 sm:$0xff]   ;;  %v8397_v42 = vld [vmem:[#allocation13 + $0x28] ss:$16 sps:$4 sm:$0xff]  }
 0x160   : > { %6216 = vmatpush1.bf16.msra.mxu0 %v8360_v16  ;;  %6248 = vmatpush1.bf16.msra.mxu1 %v8361_v17  ;;  %v8398_v43 = vld [vmem:[#allocation13 + $0x44] ss:$16 sps:$4 sm:$0xff]   ;;  %v8401_v44 = vld [vmem:[#allocation13 + $0x4c] ss:$16 sps:$4 sm:$0xff]   ;;  %v8400_v45 = vld [vmem:[#allocation13 + $0x40] ss:$16 sps:$4 sm:$0xff]  }
 0x161   : > { %6218 = vmatprep.subr.bf16.mxu0 %v8362_v18  ;;  %6250 = vmatprep.subr.bf16.mxu1 %v8364_v19  ;;  %v8403_v46 = vld [vmem:[#allocation13 + $0x48] ss:$16 sps:$4 sm:$0xff]   ;;  %v8404_v47 = vld [vmem:[#allocation13 + $0x64] ss:$16 sps:$4 sm:$0xff]   ;;  %v8407_v48 = vld [vmem:[#allocation13 + $0x6c] ss:$16 sps:$4 sm:$0xff]  }
 0x162   : > { %v8406_v49 = vld [vmem:[#allocation13 + $0x60] ss:$16 sps:$4 sm:$0xff]   ;;  %v8409_v50 = vld [vmem:[#allocation13 + $0x68] ss:$16 sps:$4 sm:$0xff]   ;;  %v8410_v51 = vld [vmem:[#allocation13 + $0x84] ss:$16 sps:$4 sm:$0xff]  }
 0x163   : > { %v8413_v52 = vld [vmem:[#allocation13 + $0x8c] ss:$16 sps:$4 sm:$0xff]   ;;  %v8412_v53 = vld [vmem:[#allocation13 + $0x80] ss:$16 sps:$4 sm:$0xff]   ;;  %v8415_v54 = vld [vmem:[#allocation13 + $0x88] ss:$16 sps:$4 sm:$0xff]  }
 0x164   : > { %6220 = vmatpush1.bf16.msra.mxu0 %v8366_v20  ;;  %6252 = vmatpush1.bf16.msra.mxu1 %v8367_v21  ;;  %v8416_v55 = vld [vmem:[#allocation13 + $0xa4] ss:$16 sps:$4 sm:$0xff]   ;;  %v8419_v56 = vld [vmem:[#allocation13 + $0xac] ss:$16 sps:$4 sm:$0xff]   ;;  %v8418_v57 = vld [vmem:[#allocation13 + $0xa0] ss:$16 sps:$4 sm:$0xff]  }
 0x165   : > { %6222 = vmatprep.subr.bf16.mxu0 %v8368_v22  ;;  %6254 = vmatprep.subr.bf16.mxu1 %v8370_v23  ;;  %v8421_v58 = vld [vmem:[#allocation13 + $0xa8] ss:$16 sps:$4 sm:$0xff]   ;;  %v8422_v59 = vld [vmem:[#allocation13 + $0xc4] ss:$16 sps:$4 sm:$0xff]   ;;  %v8425_v60 = vld [vmem:[#allocation13 + $0xcc] ss:$16 sps:$4 sm:$0xff]  }
 0x166   : > { %v8424_v61 = vld [vmem:[#allocation13 + $0xc0] ss:$16 sps:$4 sm:$0xff]   ;;  %v8427_v62 = vld [vmem:[#allocation13 + $0xc8] ss:$16 sps:$4 sm:$0xff]   ;;  %v8428_v63 = vld [vmem:[#allocation13 + $0xe4] ss:$16 sps:$4 sm:$0xff]  }
 0x167   : > { %v8431_v0 = vld [vmem:[#allocation13 + $0xec] ss:$16 sps:$4 sm:$0xff]   ;;  %v8430_v2 = vld [vmem:[#allocation13 + $0xe0] ss:$16 sps:$4 sm:$0xff]   ;;  %v8433_v3 = vld [vmem:[#allocation13 + $0xe8] ss:$16 sps:$4 sm:$0xff]  }
 0x168   : > { %6224 = vmatpush1.bf16.msra.mxu0 %v8372_v24  ;;  %6256 = vmatpush1.bf16.msra.mxu1 %v8373_v25  ;;  %v9687_v4 = vld [vmem:[#allocation16 + $0x4] ss:$16 sps:$4 sm:$0xff]   ;;  %v9689_v5 = vld [vmem:[#allocation16 + $0xc] ss:$16 sps:$4 sm:$0xff]   ;;  %v9691_v6 = vld [vmem:[#allocation16] ss:$16 sps:$4 sm:$0xff]  }
 0x169   : > { %6226 = vmatprep.subr.bf16.mxu0 %v8374_v26  ;;  %6258 = vmatprep.subr.bf16.mxu1 %v8376_v27  ;;  %v9693_v7 = vld [vmem:[#allocation16 + $0x8] ss:$16 sps:$4 sm:$0xff]   ;;  %v9695_v8 = vld [vmem:[#allocation16 + $0x24] ss:$16 sps:$4 sm:$0xff]   ;;  %v9697_v9 = vld [vmem:[#allocation16 + $0x2c] ss:$16 sps:$4 sm:$0xff]  }
 0x16a   : > { %v9701_v10 = vld [vmem:[#allocation16 + $0x20] ss:$16 sps:$4 sm:$0xff]   ;;  %v9703_v11 = vld [vmem:[#allocation16 + $0x28] ss:$16 sps:$4 sm:$0xff]   ;;  %v9707_v12 = vld [vmem:[#allocation16 + $0x44] ss:$16 sps:$4 sm:$0xff]  }
 0x16b   : > { %v9709_v13 = vld [vmem:[#allocation16 + $0x4c] ss:$16 sps:$4 sm:$0xff]   ;;  %v9715_v14 = vld [vmem:[#allocation16 + $0x40] ss:$16 sps:$4 sm:$0xff]   ;;  %v9717_v15 = vld [vmem:[#allocation16 + $0x48] ss:$16 sps:$4 sm:$0xff]  }
 0x16c   : > { %6228 = vmatpush1.bf16.msra.mxu0 %v8378_v28  ;;  %6260 = vmatpush1.bf16.msra.mxu1 %v8379_v29  ;;  %v9721_v16 = vld [vmem:[#allocation16 + $0x64] ss:$16 sps:$4 sm:$0xff]   ;;  %v9723_v17 = vld [vmem:[#allocation16 + $0x6c] ss:$16 sps:$4 sm:$0xff]   ;;  %v9729_v18 = vld [vmem:[#allocation16 + $0x60] ss:$16 sps:$4 sm:$0xff]  }
 0x16d   : > { %6230 = vmatprep.subr.bf16.mxu0 %v8380_v30  ;;  %6262 = vmatprep.subr.bf16.mxu1 %v8382_v31  ;;  %v9731_v19 = vld [vmem:[#allocation16 + $0x68] ss:$16 sps:$4 sm:$0xff]   ;;  %v9733_v20 = vld [vmem:[#allocation16 + $0x84] ss:$16 sps:$4 sm:$0xff]   ;;  %v9735_v21 = vld [vmem:[#allocation16 + $0x8c] ss:$16 sps:$4 sm:$0xff]  }
 0x16e   : > { %v9741_v22 = vld [vmem:[#allocation16 + $0x80] ss:$16 sps:$4 sm:$0xff]   ;;  %v9743_v23 = vld [vmem:[#allocation16 + $0x88] ss:$16 sps:$4 sm:$0xff]   ;;  %v9745_v24 = vld [vmem:[#allocation16 + $0xa4] ss:$16 sps:$4 sm:$0xff]  }
 0x16f   : > { %v9747_v25 = vld [vmem:[#allocation16 + $0xac] ss:$16 sps:$4 sm:$0xff]   ;;  %v9753_v26 = vld [vmem:[#allocation16 + $0xa0] ss:$16 sps:$4 sm:$0xff]   ;;  %v9755_v27 = vld [vmem:[#allocation16 + $0xa8] ss:$16 sps:$4 sm:$0xff]  }
 0x170   : > { %6232 = vmatpush1.bf16.msra.mxu0 %v8384_v32  ;;  %6264 = vmatpush1.bf16.msra.mxu1 %v8385_v33  ;;  %v9757_v28 = vld [vmem:[#allocation16 + $0xc4] ss:$16 sps:$4 sm:$0xff]   ;;  %v9759_v29 = vld [vmem:[#allocation16 + $0xcc] ss:$16 sps:$4 sm:$0xff]   ;;  %v9765_v30 = vld [vmem:[#allocation16 + $0xc0] ss:$16 sps:$4 sm:$0xff]  }
 0x171   : > { %6266 = vmatprep.subr.bf16.mxu0 %v8386_v34  ;;  %6298 = vmatprep.subr.bf16.mxu1 %v8389_v35  ;;  %v9767_v31 = vld [vmem:[#allocation16 + $0xc8] ss:$16 sps:$4 sm:$0xff]   ;;  %v9769_v32 = vld [vmem:[#allocation16 + $0xe4] ss:$16 sps:$4 sm:$0xff]   ;;  %v9771_v33 = vld [vmem:[#allocation16 + $0xec] ss:$16 sps:$4 sm:$0xff]  }
 0x172   : > { %v9777_v34 = vld [vmem:[#allocation16 + $0xe0] ss:$16 sps:$4 sm:$0xff]   ;;  %v9779_v35 = vld [vmem:[#allocation16 + $0xe8] ss:$16 sps:$4 sm:$0xff]   ;;  %s10820_s10 = sld [smem:[#allocation44_spill]]  ;;  %s10821_s18 = sld [smem:[#allocation43_spill]] }
 0x173   : > { %898 = vmatmul.mubr.f32.vlgmr.msra.gmra.mrb[0].mxu0 %v9681_v36  ;;  %969 = vmatmul.mubr.f32.vlgmr.msra.gmra.mrb[0].mxu1 %v9681_v36  ;;  %vm5590_vm6 = vcmask 162816   ;;  %s10822_s4 = sld [smem:[#allocation45_spill]]  ;;  %vm5668_vm7 = vcmask 24576   ;;  %s5905_s16 = sshll.u32 %s9320_s30, 4 }
 0x174   : > { %6268 = vmatpush1.bf16.msra.mxu0 %v8388_v37  ;;  %6300 = vmatpush1.bf16.msra.mxu1 %v8391_v38  ;;  %s713_s5 = scalar_lea.vmem [#allocation24], %s9640_s7  ;;  %s10823_s14 = sld [smem:[#allocation46_spill]] }
 0x175   : > { %6270 = vmatprep.subr.bf16.mxu0 %v8392_v39  ;;  %6302 = vmatprep.subr.bf16.mxu1 %v8395_v40  ;;  %v811_v40 = vld [vmem:[#allocation15] sm:$0xf]  ;;  %s5694_s25 = sshll.u32 %s713_s5, 4  ;;  %s5682_s3 = scalar_lea.sflag [#allocation9], %s9640_s7  ;;  %s10700_s25 = int_to_ptr.vmem [resolvable:$true] %s5694_s25 }
 0x176   : > { %1139 = vmatprep.mubr.f32.mxu0 %v9200_v1  ;;  %1210 = vmatprep.mubr.f32.mxu1 %v9200_v1  ;;  %s9096_s6 = scalar_lea.vmem %s10700_s25, 16  ;;  %p10824_p7 = scmp.ne.s32.totalorder %s10797_s2, 0 }
 0x177   : > { %p9097_p5 = scmp.ne.s32.totalorder %s10700_s25, %s9096_s6  ;;  %s9205_s30 = smov [#allocation24]  }
 0x178   : > { %6272 = vmatpush1.bf16.msra.mxu0 %v8394_v41  ;;  %6304 = vmatpush1.bf16.msra.mxu1 %v8397_v42 }
 0x179   : > { %6274 = vmatprep.subr.bf16.mxu0 %v8398_v43  ;;  %6306 = vmatprep.subr.bf16.mxu1 %v8401_v44  ;;  %p9098_p3 = pnand %p9097_p5, %p10824_p7 }
 0x17a   : > { %s10698_s20 = scalar_lea.hbm %s10823_s14, %s5905_s16 }
 0x17b   : > { %p9099_p6 = pneg %p9098_p3 }
 0x17c   : > { %6276 = vmatpush1.bf16.msra.mxu0 %v8400_v45  ;;  %6308 = vmatpush1.bf16.msra.mxu1 %v8403_v46 }
 0x17d   : > { %6278 = vmatprep.subr.bf16.mxu0 %v8404_v47  ;;  %6310 = vmatprep.subr.bf16.mxu1 %v8407_v48 }
 0x180   : > { %6280 = vmatpush1.bf16.msra.mxu0 %v8406_v49  ;;  %6312 = vmatpush1.bf16.msra.mxu1 %v8409_v50 }
 0x181   : > { %6282 = vmatprep.subr.bf16.mxu0 %v8410_v51  ;;  %6314 = vmatprep.subr.bf16.mxu1 %v8413_v52 }
 0x184   : > { %6284 = vmatpush1.bf16.msra.mxu0 %v8412_v53  ;;  %6316 = vmatpush1.bf16.msra.mxu1 %v8415_v54 }
 0x185   : > { %6286 = vmatprep.subr.bf16.mxu0 %v8416_v55  ;;  %6318 = vmatprep.subr.bf16.mxu1 %v8419_v56 }
 0x188   : > { %6288 = vmatpush1.bf16.msra.mxu0 %v8418_v57  ;;  %6320 = vmatpush1.bf16.msra.mxu1 %v8421_v58 }
 0x189   : > { %6290 = vmatprep.subr.bf16.mxu0 %v8422_v59  ;;  %6322 = vmatprep.subr.bf16.mxu1 %v8425_v60 }
 0x18c   : > { %6292 = vmatpush1.bf16.msra.mxu0 %v8424_v61  ;;  %6324 = vmatpush1.bf16.msra.mxu1 %v8427_v62 }
 0x18d   : > { %6294 = vmatprep.subr.bf16.mxu0 %v8428_v63  ;;  %6326 = vmatprep.subr.bf16.mxu1 %v8431_v0 }
 0x190   : > { %6296 = vmatpush1.bf16.msra.mxu0 %v8430_v2  ;;  %6328 = vmatpush1.bf16.msra.mxu1 %v8433_v3 }
 0x191   : > { %6330 = vmatprep.subr.bf16.mxu0 %v9687_v4  ;;  %6362 = vmatprep.subr.bf16.mxu1 %v9689_v5 }
 0x193   : > { %1140 = vmatmul.mubr.f32.vlgmr.msra.gmra.mrb[2].mxu0 %v9681_v36  ;;  %1211 = vmatmul.mubr.f32.vlgmr.msra.gmra.mrb[2].mxu1 %v9681_v36  ;;  %v813_v36 = vlaneseq }
 0x194   : > { %6332 = vmatpush1.bf16.msra.mxu0 %v9691_v6  ;;  %6364 = vmatpush1.bf16.msra.mxu1 %v9693_v7 }
 0x195   : > { %6334 = vmatprep.subr.bf16.mxu0 %v9695_v8  ;;  %6366 = vmatprep.subr.bf16.mxu1 %v9697_v9  ;;  %v9826_v37 = vshrl.u32 %v813_v36, 7  ;;  %vm9842_vm0 = vcmp.lt.s32.totalorder %v813_v36, 512 }
 0x196   : > { %1440 = vmatprep.mubr.f32.mxu0 %v9200_v1  ;;  %1511 = vmatprep.mubr.f32.mxu1 %v9200_v1 }
 0x197   : > { %v9829_v38 = vsub.s32 0, %v9826_v37  ;;  %v823_v39 = vsub.s32 2, %v9826_v37  ;;  %v819_v41 = vsub.s32 1, %v9826_v37  ;;  %v827_v42 = vsub.s32 3, %v9826_v37 }
 0x198   : > { %6336 = vmatpush1.bf16.msra.mxu0 %v9701_v10  ;;  %6368 = vmatpush1.bf16.msra.mxu1 %v9703_v11 }
 0x199   : > { %6338 = vmatprep.subr.bf16.mxu0 %v9707_v12  ;;  %6370 = vmatprep.subr.bf16.mxu1 %v9709_v13  ;;  %v816_v43 = vrot.slane %v811_v40, %v9829_v38  ;;  %v824_v44 = vrot.slane %v811_v40, %v823_v39  ;;  %v820_v45 = vrot.slane %v811_v40, %v819_v41 }
 0x19a   : > { %v828_v46 = vrot.slane %v811_v40, %v827_v42 }
 0x19c   : > { %6340 = vmatpush1.bf16.msra.mxu0 %v9715_v14  ;;  %6372 = vmatpush1.bf16.msra.mxu1 %v9717_v15 }
 0x19d   : > { %6342 = vmatprep.subr.bf16.mxu0 %v9721_v16  ;;  %6374 = vmatprep.subr.bf16.mxu1 %v9723_v17 }
 0x1a0   : > { %6344 = vmatpush1.bf16.msra.mxu0 %v9729_v18  ;;  %6376 = vmatpush1.bf16.msra.mxu1 %v9731_v19 }
 0x1a1   : > { %6346 = vmatprep.subr.bf16.mxu0 %v9733_v20  ;;  %6378 = vmatprep.subr.bf16.mxu1 %v9735_v21 }
 0x1a4   : > { %6348 = vmatpush1.bf16.msra.mxu0 %v9741_v22  ;;  %6380 = vmatpush1.bf16.msra.mxu1 %v9743_v23 }
 0x1a5   : > { %6350 = vmatprep.subr.bf16.mxu0 %v9745_v24  ;;  %6382 = vmatprep.subr.bf16.mxu1 %v9747_v25 }
 0x1a8   : > { %6352 = vmatpush1.bf16.msra.mxu0 %v9753_v26  ;;  %6384 = vmatpush1.bf16.msra.mxu1 %v9755_v27 }
 0x1a9   : > { %6354 = vmatprep.subr.bf16.mxu0 %v9757_v28  ;;  %6386 = vmatprep.subr.bf16.mxu1 %v9759_v29 }
 0x1ac   : > { %6356 = vmatpush1.bf16.msra.mxu0 %v9765_v30  ;;  %6388 = vmatpush1.bf16.msra.mxu1 %v9767_v31 }
 0x1ad   : > { %6358 = vmatprep.subr.bf16.mxu0 %v9769_v32  ;;  %6390 = vmatprep.subr.bf16.mxu1 %v9771_v33 }
 0x1b0   : > { %6360 = vmatpush1.bf16.msra.mxu0 %v9777_v34  ;;  %6392 = vmatpush1.bf16.msra.mxu1 %v9779_v35 }
 0x1b1   : > { %6394 = vmatprep.subr.bf16.mxu0 %v9687_v4  ;;  %6426 = vmatprep.subr.bf16.mxu1 %v9689_v5 }
 0x1b3   : > { %1441 = vmatmul.mubr.f32.vlgmr.msra.gmra.mrb[4].mxu0 %v9200_v1  ;;  %1512 = vmatmul.mubr.f32.vlgmr.msra.gmra.mrb[4].mxu1 %v9200_v1 }
 0x1b4   : > { %6396 = vmatpush1.bf16.msra.mxu0 %v9691_v6  ;;  %6428 = vmatpush1.bf16.msra.mxu1 %v9693_v7 }
 0x1b5   : > { %6398 = vmatprep.subr.bf16.mxu0 %v9695_v8  ;;  %6430 = vmatprep.subr.bf16.mxu1 %v9697_v9 }
 0x1b6   : > { %1635 = vmatprep.mubr.f32.mxu0 %v9200_v1  ;;  %1706 = vmatprep.mubr.f32.mxu1 %v9200_v1 }
 0x1b8   : > { %6400 = vmatpush1.bf16.msra.mxu0 %v9701_v10  ;;  %6432 = vmatpush1.bf16.msra.mxu1 %v9703_v11 }
 0x1b9   : > { %6402 = vmatprep.subr.bf16.mxu0 %v9707_v12  ;;  %6434 = vmatprep.subr.bf16.mxu1 %v9709_v13 }
 0x1bc   : > { %6404 = vmatpush1.bf16.msra.mxu0 %v9715_v14  ;;  %6436 = vmatpush1.bf16.msra.mxu1 %v9717_v15 }
 0x1bd   : > { %6406 = vmatprep.subr.bf16.mxu0 %v9721_v16  ;;  %6438 = vmatprep.subr.bf16.mxu1 %v9723_v17 }
 0x1c0   : > { %6408 = vmatpush1.bf16.msra.mxu0 %v9729_v18  ;;  %6440 = vmatpush1.bf16.msra.mxu1 %v9731_v19 }
 0x1c1   : > { %6410 = vmatprep.subr.bf16.mxu0 %v9733_v20  ;;  %6442 = vmatprep.subr.bf16.mxu1 %v9735_v21 }
 0x1c4   : > { %6412 = vmatpush1.bf16.msra.mxu0 %v9741_v22  ;;  %6444 = vmatpush1.bf16.msra.mxu1 %v9743_v23 }
 0x1c5   : > { %6414 = vmatprep.subr.bf16.mxu0 %v9745_v24  ;;  %6446 = vmatprep.subr.bf16.mxu1 %v9747_v25 }
 0x1c8   : > { %6416 = vmatpush1.bf16.msra.mxu0 %v9753_v26  ;;  %6448 = vmatpush1.bf16.msra.mxu1 %v9755_v27 }
 0x1c9   : > { %6418 = vmatprep.subr.bf16.mxu0 %v9757_v28  ;;  %6450 = vmatprep.subr.bf16.mxu1 %v9759_v29 }
 0x1cc   : > { %6420 = vmatpush1.bf16.msra.mxu0 %v9765_v30  ;;  %6452 = vmatpush1.bf16.msra.mxu1 %v9767_v31 }
 0x1cd   : > { %6422 = vmatprep.subr.bf16.mxu0 %v9769_v32  ;;  %6454 = vmatprep.subr.bf16.mxu1 %v9771_v33 }
 0x1d0   : > { %6424 = vmatpush1.bf16.msra.mxu0 %v9777_v34  ;;  %6456 = vmatpush1.bf16.msra.mxu1 %v9779_v35 }
 0x1d1   : > { %6458 = vmatprep.subr.bf16.mxu0 %v9687_v4  ;;  %6490 = vmatprep.subr.bf16.mxu1 %v9689_v5 }
 0x246   : > { %v899_v47 = vpop.f32.mrb[0].mxu0  ;;  %v970_v48 = vpop.f32.mrb[0].mxu1 }
 0x247   : > { %v900_v49 = vadd.f32 %v899_v47, %v816_v43  ;;  %v971_v50 = vadd.f32 %v970_v48, %v824_v44  ;;  %v901_v51 = vpop.f32.mrb[1].mxu0  ;;  %v972_v52 = vpop.f32.mrb[1].mxu1 }
 0x248   : > { %v902_v53 = vadd.f32 %v901_v51, %v820_v45  ;;  %v973_v54 = vadd.f32 %v972_v52, %v828_v46 }
 0x249   : > { %975 = vst [vmem:[#allocation2] sm:$0xff] %v900_v49  ;;  %977 = vst [vmem:[#allocation2 + $0x10] sm:$0xff] %v971_v50 }
 0x24a   : > { %976 = vst [vmem:[#allocation2 + $0x8] sm:$0xff] %v902_v53  ;;  %978 = vst [vmem:[#allocation2 + $0x18] sm:$0xff] %v973_v54 }
 0x251   : > { %v1221_v60 = vld [vmem:[#allocation2] ss:$8 sm:$0xf]  ;;  %v1232_v61 = vld [vmem:[#allocation2 + $0x1] ss:$8 sm:$0xf] }
 0x252   : > { %v1239_v62 = vld [vmem:[#allocation2 + $0x2] ss:$8 sm:$0xf]  ;;  %v1246_v63 = vld [vmem:[#allocation2 + $0x3] ss:$8 sm:$0xf] }
 0x253   : > { %v1253_v0 = vld [vmem:[#allocation2 + $0x4] ss:$8 sm:$0xf]  ;;  %v1260_v2 = vld [vmem:[#allocation2 + $0x5] ss:$8 sm:$0xf] }
 0x254   : > { %v1267_v43 = vld [vmem:[#allocation2 + $0x6] ss:$8 sm:$0xf]  ;;  %v1274_v44 = vld [vmem:[#allocation2 + $0x7] ss:$8 sm:$0xf] }
 0x266   : > { %v1141_v55 = vpop.f32.mrb[2].mxu0  ;;  %v1212_v56 = vpop.f32.mrb[2].mxu1 }
 0x267   : > { %1217 = vst [vmem:[#allocation3] sm:$0xff] %v1141_v55  ;;  %1219 = vst [vmem:[#allocation3 + $0x10] sm:$0xff] %v1212_v56  ;;  %v1143_v57 = vpop.f32.mrb[3].mxu0  ;;  %v1214_v58 = vpop.f32.mrb[3].mxu1 }
 0x268   : > { %1218 = vst [vmem:[#allocation3 + $0x8] sm:$0xff] %v1143_v57  ;;  %1220 = vst [vmem:[#allocation3 + $0x18] sm:$0xff] %v1214_v58 }
 0x26f   : > { %v1223_v3 = vld [vmem:[#allocation3 + $0x7] ss:$8 sm:$0xf]  ;;  %v1234_v40 = vld [vmem:[#allocation3 + $0x6] ss:$8 sm:$0xf] }
 0x270   : > { %v1224_v45 = vadd.f32 %v1223_v3, %v1221_v60  ;;  %v1235_v46 = vadd.f32 %v1234_v40, %v1232_v61  ;;  %v1241_v47 = vld [vmem:[#allocation3 + $0x5] ss:$8 sm:$0xf]  ;;  %v1248_v48 = vld [vmem:[#allocation3 + $0x4] ss:$8 sm:$0xf] }
 0x271   : > { %v1242_v49 = vadd.f32 %v1241_v47, %v1239_v62  ;;  %v1249_v50 = vadd.f32 %v1248_v48, %v1246_v63  ;;  %v1255_v51 = vld [vmem:[#allocation3 + $0x3] ss:$8 sm:$0xf]  ;;  %v1262_v52 = vld [vmem:[#allocation3 + $0x2] ss:$8 sm:$0xf] }
 0x272   : > { %v1256_v53 = vadd.f32 %v1255_v51, %v1253_v0  ;;  %v1263_v54 = vadd.f32 %v1262_v52, %v1260_v2  ;;  %v1269_v55 = vld [vmem:[#allocation3 + $0x1] ss:$8 sm:$0xf]  ;;  %v1275_v56 = vld [vmem:[#allocation3] ss:$8 sm:$0xf] }
 0x273   : > { %1229 = vst.msk [vmem:[#allocation2] ss:$8 sm:$0xf] %vm9842_vm0, %v1224_v45  ;;  %1236 = vst.msk [vmem:[#allocation2 + $0x1] ss:$8 sm:$0xf] %vm9842_vm0, %v1235_v46  ;;  %v1270_v57 = vadd.f32 %v1269_v55, %v1267_v43  ;;  %v1276_v58 = vadd.f32 %v1275_v56, %v1274_v44 }
 0x274   : > { %1243 = vst.msk [vmem:[#allocation2 + $0x2] ss:$8 sm:$0xf] %vm9842_vm0, %v1242_v49  ;;  %1250 = vst.msk [vmem:[#allocation2 + $0x3] ss:$8 sm:$0xf] %vm9842_vm0, %v1249_v50 }
 0x275   : > { %1257 = vst.msk [vmem:[#allocation2 + $0x4] ss:$8 sm:$0xf] %vm9842_vm0, %v1256_v53  ;;  %1264 = vst.msk [vmem:[#allocation2 + $0x5] ss:$8 sm:$0xf] %vm9842_vm0, %v1263_v54 }
 0x276   : > { %1271 = vst.msk [vmem:[#allocation2 + $0x6] ss:$8 sm:$0xf] %vm9842_vm0, %v1270_v57  ;;  %1277 = vst.msk [vmem:[#allocation2 + $0x7] ss:$8 sm:$0xf] %vm9842_vm0, %v1276_v58 }
 0x277   : > { %v9201_v60 = vmov 1966171168  }
 0x278   : > { %v1525_v61 = vunpack.c.l.s4 %v9201_v60 }
 0x27a   : > { %v1526_v62 = vunpack.c.0.s8 %v1525_v61  ;;  %v1375_v49 = vld [vmem:[#allocation2] ss:$8 sm:$0xf] }
 0x27c   : > { %v9863_v63 = vsub.s32 %v1526_v62, %v9826_v37 }
 0x286   : > { %v1442_v0 = vpop.f32.mrb[4].mxu0  ;;  %v1513_v2 = vpop.f32.mrb[4].mxu1 }
 0x287   : > { %v1444_v3 = vpop.f32.mrb[5].mxu0  ;;  %v1515_v40 = vpop.f32.mrb[5].mxu1 }
 0x288   : > { %v1522_v43 = vcombine.low %v1442_v0, %v1444_v3  ;;  %v1523_v44 = vcombine.low %v1513_v2, %v1515_v40 }
 0x28a   : > { %v1530_v45 = vrot.slane %v1522_v43, %v9863_v63  ;;  %v1537_v46 = vrot.slane %v1523_v44, %v9863_v63 }
 0x28c   : > { %v1538_v47 = vcombine.low %v1530_v45, %v1537_v46 }
 0x28e   : > { %v1545_v48 = vrot.slane %v1538_v47, %v9863_v63 }
 0x290   : > { %v1547_v50 = vadd.f32 %v1545_v48, %v1375_v49 }
 0x292   : > { %v5885_v51 = vmul.f32 -1.442695, %v1547_v50  ;;  %v1555_v54 = vrot.slane %v1547_v50, 3 }
 0x294   : > { %8626 = vpow2.f32 %v5885_v51  ;;  %v1570_v51 = vld [vmem:[#allocation2 + $0x1] ss:$8 sm:$0xf] }
 0x29e   : > { %v8627_v52 = vpop.eup %8626 }
 0x29f   : > { %v1551_v53 = vadd.f32 1.0, %v8627_v52 }
 0x2a1   : > { %8628 = vrcp.f32 %v1551_v53 }
 0x2a2   : > { %8630 = vtanh.f32 %v1555_v54 }
 0x2ab   : > { %v8629_v55 = vpop.eup %8628 }
 0x2ac   : > { %v1559_v56 = vrot.slane %v8629_v55, 1  ;;  %v8631_v57 = vpop.eup %8630  ;;  %v1565_v62 = vrot.slane %v8629_v55, 2 }
 0x2ad   : > { %v1562_v58 = vmul.f32 %v8631_v57, %v8629_v55 }
 0x2ae   : > { %v1561_v60 = vmul.f32 0.0, %v1559_v56 }
 0x2b0   : > { %v9868_v61 = vadd.f32 %v1562_v58, %v1561_v60 }
 0x2b2   : > { %8632 = vtanh.f32 %v9868_v61 }
 0x2bc   : > { %v8633_v0 = vpop.eup %8632 }
 0x2bd   : > { %v1567_v2 = vmul.f32 %v8633_v0, %v1565_v62 }
 0x2bf   : > { %1568 = vst [vmem:[#allocation4] sm:$0x1] %v1567_v2  ;;  %1569 = vst [vmem:[#allocation5 + $0x7] sm:$0x1] %v1567_v2  ;;  %1636 = vmatmul.mubr.f32.vlgmr.msra.gmra.mrb[6].mxu0 %v1567_v2  ;;  %1707 = vmatmul.mubr.f32.vlgmr.msra.gmra.mrb[6].mxu1 %v1567_v2 }
 0x2c0   : > { %6460 = vmatpush1.bf16.msra.mxu0 %v9691_v6  ;;  %6492 = vmatpush1.bf16.msra.mxu1 %v9693_v7 }
 0x2c1   : > { %6462 = vmatprep.subr.bf16.mxu0 %v9695_v8  ;;  %6494 = vmatprep.subr.bf16.mxu1 %v9697_v9 }
 0x2c2   : > { %1830 = vmatprep.mubr.f32.mxu0 %v9200_v1  ;;  %1901 = vmatprep.mubr.f32.mxu1 %v9200_v1 }
 0x2c4   : > { %6464 = vmatpush1.bf16.msra.mxu0 %v9701_v10  ;;  %6496 = vmatpush1.bf16.msra.mxu1 %v9703_v11 }
 0x2c5   : > { %6466 = vmatprep.subr.bf16.mxu0 %v9707_v12  ;;  %6498 = vmatprep.subr.bf16.mxu1 %v9709_v13 }
 0x2c8   : > { %6468 = vmatpush1.bf16.msra.mxu0 %v9715_v14  ;;  %6500 = vmatpush1.bf16.msra.mxu1 %v9717_v15 }
 0x2c9   : > { %6470 = vmatprep.subr.bf16.mxu0 %v9721_v16  ;;  %6502 = vmatprep.subr.bf16.mxu1 %v9723_v17 }
 0x2cc   : > { %6472 = vmatpush1.bf16.msra.mxu0 %v9729_v18  ;;  %6504 = vmatpush1.bf16.msra.mxu1 %v9731_v19 }
 0x2cd   : > { %6474 = vmatprep.subr.bf16.mxu0 %v9733_v20  ;;  %6506 = vmatprep.subr.bf16.mxu1 %v9735_v21 }
 0x2d0   : > { %6476 = vmatpush1.bf16.msra.mxu0 %v9741_v22  ;;  %6508 = vmatpush1.bf16.msra.mxu1 %v9743_v23 }
 0x2d1   : > { %6478 = vmatprep.subr.bf16.mxu0 %v9745_v24  ;;  %6510 = vmatprep.subr.bf16.mxu1 %v9747_v25 }
 0x2d4   : > { %6480 = vmatpush1.bf16.msra.mxu0 %v9753_v26  ;;  %6512 = vmatpush1.bf16.msra.mxu1 %v9755_v27 }
 0x2d5   : > { %6482 = vmatprep.subr.bf16.mxu0 %v9757_v28  ;;  %6514 = vmatprep.subr.bf16.mxu1 %v9759_v29 }
 0x2d8   : > { %6484 = vmatpush1.bf16.msra.mxu0 %v9765_v30  ;;  %6516 = vmatpush1.bf16.msra.mxu1 %v9767_v31 }
 0x2d9   : > { %6486 = vmatprep.subr.bf16.mxu0 %v9769_v32  ;;  %6518 = vmatprep.subr.bf16.mxu1 %v9771_v33 }
 0x2dc   : > { %6488 = vmatpush1.bf16.msra.mxu0 %v9777_v34  ;;  %6520 = vmatpush1.bf16.msra.mxu1 %v9779_v35 }
 0x2dd   : > { %6522 = vmatprep.subr.bf16.mxu0 %v9687_v4  ;;  %6554 = vmatprep.subr.bf16.mxu1 %v9689_v5 }
 0x392   : > { %v1637_v3 = vpop.f32.mrb[6].mxu0  ;;  %v1708_v40 = vpop.f32.mrb[6].mxu1 }
 0x393   : > { %v1639_v43 = vpop.f32.mrb[7].mxu0  ;;  %v1710_v44 = vpop.f32.mrb[7].mxu1 }
 0x394   : > { %v1717_v45 = vcombine.low %v1637_v3, %v1639_v43  ;;  %v1718_v46 = vcombine.low %v1708_v40, %v1710_v44 }
 0x396   : > { %v1725_v47 = vrot.slane %v1717_v45, %v9863_v63  ;;  %v1732_v48 = vrot.slane %v1718_v46, %v9863_v63 }
 0x398   : > { %v1733_v49 = vcombine.low %v1725_v47, %v1732_v48 }
 0x39a   : > { %v1740_v50 = vrot.slane %v1733_v49, %v9863_v63 }
 0x39c   : > { %v1742_v52 = vadd.f32 %v1740_v50, %v1570_v51 }
 0x39e   : > { %v5886_v53 = vmul.f32 -1.442695, %v1742_v52  ;;  %v1750_v56 = vrot.slane %v1742_v52, 3 }
 0x3a0   : > { %8634 = vpow2.f32 %v5886_v53  ;;  %v1765_v53 = vld [vmem:[#allocation2 + $0x2] ss:$8 sm:$0xf] }
 0x3aa   : > { %v8635_v54 = vpop.eup %8634 }
 0x3ab   : > { %v1746_v55 = vadd.f32 1.0, %v8635_v54 }
 0x3ad   : > { %8636 = vrcp.f32 %v1746_v55 }
 0x3ae   : > { %8638 = vtanh.f32 %v1750_v56 }
 0x3b7   : > { %v8637_v57 = vpop.eup %8636 }
 0x3b8   : > { %v1754_v58 = vrot.slane %v8637_v57, 1  ;;  %v8639_v60 = vpop.eup %8638  ;;  %v1760_v3 = vrot.slane %v8637_v57, 2 }
 0x3b9   : > { %v1757_v62 = vmul.f32 %v8639_v60, %v8637_v57 }
 0x3ba   : > { %v1756_v0 = vmul.f32 %v1754_v58, %v9868_v61 }
 0x3bc   : > { %v9909_v2 = vadd.f32 %v1757_v62, %v1756_v0 }
 0x3be   : > { %8640 = vtanh.f32 %v9909_v2 }
 0x3c8   : > { %v8641_v40 = vpop.eup %8640 }
 0x3c9   : > { %v1762_v43 = vmul.f32 %v8641_v40, %v1760_v3 }
 0x3cb   : > { %1763 = vst [vmem:[#allocation4 + $0x1] sm:$0x1] %v1762_v43  ;;  %1764 = vst [vmem:[#allocation5 + $0x6] sm:$0x1] %v1762_v43  ;;  %1831 = vmatmul.mubr.f32.vlgmr.msra.gmra.mrb[8].mxu0 %v1762_v43  ;;  %1902 = vmatmul.mubr.f32.vlgmr.msra.gmra.mrb[8].mxu1 %v1762_v43 }
 0x3cc   : > { %6524 = vmatpush1.bf16.msra.mxu0 %v9691_v6  ;;  %6556 = vmatpush1.bf16.msra.mxu1 %v9693_v7 }
 0x3cd   : > { %6526 = vmatprep.subr.bf16.mxu0 %v9695_v8  ;;  %6558 = vmatprep.subr.bf16.mxu1 %v9697_v9 }
 0x3ce   : > { %2025 = vmatprep.mubr.f32.mxu0 %v9200_v1  ;;  %2096 = vmatprep.mubr.f32.mxu1 %v9200_v1 }
 0x3d0   : > { %6528 = vmatpush1.bf16.msra.mxu0 %v9701_v10  ;;  %6560 = vmatpush1.bf16.msra.mxu1 %v9703_v11 }
 0x3d1   : > { %6530 = vmatprep.subr.bf16.mxu0 %v9707_v12  ;;  %6562 = vmatprep.subr.bf16.mxu1 %v9709_v13 }
 0x3d4   : > { %6532 = vmatpush1.bf16.msra.mxu0 %v9715_v14  ;;  %6564 = vmatpush1.bf16.msra.mxu1 %v9717_v15 }
 0x3d5   : > { %6534 = vmatprep.subr.bf16.mxu0 %v9721_v16  ;;  %6566 = vmatprep.subr.bf16.mxu1 %v9723_v17 }
 0x3d8   : > { %6536 = vmatpush1.bf16.msra.mxu0 %v9729_v18  ;;  %6568 = vmatpush1.bf16.msra.mxu1 %v9731_v19 }
 0x3d9   : > { %6538 = vmatprep.subr.bf16.mxu0 %v9733_v20  ;;  %6570 = vmatprep.subr.bf16.mxu1 %v9735_v21 }
 0x3dc   : > { %6540 = vmatpush1.bf16.msra.mxu0 %v9741_v22  ;;  %6572 = vmatpush1.bf16.msra.mxu1 %v9743_v23 }
 0x3dd   : > { %6542 = vmatprep.subr.bf16.mxu0 %v9745_v24  ;;  %6574 = vmatprep.subr.bf16.mxu1 %v9747_v25 }
 0x3e0   : > { %6544 = vmatpush1.bf16.msra.mxu0 %v9753_v26  ;;  %6576 = vmatpush1.bf16.msra.mxu1 %v9755_v27 }
 0x3e1   : > { %6546 = vmatprep.subr.bf16.mxu0 %v9757_v28  ;;  %6578 = vmatprep.subr.bf16.mxu1 %v9759_v29 }
 0x3e4   : > { %6548 = vmatpush1.bf16.msra.mxu0 %v9765_v30  ;;  %6580 = vmatpush1.bf16.msra.mxu1 %v9767_v31 }
 0x3e5   : > { %6550 = vmatprep.subr.bf16.mxu0 %v9769_v32  ;;  %6582 = vmatprep.subr.bf16.mxu1 %v9771_v33 }
 0x3e8   : > { %6552 = vmatpush1.bf16.msra.mxu0 %v9777_v34  ;;  %6584 = vmatpush1.bf16.msra.mxu1 %v9779_v35 }
 0x3e9   : > { %6586 = vmatprep.subr.bf16.mxu0 %v9687_v4  ;;  %6618 = vmatprep.subr.bf16.mxu1 %v9689_v5 }
 0x49e   : > { %v1832_v61 = vpop.f32.mrb[8].mxu0  ;;  %v1903_v44 = vpop.f32.mrb[8].mxu1 }
 0x49f   : > { %v1834_v45 = vpop.f32.mrb[9].mxu0  ;;  %v1905_v46 = vpop.f32.mrb[9].mxu1 }
 0x4a0   : > { %v1912_v47 = vcombine.low %v1832_v61, %v1834_v45  ;;  %v1913_v48 = vcombine.low %v1903_v44, %v1905_v46 }
 0x4a2   : > { %v1920_v49 = vrot.slane %v1912_v47, %v9863_v63  ;;  %v1927_v50 = vrot.slane %v1913_v48, %v9863_v63 }
 0x4a4   : > { %v1928_v51 = vcombine.low %v1920_v49, %v1927_v50 }
 0x4a6   : > { %v1935_v52 = vrot.slane %v1928_v51, %v9863_v63 }
 0x4a8   : > { %v1937_v54 = vadd.f32 %v1935_v52, %v1765_v53 }
 0x4aa   : > { %v5887_v55 = vmul.f32 -1.442695, %v1937_v54  ;;  %v1945_v58 = vrot.slane %v1937_v54, 3 }
 0x4ac   : > { %8642 = vpow2.f32 %v5887_v55  ;;  %v1960_v55 = vld [vmem:[#allocation2 + $0x3] ss:$8 sm:$0xf] }
 0x4b6   : > { %v8643_v56 = vpop.eup %8642 }
 0x4b7   : > { %v1941_v57 = vadd.f32 1.0, %v8643_v56 }
 0x4b9   : > { %8644 = vrcp.f32 %v1941_v57 }
 0x4ba   : > { %8646 = vtanh.f32 %v1945_v58 }
 0x4c3   : > { %v8645_v60 = vpop.eup %8644 }
 0x4c4   : > { %v1949_v62 = vrot.slane %v8645_v60, 1  ;;  %v8647_v0 = vpop.eup %8646  ;;  %v1955_v61 = vrot.slane %v8645_v60, 2 }
 0x4c5   : > { %v1952_v3 = vmul.f32 %v8647_v0, %v8645_v60 }
 0x4c6   : > { %v1951_v40 = vmul.f32 %v1949_v62, %v9909_v2 }
 0x4c8   : > { %v9950_v43 = vadd.f32 %v1952_v3, %v1951_v40 }
 0x4ca   : > { %8648 = vtanh.f32 %v9950_v43 }
 0x4d4   : > { %v8649_v44 = vpop.eup %8648 }
 0x4d5   : > { %v1957_v45 = vmul.f32 %v8649_v44, %v1955_v61 }
 0x4d7   : > { %1958 = vst [vmem:[#allocation4 + $0x2] sm:$0x1] %v1957_v45  ;;  %1959 = vst [vmem:[#allocation5 + $0x5] sm:$0x1] %v1957_v45  ;;  %2026 = vmatmul.mubr.f32.vlgmr.msra.gmra.mrb[10].mxu0 %v1957_v45  ;;  %2097 = vmatmul.mubr.f32.vlgmr.msra.gmra.mrb[10].mxu1 %v1957_v45 }
 0x4d8   : > { %6588 = vmatpush1.bf16.msra.mxu0 %v9691_v6  ;;  %6620 = vmatpush1.bf16.msra.mxu1 %v9693_v7 }
 0x4d9   : > { %6590 = vmatprep.subr.bf16.mxu0 %v9695_v8  ;;  %6622 = vmatprep.subr.bf16.mxu1 %v9697_v9 }
 0x4da   : > { %2220 = vmatprep.mubr.f32.mxu0 %v9200_v1  ;;  %2291 = vmatprep.mubr.f32.mxu1 %v9200_v1 }
 0x4dc   : > { %6592 = vmatpush1.bf16.msra.mxu0 %v9701_v10  ;;  %6624 = vmatpush1.bf16.msra.mxu1 %v9703_v11 }
 0x4dd   : > { %6594 = vmatprep.subr.bf16.mxu0 %v9707_v12  ;;  %6626 = vmatprep.subr.bf16.mxu1 %v9709_v13 }
 0x4e0   : > { %6596 = vmatpush1.bf16.msra.mxu0 %v9715_v14  ;;  %6628 = vmatpush1.bf16.msra.mxu1 %v9717_v15 }
 0x4e1   : > { %6598 = vmatprep.subr.bf16.mxu0 %v9721_v16  ;;  %6630 = vmatprep.subr.bf16.mxu1 %v9723_v17 }
 0x4e4   : > { %6600 = vmatpush1.bf16.msra.mxu0 %v9729_v18  ;;  %6632 = vmatpush1.bf16.msra.mxu1 %v9731_v19 }
 0x4e5   : > { %6602 = vmatprep.subr.bf16.mxu0 %v9733_v20  ;;  %6634 = vmatprep.subr.bf16.mxu1 %v9735_v21 }
 0x4e8   : > { %6604 = vmatpush1.bf16.msra.mxu0 %v9741_v22  ;;  %6636 = vmatpush1.bf16.msra.mxu1 %v9743_v23 }
 0x4e9   : > { %6606 = vmatprep.subr.bf16.mxu0 %v9745_v24  ;;  %6638 = vmatprep.subr.bf16.mxu1 %v9747_v25 }
 0x4ec   : > { %6608 = vmatpush1.bf16.msra.mxu0 %v9753_v26  ;;  %6640 = vmatpush1.bf16.msra.mxu1 %v9755_v27 }
 0x4ed   : > { %6610 = vmatprep.subr.bf16.mxu0 %v9757_v28  ;;  %6642 = vmatprep.subr.bf16.mxu1 %v9759_v29 }
 0x4f0   : > { %6612 = vmatpush1.bf16.msra.mxu0 %v9765_v30  ;;  %6644 = vmatpush1.bf16.msra.mxu1 %v9767_v31 }
 0x4f1   : > { %6614 = vmatprep.subr.bf16.mxu0 %v9769_v32  ;;  %6646 = vmatprep.subr.bf16.mxu1 %v9771_v33 }
 0x4f4   : > { %6616 = vmatpush1.bf16.msra.mxu0 %v9777_v34  ;;  %6648 = vmatpush1.bf16.msra.mxu1 %v9779_v35 }
 0x4f5   : > { %6650 = vmatprep.subr.bf16.mxu0 %v9687_v4  ;;  %6682 = vmatprep.subr.bf16.mxu1 %v9689_v5 }
 0x5aa   : > { %v2027_v2 = vpop.f32.mrb[10].mxu0  ;;  %v2098_v46 = vpop.f32.mrb[10].mxu1 }
 0x5ab   : > { %v2029_v47 = vpop.f32.mrb[11].mxu0  ;;  %v2100_v48 = vpop.f32.mrb[11].mxu1 }
 0x5ac   : > { %v2107_v49 = vcombine.low %v2027_v2, %v2029_v47  ;;  %v2108_v50 = vcombine.low %v2098_v46, %v2100_v48 }
 0x5ae   : > { %v2115_v51 = vrot.slane %v2107_v49, %v9863_v63  ;;  %v2122_v52 = vrot.slane %v2108_v50, %v9863_v63 }
 0x5b0   : > { %v2123_v53 = vcombine.low %v2115_v51, %v2122_v52 }
 0x5b2   : > { %v2130_v54 = vrot.slane %v2123_v53, %v9863_v63 }
 0x5b4   : > { %v2132_v56 = vadd.f32 %v2130_v54, %v1960_v55  ;;  %v10039_v54 = vld [vmem:[#allocation16] ss:$16 sps:$4 sm:$0xff]   ;;  %v10042_v55 = vld [vmem:[#allocation16 + $0x8] ss:$16 sps:$4 sm:$0xff]  }
 0x5b6   : > { %v5888_v57 = vmul.f32 -1.442695, %v2132_v56  ;;  %v2140_v5 = vrot.slane %v2132_v56, 3  ;;  %v10045_v56 = vld [vmem:[#allocation16 + $0x24] ss:$16 sps:$4 sm:$0xff]  }
 0x5b8   : > { %8650 = vpow2.f32 %v5888_v57  ;;  %v10048_v57 = vld [vmem:[#allocation16 + $0x2c] ss:$16 sps:$4 sm:$0xff]  }
 0x5c2   : > { %v8651_v4 = vpop.eup %8650 }
 0x5c3   : > { %v2136_v58 = vadd.f32 1.0, %v8651_v4  ;;  %v10053_v4 = vld [vmem:[#allocation16 + $0x20] ss:$16 sps:$4 sm:$0xff]  }
 0x5c5   : > { %8652 = vrcp.f32 %v2136_v58  ;;  %v10056_v58 = vld [vmem:[#allocation16 + $0x28] ss:$16 sps:$4 sm:$0xff]  }
 0x5c6   : > { %8654 = vtanh.f32 %v2140_v5  ;;  %v10059_v5 = vld [vmem:[#allocation16 + $0x44] ss:$16 sps:$4 sm:$0xff]  }
 0x5cf   : > { %v8653_v60 = vpop.eup %8652 }
 0x5d0   : > { %v2144_v62 = vrot.slane %v8653_v60, 1  ;;  %v8655_v0 = vpop.eup %8654  ;;  %v2150_v44 = vrot.slane %v8653_v60, 2 }
 0x5d1   : > { %v2147_v3 = vmul.f32 %v8655_v0, %v8653_v60  ;;  %v10062_v60 = vld [vmem:[#allocation16 + $0x4c] ss:$16 sps:$4 sm:$0xff]   ;;  %v10068_v0 = vld [vmem:[#allocation16 + $0x48] ss:$16 sps:$4 sm:$0xff]  }
 0x5d2   : > { %v2146_v40 = vmul.f32 %v2144_v62, %v9950_v43  ;;  %v10065_v62 = vld [vmem:[#allocation16 + $0x40] ss:$16 sps:$4 sm:$0xff]  }
 0x5d4   : > { %v9991_v61 = vadd.f32 %v2147_v3, %v2146_v40  ;;  %v10071_v3 = vld [vmem:[#allocation16 + $0x64] ss:$16 sps:$4 sm:$0xff]   ;;  %v10074_v40 = vld [vmem:[#allocation16 + $0x6c] ss:$16 sps:$4 sm:$0xff]  }
 0x5d6   : > { %8656 = vtanh.f32 %v9991_v61 }
 0x5e0   : > { %v8657_v45 = vpop.eup %8656 }
 0x5e1   : > { %v2152_v2 = vmul.f32 %v8657_v45, %v2150_v44  ;;  %v10080_v44 = vld [vmem:[#allocation16 + $0x68] ss:$16 sps:$4 sm:$0xff]   ;;  %v10083_v45 = vld [vmem:[#allocation16 + $0x84] ss:$16 sps:$4 sm:$0xff]  }
 0x5e3   : > { %2153 = vst [vmem:[#allocation4 + $0x3] sm:$0x1] %v2152_v2  ;;  %2154 = vst [vmem:[#allocation5 + $0x4] sm:$0x1] %v2152_v2  ;;  %2221 = vmatmul.mubr.f32.vlgmr.msra.gmra.mrb[12].mxu0 %v2152_v2  ;;  %2292 = vmatmul.mubr.f32.vlgmr.msra.gmra.mrb[12].mxu1 %v2152_v2  ;;  %v10086_v2 = vld [vmem:[#allocation16 + $0x8c] ss:$16 sps:$4 sm:$0xff]  }
 0x5e4   : > { %6652 = vmatpush1.bf16.msra.mxu0 %v9691_v6  ;;  %6684 = vmatpush1.bf16.msra.mxu1 %v9693_v7  ;;  %v10026_v6 = vld [vmem:[#allocation16 + $0x4] ss:$16 sps:$4 sm:$0xff]   ;;  %v10029_v7 = vld [vmem:[#allocation16 + $0xc] ss:$16 sps:$4 sm:$0xff]  }
 0x5e5   : > { %6654 = vmatprep.subr.bf16.mxu0 %v9695_v8  ;;  %6686 = vmatprep.subr.bf16.mxu1 %v9697_v9 }
 0x5e6   : > { %2415 = vmatprep.mubr.f32.mxu0 %v9200_v1  ;;  %2486 = vmatprep.mubr.f32.mxu1 %v9200_v1 }
 0x5e8   : > { %6656 = vmatpush1.bf16.msra.mxu0 %v9701_v10  ;;  %6688 = vmatpush1.bf16.msra.mxu1 %v9703_v11 }
 0x5e9   : > { %6658 = vmatprep.subr.bf16.mxu0 %v9707_v12  ;;  %6690 = vmatprep.subr.bf16.mxu1 %v9709_v13 }
 0x5ec   : > { %6660 = vmatpush1.bf16.msra.mxu0 %v9715_v14  ;;  %6692 = vmatpush1.bf16.msra.mxu1 %v9717_v15 }
 0x5ed   : > { %6662 = vmatprep.subr.bf16.mxu0 %v9721_v16  ;;  %6694 = vmatprep.subr.bf16.mxu1 %v9723_v17 }
 0x5f0   : > { %6664 = vmatpush1.bf16.msra.mxu0 %v9729_v18  ;;  %6696 = vmatpush1.bf16.msra.mxu1 %v9731_v19  ;;  %v2155_v18 = vld [vmem:[#allocation2 + $0x4] ss:$8 sm:$0xf] }
 0x5f1   : > { %6666 = vmatprep.subr.bf16.mxu0 %v9733_v20  ;;  %6698 = vmatprep.subr.bf16.mxu1 %v9735_v21 }
 0x5f4   : > { %6668 = vmatpush1.bf16.msra.mxu0 %v9741_v22  ;;  %6700 = vmatpush1.bf16.msra.mxu1 %v9743_v23 }
 0x5f5   : > { %6670 = vmatprep.subr.bf16.mxu0 %v9745_v24  ;;  %6702 = vmatprep.subr.bf16.mxu1 %v9747_v25 }
 0x5f8   : > { %6672 = vmatpush1.bf16.msra.mxu0 %v9753_v26  ;;  %6704 = vmatpush1.bf16.msra.mxu1 %v9755_v27 }
 0x5f9   : > { %6674 = vmatprep.subr.bf16.mxu0 %v9757_v28  ;;  %6706 = vmatprep.subr.bf16.mxu1 %v9759_v29 }
 0x5fc   : > { %6676 = vmatpush1.bf16.msra.mxu0 %v9765_v30  ;;  %6708 = vmatpush1.bf16.msra.mxu1 %v9767_v31 }
 0x5fd   : > { %6678 = vmatprep.subr.bf16.mxu0 %v9769_v32  ;;  %6710 = vmatprep.subr.bf16.mxu1 %v9771_v33 }
 0x600   : > { %6680 = vmatpush1.bf16.msra.mxu0 %v9777_v34  ;;  %6712 = vmatpush1.bf16.msra.mxu1 %v9779_v35 }
 0x601   : > { %6714 = vmatprep.subr.bf16.mxu0 %v10026_v6  ;;  %6746 = vmatprep.subr.bf16.mxu1 %v10029_v7 }
 0x6b6   : > { %v2222_v8 = vpop.f32.mrb[12].mxu0  ;;  %v2293_v9 = vpop.f32.mrb[12].mxu1 }
 0x6b7   : > { %v2224_v10 = vpop.f32.mrb[13].mxu0  ;;  %v2295_v11 = vpop.f32.mrb[13].mxu1 }
 0x6b8   : > { %v2302_v12 = vcombine.low %v2222_v8, %v2224_v10  ;;  %v2303_v13 = vcombine.low %v2293_v9, %v2295_v11  ;;  %v10089_v8 = vld [vmem:[#allocation16 + $0x80] ss:$16 sps:$4 sm:$0xff]   ;;  %v10092_v9 = vld [vmem:[#allocation16 + $0x88] ss:$16 sps:$4 sm:$0xff]  }
 0x6ba   : > { %v2310_v14 = vrot.slane %v2302_v12, %v9863_v63  ;;  %v2317_v15 = vrot.slane %v2303_v13, %v9863_v63 }
 0x6bc   : > { %v2318_v16 = vcombine.low %v2310_v14, %v2317_v15 }
 0x6be   : > { %v2325_v17 = vrot.slane %v2318_v16, %v9863_v63 }
 0x6c0   : > { %v2327_v19 = vadd.f32 %v2325_v17, %v2155_v18 }
 0x6c2   : > { %v5889_v20 = vmul.f32 -1.442695, %v2327_v19  ;;  %v2335_v23 = vrot.slane %v2327_v19, 3 }
 0x6c4   : > { %8658 = vpow2.f32 %v5889_v20 }
 0x6ce   : > { %v8659_v21 = vpop.eup %8658 }
 0x6cf   : > { %v2331_v22 = vadd.f32 1.0, %v8659_v21  ;;  %v8784_v21 = vld [vmem:[#allocation16 + $0xa4] ss:$16 sps:$4 sm:$0xff]  }
 0x6d1   : > { %8660 = vrcp.f32 %v2331_v22  ;;  %v8785_v22 = vld [vmem:[#allocation16 + $0xac] ss:$16 sps:$4 sm:$0xff]  }
 0x6d2   : > { %8662 = vtanh.f32 %v2335_v23  ;;  %v8786_v23 = vld [vmem:[#allocation16 + $0xa0] ss:$16 sps:$4 sm:$0xff]  }
 0x6db   : > { %v8661_v43 = vpop.eup %8660 }
 0x6dc   : > { %v2339_v46 = vrot.slane %v8661_v43, 1  ;;  %v8663_v47 = vpop.eup %8662  ;;  %v2345_v51 = vrot.slane %v8661_v43, 2 }
 0x6dd   : > { %v2342_v48 = vmul.f32 %v8663_v47, %v8661_v43  ;;  %v8787_v43 = vld [vmem:[#allocation16 + $0xa8] ss:$16 sps:$4 sm:$0xff]   ;;  %v8789_v47 = vld [vmem:[#allocation16 + $0xcc] ss:$16 sps:$4 sm:$0xff]  }
 0x6de   : > { %v2341_v49 = vmul.f32 %v2339_v46, %v9991_v61  ;;  %v10077_v61 = vld [vmem:[#allocation16 + $0x60] ss:$16 sps:$4 sm:$0xff]   ;;  %v8788_v46 = vld [vmem:[#allocation16 + $0xc4] ss:$16 sps:$4 sm:$0xff]  }
 0x6e0   : > { %v10036_v50 = vadd.f32 %v2342_v48, %v2341_v49  ;;  %v8790_v48 = vld [vmem:[#allocation16 + $0xc0] ss:$16 sps:$4 sm:$0xff]   ;;  %v8791_v49 = vld [vmem:[#allocation16 + $0xc8] ss:$16 sps:$4 sm:$0xff]  }
 0x6e2   : > { %8664 = vtanh.f32 %v10036_v50 }
 0x6ec   : > { %v8665_v52 = vpop.eup %8664 }
 0x6ed   : > { %v2347_v53 = vmul.f32 %v8665_v52, %v2345_v51  ;;  %v8793_v51 = vld [vmem:[#allocation16 + $0xec] ss:$16 sps:$4 sm:$0xff]   ;;  %v8794_v52 = vld [vmem:[#allocation16 + $0xe0] ss:$16 sps:$4 sm:$0xff]  }
 0x6ef   : > { %2348 = vst [vmem:[#allocation4 + $0x4] sm:$0x1] %v2347_v53  ;;  %2349 = vst [vmem:[#allocation5 + $0x3] sm:$0x1] %v2347_v53  ;;  %2416 = vmatmul.mubr.f32.vlgmr.msra.gmra.mrb[14].mxu0 %v2347_v53  ;;  %2487 = vmatmul.mubr.f32.vlgmr.msra.gmra.mrb[14].mxu1 %v2347_v53  ;;  %v8795_v53 = vld [vmem:[#allocation16 + $0xe8] ss:$16 sps:$4 sm:$0xff]  }
 0x6f0   : > { %6716 = vmatpush1.bf16.msra.mxu0 %v10039_v54  ;;  %6748 = vmatpush1.bf16.msra.mxu1 %v10042_v55 }
 0x6f1   : > { %6718 = vmatprep.subr.bf16.mxu0 %v10045_v56  ;;  %6750 = vmatprep.subr.bf16.mxu1 %v10048_v57 }
 0x6f2   : > { %2610 = vmatprep.mubr.f32.mxu0 %v9200_v1  ;;  %2681 = vmatprep.mubr.f32.mxu1 %v9200_v1 }
 0x6f4   : > { %6720 = vmatpush1.bf16.msra.mxu0 %v10053_v4  ;;  %6752 = vmatpush1.bf16.msra.mxu1 %v10056_v58 }
 0x6f5   : > { %6722 = vmatprep.subr.bf16.mxu0 %v10059_v5  ;;  %6754 = vmatprep.subr.bf16.mxu1 %v10062_v60 }
 0x6f8   : > { %6724 = vmatpush1.bf16.msra.mxu0 %v10065_v62  ;;  %6756 = vmatpush1.bf16.msra.mxu1 %v10068_v0 }
 0x6f9   : > { %6726 = vmatprep.subr.bf16.mxu0 %v10071_v3  ;;  %6758 = vmatprep.subr.bf16.mxu1 %v10074_v40 }
 0x6fc   : > { %6728 = vmatpush1.bf16.msra.mxu0 %v10077_v61  ;;  %6760 = vmatpush1.bf16.msra.mxu1 %v10080_v44 }
 0x6fd   : > { %6730 = vmatprep.subr.bf16.mxu0 %v10083_v45  ;;  %6762 = vmatprep.subr.bf16.mxu1 %v10086_v2 }
 0x700   : > { %6732 = vmatpush1.bf16.msra.mxu0 %v10089_v8  ;;  %6764 = vmatpush1.bf16.msra.mxu1 %v10092_v9 }
 0x701   : > { %6734 = vmatprep.subr.bf16.mxu0 %v9745_v24  ;;  %6766 = vmatprep.subr.bf16.mxu1 %v9747_v25 }
 0x704   : > { %6736 = vmatpush1.bf16.msra.mxu0 %v9753_v26  ;;  %6768 = vmatpush1.bf16.msra.mxu1 %v9755_v27 }
 0x705   : > { %6738 = vmatprep.subr.bf16.mxu0 %v9757_v28  ;;  %6770 = vmatprep.subr.bf16.mxu1 %v9759_v29 }
 0x708   : > { %6740 = vmatpush1.bf16.msra.mxu0 %v9765_v30  ;;  %6772 = vmatpush1.bf16.msra.mxu1 %v9767_v31 }
 0x709   : > { %6742 = vmatprep.subr.bf16.mxu0 %v9769_v32  ;;  %6774 = vmatprep.subr.bf16.mxu1 %v9771_v33 }
 0x70c   : > { %6744 = vmatpush1.bf16.msra.mxu0 %v9777_v34  ;;  %6776 = vmatpush1.bf16.msra.mxu1 %v9779_v35  ;;  %v2350_v34 = vld [vmem:[#allocation2 + $0x5] ss:$8 sm:$0xf] }
 0x70d   : > { %6778 = vmatprep.subr.bf16.mxu0 %v10026_v6  ;;  %6810 = vmatprep.subr.bf16.mxu1 %v10029_v7 }
 0x7c2   : > { %v2417_v24 = vpop.f32.mrb[14].mxu0  ;;  %v2488_v25 = vpop.f32.mrb[14].mxu1 }
 0x7c3   : > { %v2419_v26 = vpop.f32.mrb[15].mxu0  ;;  %v2490_v27 = vpop.f32.mrb[15].mxu1 }
 0x7c4   : > { %v2497_v28 = vcombine.low %v2417_v24, %v2419_v26  ;;  %v2498_v29 = vcombine.low %v2488_v25, %v2490_v27 }
 0x7c6   : > { %v2505_v30 = vrot.slane %v2497_v28, %v9863_v63  ;;  %v2512_v31 = vrot.slane %v2498_v29, %v9863_v63 }
 0x7c8   : > { %v2513_v32 = vcombine.low %v2505_v30, %v2512_v31  ;;  %v8482_v31 = vld [vmem:[#allocation18 + $0x4] ss:$16 sps:$4 sm:$0xff]  }
 0x7ca   : > { %v2520_v33 = vrot.slane %v2513_v32, %v9863_v63  ;;  %v8485_v32 = vld [vmem:[#allocation18 + $0xc] ss:$16 sps:$4 sm:$0xff]  }
 0x7cc   : > { %v2522_v10 = vadd.f32 %v2520_v33, %v2350_v34  ;;  %v8484_v33 = vld [vmem:[#allocation18] ss:$16 sps:$4 sm:$0xff]   ;;  %v8487_v34 = vld [vmem:[#allocation18 + $0x8] ss:$16 sps:$4 sm:$0xff]  }
 0x7ce   : > { %v5890_v35 = vmul.f32 -1.442695, %v2522_v10  ;;  %v2530_v7 = vrot.slane %v2522_v10, 3  ;;  %v8488_v10 = vld [vmem:[#allocation18 + $0x24] ss:$16 sps:$4 sm:$0xff]  }
 0x7d0   : > { %8666 = vpow2.f32 %v5890_v35  ;;  %v8491_v35 = vld [vmem:[#allocation18 + $0x2c] ss:$16 sps:$4 sm:$0xff]  }
 0x7da   : > { %v8667_v6 = vpop.eup %8666 }
 0x7db   : > { %v2526_v11 = vadd.f32 1.0, %v8667_v6  ;;  %v8490_v6 = vld [vmem:[#allocation18 + $0x20] ss:$16 sps:$4 sm:$0xff]  }
 0x7dd   : > { %8668 = vrcp.f32 %v2526_v11  ;;  %v8493_v11 = vld [vmem:[#allocation18 + $0x28] ss:$16 sps:$4 sm:$0xff]  }
 0x7de   : > { %8670 = vtanh.f32 %v2530_v7  ;;  %v8494_v7 = vld [vmem:[#allocation18 + $0x44] ss:$16 sps:$4 sm:$0xff]  }
 0x7e7   : > { %v8669_v12 = vpop.eup %8668 }
 0x7e8   : > { %v2534_v13 = vrot.slane %v8669_v12, 1  ;;  %v8671_v14 = vpop.eup %8670  ;;  %v2540_v18 = vrot.slane %v8669_v12, 2 }
 0x7e9   : > { %v2537_v15 = vmul.f32 %v8671_v14, %v8669_v12  ;;  %v8497_v12 = vld [vmem:[#allocation18 + $0x4c] ss:$16 sps:$4 sm:$0xff]   ;;  %v8499_v14 = vld [vmem:[#allocation18 + $0x48] ss:$16 sps:$4 sm:$0xff]  }
 0x7ea   : > { %v2536_v16 = vmul.f32 %v2534_v13, %v10036_v50  ;;  %v8792_v50 = vld [vmem:[#allocation16 + $0xe4] ss:$16 sps:$4 sm:$0xff]   ;;  %v8496_v13 = vld [vmem:[#allocation18 + $0x40] ss:$16 sps:$4 sm:$0xff]  }
 0x7ec   : > { %v10113_v17 = vadd.f32 %v2537_v15, %v2536_v16  ;;  %v8500_v15 = vld [vmem:[#allocation18 + $0x64] ss:$16 sps:$4 sm:$0xff]   ;;  %v8503_v16 = vld [vmem:[#allocation18 + $0x6c] ss:$16 sps:$4 sm:$0xff]  }
 0x7ee   : > { %8672 = vtanh.f32 %v10113_v17 }
 0x7f8   : > { %v8673_v19 = vpop.eup %8672 }
 0x7f9   : > { %v2542_v20 = vmul.f32 %v8673_v19, %v2540_v18  ;;  %v8505_v18 = vld [vmem:[#allocation18 + $0x68] ss:$16 sps:$4 sm:$0xff]   ;;  %v8506_v19 = vld [vmem:[#allocation18 + $0x84] ss:$16 sps:$4 sm:$0xff]  }
 0x7fb   : > { %2543 = vst [vmem:[#allocation4 + $0x5] sm:$0x1] %v2542_v20  ;;  %2544 = vst [vmem:[#allocation5 + $0x2] sm:$0x1] %v2542_v20  ;;  %2611 = vmatmul.mubr.f32.vlgmr.msra.gmra.mrb[16].mxu0 %v2542_v20  ;;  %2682 = vmatmul.mubr.f32.vlgmr.msra.gmra.mrb[16].mxu1 %v2542_v20  ;;  %v8509_v20 = vld [vmem:[#allocation18 + $0x8c] ss:$16 sps:$4 sm:$0xff]  }
 0x7fc   : > { %6780 = vmatpush1.bf16.msra.mxu0 %v10039_v54  ;;  %6812 = vmatpush1.bf16.msra.mxu1 %v10042_v55 }
 0x7fd   : > { %6782 = vmatprep.subr.bf16.mxu0 %v10045_v56  ;;  %6814 = vmatprep.subr.bf16.mxu1 %v10048_v57 }
 0x7fe   : > { %2805 = vmatprep.mubr.f32.mxu0 %v9200_v1  ;;  %2876 = vmatprep.mubr.f32.mxu1 %v9200_v1 }
 0x800   : > { %6784 = vmatpush1.bf16.msra.mxu0 %v10053_v4  ;;  %6816 = vmatpush1.bf16.msra.mxu1 %v10056_v58 }
 0x801   : > { %6786 = vmatprep.subr.bf16.mxu0 %v10059_v5  ;;  %6818 = vmatprep.subr.bf16.mxu1 %v10062_v60 }
 0x804   : > { %6788 = vmatpush1.bf16.msra.mxu0 %v10065_v62  ;;  %6820 = vmatpush1.bf16.msra.mxu1 %v10068_v0 }
 0x805   : > { %6790 = vmatprep.subr.bf16.mxu0 %v10071_v3  ;;  %6822 = vmatprep.subr.bf16.mxu1 %v10074_v40  ;;  %v2545_v3 = vld [vmem:[#allocation2 + $0x6] ss:$8 sm:$0xf] }
 0x808   : > { %6792 = vmatpush1.bf16.msra.mxu0 %v10077_v61  ;;  %6824 = vmatpush1.bf16.msra.mxu1 %v10080_v44 }
 0x809   : > { %6794 = vmatprep.subr.bf16.mxu0 %v10083_v45  ;;  %6826 = vmatprep.subr.bf16.mxu1 %v10086_v2 }
 0x80c   : > { %6796 = vmatpush1.bf16.msra.mxu0 %v10089_v8  ;;  %6828 = vmatpush1.bf16.msra.mxu1 %v10092_v9 }
 0x80d   : > { %6798 = vmatprep.subr.bf16.mxu0 %v8784_v21  ;;  %6830 = vmatprep.subr.bf16.mxu1 %v8785_v22  ;;  %v8508_v21 = vld [vmem:[#allocation18 + $0x80] ss:$16 sps:$4 sm:$0xff]   ;;  %v8511_v22 = vld [vmem:[#allocation18 + $0x88] ss:$16 sps:$4 sm:$0xff]  }
 0x810   : > { %6800 = vmatpush1.bf16.msra.mxu0 %v8786_v23  ;;  %6832 = vmatpush1.bf16.msra.mxu1 %v8787_v43  ;;  %v8512_v23 = vld [vmem:[#allocation18 + $0xa4] ss:$16 sps:$4 sm:$0xff]   ;;  %v8515_v43 = vld [vmem:[#allocation18 + $0xac] ss:$16 sps:$4 sm:$0xff]  }
 0x811   : > { %6802 = vmatprep.subr.bf16.mxu0 %v8788_v46  ;;  %6834 = vmatprep.subr.bf16.mxu1 %v8789_v47  ;;  %v8514_v46 = vld [vmem:[#allocation18 + $0xa0] ss:$16 sps:$4 sm:$0xff]   ;;  %v8517_v47 = vld [vmem:[#allocation18 + $0xa8] ss:$16 sps:$4 sm:$0xff]  }
 0x814   : > { %6804 = vmatpush1.bf16.msra.mxu0 %v8790_v48  ;;  %6836 = vmatpush1.bf16.msra.mxu1 %v8791_v49  ;;  %v8518_v48 = vld [vmem:[#allocation18 + $0xc4] ss:$16 sps:$4 sm:$0xff]   ;;  %v8521_v49 = vld [vmem:[#allocation18 + $0xcc] ss:$16 sps:$4 sm:$0xff]  }
 0x815   : > { %6806 = vmatprep.subr.bf16.mxu0 %v8792_v50  ;;  %6838 = vmatprep.subr.bf16.mxu1 %v8793_v51  ;;  %v8520_v50 = vld [vmem:[#allocation18 + $0xc0] ss:$16 sps:$4 sm:$0xff]   ;;  %v8523_v51 = vld [vmem:[#allocation18 + $0xc8] ss:$16 sps:$4 sm:$0xff]  }
 0x818   : > { %6808 = vmatpush1.bf16.msra.mxu0 %v8794_v52  ;;  %6840 = vmatpush1.bf16.msra.mxu1 %v8795_v53  ;;  %v8524_v52 = vld [vmem:[#allocation18 + $0xe4] ss:$16 sps:$4 sm:$0xff]   ;;  %v8527_v53 = vld [vmem:[#allocation18 + $0xec] ss:$16 sps:$4 sm:$0xff]  }
 0x819   : > { %6842 = vmatprep.subr.bf16.mxu0 %v8482_v31  ;;  %6874 = vmatprep.subr.bf16.mxu1 %v8485_v32 }
 0x8ce   : > { %v2612_v54 = vpop.f32.mrb[16].mxu0  ;;  %v2683_v55 = vpop.f32.mrb[16].mxu1 }
 0x8cf   : > { %v2614_v56 = vpop.f32.mrb[17].mxu0  ;;  %v2685_v57 = vpop.f32.mrb[17].mxu1 }
 0x8d0   : > { %v2692_v4 = vcombine.low %v2612_v54, %v2614_v56  ;;  %v2693_v58 = vcombine.low %v2683_v55, %v2685_v57  ;;  %v8526_v54 = vld [vmem:[#allocation18 + $0xe0] ss:$16 sps:$4 sm:$0xff]   ;;  %v8529_v55 = vld [vmem:[#allocation18 + $0xe8] ss:$16 sps:$4 sm:$0xff]   ;;  %v8530_v56 = vld [vmem:[#allocation19 + $0x4] ss:$16 sps:$4 sm:$0xff]  }
 0x8d1   : > { %v8533_v57 = vld [vmem:[#allocation19 + $0xc] ss:$16 sps:$4 sm:$0xff]  }
 0x8d2   : > { %v2700_v5 = vrot.slane %v2692_v4, %v9863_v63  ;;  %v2707_v60 = vrot.slane %v2693_v58, %v9863_v63 }
 0x8d4   : > { %v2708_v62 = vcombine.low %v2700_v5, %v2707_v60 }
 0x8d6   : > { %v2715_v0 = vrot.slane %v2708_v62, %v9863_v63 }
 0x8d8   : > { %v2717_v40 = vadd.f32 %v2715_v0, %v2545_v3 }
 0x8da   : > { %v5891_v61 = vmul.f32 -1.442695, %v2717_v40  ;;  %v2725_v2 = vrot.slane %v2717_v40, 3 }
 0x8dc   : > { %8674 = vpow2.f32 %v5891_v61 }
 0x8e6   : > { %v8675_v44 = vpop.eup %8674 }
 0x8e7   : > { %v2721_v45 = vadd.f32 1.0, %v8675_v44 }
 0x8e9   : > { %8676 = vrcp.f32 %v2721_v45  ;;  %v2740_v45 = vld [vmem:[#allocation2 + $0x7] ss:$8 sm:$0xf] }
 0x8ea   : > { %8678 = vtanh.f32 %v2725_v2 }
 0x8f3   : > { %v8677_v8 = vpop.eup %8676 }
 0x8f4   : > { %v2729_v9 = vrot.slane %v8677_v8, 1  ;;  %v8679_v24 = vpop.eup %8678  ;;  %v2735_v28 = vrot.slane %v8677_v8, 2 }
 0x8f5   : > { %v2732_v25 = vmul.f32 %v8679_v24, %v8677_v8 }
 0x8f6   : > { %v2731_v26 = vmul.f32 %v2729_v9, %v10113_v17  ;;  %v8502_v17 = vld [vmem:[#allocation18 + $0x60] ss:$16 sps:$4 sm:$0xff]  }
 0x8f8   : > { %v10140_v27 = vadd.f32 %v2732_v25, %v2731_v26 }
 0x8fa   : > { %8680 = vtanh.f32 %v10140_v27 }
 0x904   : > { %v8681_v29 = vpop.eup %8680 }
 0x905   : > { %v2737_v30 = vmul.f32 %v8681_v29, %v2735_v28 }
 0x907   : > { %2738 = vst [vmem:[#allocation4 + $0x6] sm:$0x1] %v2737_v30  ;;  %2739 = vst [vmem:[#allocation5 + $0x1] sm:$0x1] %v2737_v30  ;;  %2806 = vmatmul.mubr.f32.vlgmr.msra.gmra.mrb[18].mxu0 %v2737_v30  ;;  %2877 = vmatmul.mubr.f32.vlgmr.msra.gmra.mrb[18].mxu1 %v2737_v30 }
 0x908   : > { %3125 = vmatprep.mubr.f32.mxu0 %v9200_v1  ;;  %3196 = vmatprep.mubr.f32.mxu1 %v9200_v1 }
 0x909   : > { %6844 = vmatpush1.bf16.msra.mxu0 %v8484_v33  ;;  %6876 = vmatpush1.bf16.msra.mxu1 %v8487_v34 }
 0x90a   : > { %6846 = vmatprep.subr.bf16.mxu0 %v8488_v10  ;;  %6878 = vmatprep.subr.bf16.mxu1 %v8491_v35  ;;  %v10150_v35 = vand.u32 127, %v813_v36  ;;  %v8538_v36 = vld [vmem:[#allocation19 + $0x20] ss:$16 sps:$4 sm:$0xff]  }
 0x90c   : > { %vm2937_vm1 = vcmp.lt.s32.totalorder %v10150_v35, 50  ;;  %v6004_v35 = vld [vmem:[%s10818_s1 + $0x8] sm:$0xff]  }
 0x90d   : > { %6848 = vmatpush1.bf16.msra.mxu0 %v8490_v6  ;;  %6880 = vmatpush1.bf16.msra.mxu1 %v8493_v11  ;;  %v8532_v6 = vld [vmem:[#allocation19] ss:$16 sps:$4 sm:$0xff]   ;;  %v8535_v11 = vld [vmem:[#allocation19 + $0x8] ss:$16 sps:$4 sm:$0xff]  }
 0x90e   : > { %6850 = vmatprep.subr.bf16.mxu0 %v8494_v7  ;;  %6882 = vmatprep.subr.bf16.mxu1 %v8497_v12  ;;  %v8536_v7 = vld [vmem:[#allocation19 + $0x24] ss:$16 sps:$4 sm:$0xff]  }
 0x911   : > { %6852 = vmatpush1.bf16.msra.mxu0 %v8496_v13  ;;  %6884 = vmatpush1.bf16.msra.mxu1 %v8499_v14  ;;  %v8539_v14 = vld [vmem:[#allocation19 + $0x2c] ss:$16 sps:$4 sm:$0xff]  }
 0x912   : > { %6854 = vmatprep.subr.bf16.mxu0 %v8500_v15  ;;  %6886 = vmatprep.subr.bf16.mxu1 %v8503_v16  ;;  %v8541_v15 = vld [vmem:[#allocation19 + $0x28] ss:$16 sps:$4 sm:$0xff]   ;;  %v8542_v16 = vld [vmem:[#allocation19 + $0x44] ss:$16 sps:$4 sm:$0xff]  }
 0x915   : > { %6856 = vmatpush1.bf16.msra.mxu0 %v8502_v17  ;;  %6888 = vmatpush1.bf16.msra.mxu1 %v8505_v18  ;;  %v8545_v17 = vld [vmem:[#allocation19 + $0x4c] ss:$16 sps:$4 sm:$0xff]   ;;  %v8544_v18 = vld [vmem:[#allocation19 + $0x40] ss:$16 sps:$4 sm:$0xff]  }
 0x916   : > { %6858 = vmatprep.subr.bf16.mxu0 %v8506_v19  ;;  %6890 = vmatprep.subr.bf16.mxu1 %v8509_v20  ;;  %v8547_v19 = vld [vmem:[#allocation19 + $0x48] ss:$16 sps:$4 sm:$0xff]   ;;  %v8548_v20 = vld [vmem:[#allocation19 + $0x64] ss:$16 sps:$4 sm:$0xff]  }
 0x919   : > { %6860 = vmatpush1.bf16.msra.mxu0 %v8508_v21  ;;  %6892 = vmatpush1.bf16.msra.mxu1 %v8511_v22  ;;  %v8551_v21 = vld [vmem:[#allocation19 + $0x6c] ss:$16 sps:$4 sm:$0xff]   ;;  %v8550_v22 = vld [vmem:[#allocation19 + $0x60] ss:$16 sps:$4 sm:$0xff]  }
 0x91a   : > { %6862 = vmatprep.subr.bf16.mxu0 %v8512_v23  ;;  %6894 = vmatprep.subr.bf16.mxu1 %v8515_v43  ;;  %v8553_v23 = vld [vmem:[#allocation19 + $0x68] ss:$16 sps:$4 sm:$0xff]   ;;  %v8554_v43 = vld [vmem:[#allocation19 + $0x84] ss:$16 sps:$4 sm:$0xff]  }
 0x91d   : > { %6864 = vmatpush1.bf16.msra.mxu0 %v8514_v46  ;;  %6896 = vmatpush1.bf16.msra.mxu1 %v8517_v47  ;;  %v8557_v46 = vld [vmem:[#allocation19 + $0x8c] ss:$16 sps:$4 sm:$0xff]   ;;  %v8556_v47 = vld [vmem:[#allocation19 + $0x80] ss:$16 sps:$4 sm:$0xff]  }
 0x91e   : > { %6866 = vmatprep.subr.bf16.mxu0 %v8518_v48  ;;  %6898 = vmatprep.subr.bf16.mxu1 %v8521_v49  ;;  %v8559_v48 = vld [vmem:[#allocation19 + $0x88] ss:$16 sps:$4 sm:$0xff]   ;;  %v8560_v49 = vld [vmem:[#allocation19 + $0xa4] ss:$16 sps:$4 sm:$0xff]  }
 0x921   : > { %6868 = vmatpush1.bf16.msra.mxu0 %v8520_v50  ;;  %6900 = vmatpush1.bf16.msra.mxu1 %v8523_v51  ;;  %v8563_v50 = vld [vmem:[#allocation19 + $0xac] ss:$16 sps:$4 sm:$0xff]   ;;  %v8562_v51 = vld [vmem:[#allocation19 + $0xa0] ss:$16 sps:$4 sm:$0xff]  }
 0x922   : > { %6870 = vmatprep.subr.bf16.mxu0 %v8524_v52  ;;  %6902 = vmatprep.subr.bf16.mxu1 %v8527_v53  ;;  %v8565_v52 = vld [vmem:[#allocation19 + $0xa8] ss:$16 sps:$4 sm:$0xff]   ;;  %v8566_v53 = vld [vmem:[#allocation19 + $0xc4] ss:$16 sps:$4 sm:$0xff]  }
 0x925   : > { %6872 = vmatpush1.bf16.msra.mxu0 %v8526_v54  ;;  %6904 = vmatpush1.bf16.msra.mxu1 %v8529_v55  ;;  %v8569_v54 = vld [vmem:[#allocation19 + $0xcc] ss:$16 sps:$4 sm:$0xff]   ;;  %v8568_v55 = vld [vmem:[#allocation19 + $0xc0] ss:$16 sps:$4 sm:$0xff]  }
 0x926   : > { %6906 = vmatprep.subr.bf16.mxu0 %v8530_v56  ;;  %6938 = vmatprep.subr.bf16.mxu1 %v8533_v57  ;;  %v8571_v56 = vld [vmem:[#allocation19 + $0xc8] ss:$16 sps:$4 sm:$0xff]   ;;  %v8572_v57 = vld [vmem:[#allocation19 + $0xe4] ss:$16 sps:$4 sm:$0xff]  }
 0x9da   : > { %v2807_v4 = vpop.f32.mrb[18].mxu0  ;;  %v2878_v58 = vpop.f32.mrb[18].mxu1 }
 0x9db   : > { %v2809_v5 = vpop.f32.mrb[19].mxu0  ;;  %v2880_v60 = vpop.f32.mrb[19].mxu1 }
 0x9dc   : > { %v2887_v62 = vcombine.low %v2807_v4, %v2809_v5  ;;  %v2888_v0 = vcombine.low %v2878_v58, %v2880_v60  ;;  %v8575_v4 = vld [vmem:[#allocation19 + $0xec] ss:$16 sps:$4 sm:$0xff]   ;;  %v8574_v58 = vld [vmem:[#allocation19 + $0xe0] ss:$16 sps:$4 sm:$0xff]   ;;  %v8577_v5 = vld [vmem:[#allocation19 + $0xe8] ss:$16 sps:$4 sm:$0xff]  }
 0x9dd   : > { %v10162_v60 = vld [vmem:[#allocation22 + $0x4] ss:$16 sps:$4 sm:$0xff]  }
 0x9de   : > { %v2895_v3 = vrot.slane %v2887_v62, %v9863_v63  ;;  %v2902_v40 = vrot.slane %v2888_v0, %v9863_v63  ;;  %v10164_v62 = vld [vmem:[#allocation22 + $0xc] ss:$16 sps:$4 sm:$0xff]   ;;  %v10166_v0 = vld [vmem:[#allocation22] ss:$16 sps:$4 sm:$0xff]  }
 0x9e0   : > { %v2903_v61 = vcombine.low %v2895_v3, %v2902_v40  ;;  %v10168_v3 = vld [vmem:[#allocation22 + $0x8] ss:$16 sps:$4 sm:$0xff]   ;;  %v10172_v40 = vld [vmem:[#allocation22 + $0x24] ss:$16 sps:$4 sm:$0xff]  }
 0x9e2   : > { %v2910_v44 = vrot.slane %v2903_v61, %v9863_v63  ;;  %v10174_v61 = vld [vmem:[#allocation22 + $0x2c] ss:$16 sps:$4 sm:$0xff]  }
 0x9e4   : > { %v2912_v2 = vadd.f32 %v2910_v44, %v2740_v45  ;;  %v10180_v44 = vld [vmem:[#allocation22 + $0x20] ss:$16 sps:$4 sm:$0xff]   ;;  %v10182_v45 = vld [vmem:[#allocation22 + $0x28] ss:$16 sps:$4 sm:$0xff]  }
 0x9e6   : > { %v5892_v8 = vmul.f32 -1.442695, %v2912_v2  ;;  %v2920_v25 = vrot.slane %v2912_v2, 3  ;;  %v10186_v2 = vld [vmem:[#allocation22 + $0x44] ss:$16 sps:$4 sm:$0xff]  }
 0x9e8   : > { %8682 = vpow2.f32 %v5892_v8  ;;  %v10188_v8 = vld [vmem:[#allocation22 + $0x4c] ss:$16 sps:$4 sm:$0xff]  }
 0x9f2   : > { %v8683_v9 = vpop.eup %8682 }
 0x9f3   : > { %v2916_v24 = vadd.f32 1.0, %v8683_v9  ;;  %v10194_v9 = vld [vmem:[#allocation22 + $0x40] ss:$16 sps:$4 sm:$0xff]  }
 0x9f5   : > { %8684 = vrcp.f32 %v2916_v24  ;;  %v10196_v24 = vld [vmem:[#allocation22 + $0x48] ss:$16 sps:$4 sm:$0xff]  }
 0x9f6   : > { %8686 = vtanh.f32 %v2920_v25  ;;  %v10200_v25 = vld [vmem:[#allocation22 + $0x64] ss:$16 sps:$4 sm:$0xff]  }
 0x9ff   : > { %v8685_v26 = vpop.eup %8684 }
 0xa00   : > { %v2924_v28 = vrot.slane %v8685_v26, 1  ;;  %v8687_v29 = vpop.eup %8686  ;;  %v2930_v33 = vrot.slane %v8685_v26, 2 }
 0xa01   : > { %v2927_v31 = vmul.f32 %v8687_v29, %v8685_v26  ;;  %v10202_v26 = vld [vmem:[#allocation22 + $0x6c] ss:$16 sps:$4 sm:$0xff]   ;;  %v10208_v29 = vld [vmem:[#allocation22 + $0x68] ss:$16 sps:$4 sm:$0xff]  }
 0xa02   : > { %v2926_v30 = vmul.f32 %v2924_v28, %v10140_v27  ;;  %v10206_v28 = vld [vmem:[#allocation22 + $0x60] ss:$16 sps:$4 sm:$0xff]  }
 0xa04   : > { %v2928_v32 = vadd.f32 %v2927_v31, %v2926_v30  ;;  %v10212_v30 = vld [vmem:[#allocation22 + $0x84] ss:$16 sps:$4 sm:$0xff]   ;;  %v10214_v31 = vld [vmem:[#allocation22 + $0x8c] ss:$16 sps:$4 sm:$0xff]  }
 0xa06   : > { %8688 = vtanh.f32 %v2928_v32  ;;  %v10218_v32 = vld [vmem:[#allocation22 + $0x80] ss:$16 sps:$4 sm:$0xff]  }
 0xa10   : > { %v8689_v34 = vpop.eup %8688 }
 0xa11   : > { %v2932_v10 = vmul.f32 %v8689_v34, %v2930_v33  ;;  %v10220_v33 = vld [vmem:[#allocation22 + $0x88] ss:$16 sps:$4 sm:$0xff]   ;;  %v10224_v34 = vld [vmem:[#allocation22 + $0xa4] ss:$16 sps:$4 sm:$0xff]  }
 0xa13   : > { %2933 = vst [vmem:[#allocation4 + $0x7] sm:$0x1] %v2932_v10  ;;  %2934 = vst [vmem:[#allocation5] sm:$0x1] %v2932_v10  ;;  %v10226_v10 = vld [vmem:[#allocation22 + $0xac] ss:$16 sps:$4 sm:$0xff]  }
 0xa1a   : > { %v2938_v12 = vld [vmem:[#allocation4] sm:$0xff]  ;;  %v2939_v13 = vld [vmem:[#allocation5] sm:$0xff] }
 0xa1b   : > { %v10155_v27 = vsel %vm2937_vm1, %v2938_v12, %v2939_v13  ;;  %v10238_v12 = vld [vmem:[#allocation22 + $0xcc] ss:$16 sps:$4 sm:$0xff]   ;;  %v10242_v13 = vld [vmem:[#allocation22 + $0xc0] ss:$16 sps:$4 sm:$0xff]  }
 0xa1c   : > { %2941 = vst [vmem:[#allocation4] sm:$0xff] %v10155_v27  ;;  %3126 = vmatmul.mubr.f32.vlgmr.msra.gmra.mrb[20].mxu0 %v10155_v27  ;;  %3197 = vmatmul.mubr.f32.vlgmr.msra.gmra.mrb[20].mxu1 %v10155_v27 }
 0xa1d   : > { %6908 = vmatpush1.bf16.msra.mxu0 %v8532_v6  ;;  %6940 = vmatpush1.bf16.msra.mxu1 %v8535_v11  ;;  %v10230_v6 = vld [vmem:[#allocation22 + $0xa0] ss:$16 sps:$4 sm:$0xff]   ;;  %v10232_v11 = vld [vmem:[#allocation22 + $0xa8] ss:$16 sps:$4 sm:$0xff]  }
 0xa1e   : > { %6910 = vmatprep.subr.bf16.mxu0 %v8536_v7  ;;  %6942 = vmatprep.subr.bf16.mxu1 %v8539_v14  ;;  %v10236_v7 = vld [vmem:[#allocation22 + $0xc4] ss:$16 sps:$4 sm:$0xff]   ;;  %v10244_v14 = vld [vmem:[#allocation22 + $0xc8] ss:$16 sps:$4 sm:$0xff]  }
 0xa1f   : > { %3367 = vmatprep.mubr.f32.mxu0 %v9200_v1  ;;  %3438 = vmatprep.mubr.f32.mxu1 %v9200_v1 }
 0xa21   : > { %6912 = vmatpush1.bf16.msra.mxu0 %v8538_v36  ;;  %6944 = vmatpush1.bf16.msra.mxu1 %v8541_v15  ;;  %v10250_v36 = vld [vmem:[#allocation22 + $0xec] ss:$16 sps:$4 sm:$0xff]   ;;  %v10254_v15 = vld [vmem:[#allocation22 + $0xe0] ss:$16 sps:$4 sm:$0xff]  }
 0xa22   : > { %6914 = vmatprep.subr.bf16.mxu0 %v8542_v16  ;;  %6946 = vmatprep.subr.bf16.mxu1 %v8545_v17  ;;  %v10256_v16 = vld [vmem:[#allocation22 + $0xe8] ss:$16 sps:$4 sm:$0xff]   ;;  %v3039_v17 = vld [vmem:[#allocation21] sm:$0xf] }
 0xa25   : > { %6916 = vmatpush1.bf16.msra.mxu0 %v8544_v18  ;;  %6948 = vmatpush1.bf16.msra.mxu1 %v8547_v19  ;;  %v3044_v18 = vrot.slane %v3039_v17, %v9829_v38  ;;  %v3052_v19 = vrot.slane %v3039_v17, %v823_v39 }
 0xa26   : > { %6918 = vmatprep.subr.bf16.mxu0 %v8548_v20  ;;  %6950 = vmatprep.subr.bf16.mxu1 %v8551_v21  ;;  %v3048_v20 = vrot.slane %v3039_v17, %v819_v41  ;;  %v3056_v21 = vrot.slane %v3039_v17, %v827_v42 }
 0xa29   : > { %6920 = vmatpush1.bf16.msra.mxu0 %v8550_v22  ;;  %6952 = vmatpush1.bf16.msra.mxu1 %v8553_v23 }
 0xa2a   : > { %6922 = vmatprep.subr.bf16.mxu0 %v8554_v43  ;;  %6954 = vmatprep.subr.bf16.mxu1 %v8557_v46 }
 0xa2d   : > { %6924 = vmatpush1.bf16.msra.mxu0 %v8556_v47  ;;  %6956 = vmatpush1.bf16.msra.mxu1 %v8559_v48 }
 0xa2e   : > { %6926 = vmatprep.subr.bf16.mxu0 %v8560_v49  ;;  %6958 = vmatprep.subr.bf16.mxu1 %v8563_v50 }
 0xa31   : > { %6928 = vmatpush1.bf16.msra.mxu0 %v8562_v51  ;;  %6960 = vmatpush1.bf16.msra.mxu1 %v8565_v52 }
 0xa32   : > { %6930 = vmatprep.subr.bf16.mxu0 %v8566_v53  ;;  %6962 = vmatprep.subr.bf16.mxu1 %v8569_v54 }
 0xa35   : > { %6932 = vmatpush1.bf16.msra.mxu0 %v8568_v55  ;;  %6964 = vmatpush1.bf16.msra.mxu1 %v8571_v56 }
 0xa36   : > { %6934 = vmatprep.subr.bf16.mxu0 %v8572_v57  ;;  %6966 = vmatprep.subr.bf16.mxu1 %v8575_v4 }
 0xa39   : > { %6936 = vmatpush1.bf16.msra.mxu0 %v8574_v58  ;;  %6968 = vmatpush1.bf16.msra.mxu1 %v8577_v5 }
 0xa3a   : > { %6970 = vmatprep.subr.bf16.mxu0 %v10162_v60  ;;  %7002 = vmatprep.subr.bf16.mxu1 %v10164_v62 }
 0xa3c   : > { %3368 = vmatmul.mubr.f32.vlgmr.msra.gmra.mrb[22].mxu0 %v10155_v27  ;;  %3439 = vmatmul.mubr.f32.vlgmr.msra.gmra.mrb[22].mxu1 %v10155_v27  ;;  %v10248_v27 = vld [vmem:[#allocation22 + $0xe4] ss:$16 sps:$4 sm:$0xff]  }
 0xa3d   : > { %6972 = vmatpush1.bf16.msra.mxu0 %v10166_v0  ;;  %7004 = vmatpush1.bf16.msra.mxu1 %v10168_v3 }
 0xa3e   : > { %6974 = vmatprep.subr.bf16.mxu0 %v10172_v40  ;;  %7006 = vmatprep.subr.bf16.mxu1 %v10174_v61 }
 0xa3f   : > { %3650 = vmatprep.mubr.f32.mxu0 %v9200_v1  ;;  %3721 = vmatprep.mubr.f32.mxu1 %v9200_v1 }
 0xa41   : > { %6976 = vmatpush1.bf16.msra.mxu0 %v10180_v44  ;;  %7008 = vmatpush1.bf16.msra.mxu1 %v10182_v45 }
 0xa42   : > { %6978 = vmatprep.subr.bf16.mxu0 %v10186_v2  ;;  %7010 = vmatprep.subr.bf16.mxu1 %v10188_v8 }
 0xa45   : > { %6980 = vmatpush1.bf16.msra.mxu0 %v10194_v9  ;;  %7012 = vmatpush1.bf16.msra.mxu1 %v10196_v24 }
 0xa46   : > { %6982 = vmatprep.subr.bf16.mxu0 %v10200_v25  ;;  %7014 = vmatprep.subr.bf16.mxu1 %v10202_v26 }
 0xa49   : > { %6984 = vmatpush1.bf16.msra.mxu0 %v10206_v28  ;;  %7016 = vmatpush1.bf16.msra.mxu1 %v10208_v29 }
 0xa4a   : > { %6986 = vmatprep.subr.bf16.mxu0 %v10212_v30  ;;  %7018 = vmatprep.subr.bf16.mxu1 %v10214_v31 }
 0xa4d   : > { %6988 = vmatpush1.bf16.msra.mxu0 %v10218_v32  ;;  %7020 = vmatpush1.bf16.msra.mxu1 %v10220_v33 }
 0xa4e   : > { %6990 = vmatprep.subr.bf16.mxu0 %v10224_v34  ;;  %7022 = vmatprep.subr.bf16.mxu1 %v10226_v10 }
 0xa51   : > { %6992 = vmatpush1.bf16.msra.mxu0 %v10230_v6  ;;  %7024 = vmatpush1.bf16.msra.mxu1 %v10232_v11 }
 0xa52   : > { %6994 = vmatprep.subr.bf16.mxu0 %v10236_v7  ;;  %7026 = vmatprep.subr.bf16.mxu1 %v10238_v12 }
 0xa55   : > { %6996 = vmatpush1.bf16.msra.mxu0 %v10242_v13  ;;  %7028 = vmatpush1.bf16.msra.mxu1 %v10244_v14 }
 0xa56   : > { %6998 = vmatprep.subr.bf16.mxu0 %v10248_v27  ;;  %7030 = vmatprep.subr.bf16.mxu1 %v10250_v36 }
 0xa59   : > { %7000 = vmatpush1.bf16.msra.mxu0 %v10254_v15  ;;  %7032 = vmatpush1.bf16.msra.mxu1 %v10256_v16 }
 0xa5a   : > { %7034 = vmatprep.subr.bf16.mxu0 %v10162_v60  ;;  %7066 = vmatprep.subr.bf16.mxu1 %v10164_v62 }
 0xa5c   : > { %3651 = vmatmul.mubr.f32.vlgmr.msra.gmra.mrb[24].mxu0 %v9200_v1  ;;  %3722 = vmatmul.mubr.f32.vlgmr.msra.gmra.mrb[24].mxu1 %v9200_v1 }
 0xa5d   : > { %7036 = vmatpush1.bf16.msra.mxu0 %v10166_v0  ;;  %7068 = vmatpush1.bf16.msra.mxu1 %v10168_v3 }
 0xa5e   : > { %7038 = vmatprep.subr.bf16.mxu0 %v10172_v40  ;;  %7070 = vmatprep.subr.bf16.mxu1 %v10174_v61 }
 0xa5f   : > { %3845 = vmatprep.mubr.f32.mxu0 %v9200_v1  ;;  %3916 = vmatprep.mubr.f32.mxu1 %v9200_v1 }
 0xa61   : > { %7040 = vmatpush1.bf16.msra.mxu0 %v10180_v44  ;;  %7072 = vmatpush1.bf16.msra.mxu1 %v10182_v45 }
 0xa62   : > { %7042 = vmatprep.subr.bf16.mxu0 %v10186_v2  ;;  %7074 = vmatprep.subr.bf16.mxu1 %v10188_v8 }
 0xa65   : > { %7044 = vmatpush1.bf16.msra.mxu0 %v10194_v9  ;;  %7076 = vmatpush1.bf16.msra.mxu1 %v10196_v24 }
 0xa66   : > { %7046 = vmatprep.subr.bf16.mxu0 %v10200_v25  ;;  %7078 = vmatprep.subr.bf16.mxu1 %v10202_v26 }
 0xa69   : > { %7048 = vmatpush1.bf16.msra.mxu0 %v10206_v28  ;;  %7080 = vmatpush1.bf16.msra.mxu1 %v10208_v29 }
 0xa6a   : > { %7050 = vmatprep.subr.bf16.mxu0 %v10212_v30  ;;  %7082 = vmatprep.subr.bf16.mxu1 %v10214_v31 }
 0xa6d   : > { %7052 = vmatpush1.bf16.msra.mxu0 %v10218_v32  ;;  %7084 = vmatpush1.bf16.msra.mxu1 %v10220_v33 }
 0xa6e   : > { %7054 = vmatprep.subr.bf16.mxu0 %v10224_v34  ;;  %7086 = vmatprep.subr.bf16.mxu1 %v10226_v10 }
 0xa71   : > { %7056 = vmatpush1.bf16.msra.mxu0 %v10230_v6  ;;  %7088 = vmatpush1.bf16.msra.mxu1 %v10232_v11 }
 0xa72   : > { %7058 = vmatprep.subr.bf16.mxu0 %v10236_v7  ;;  %7090 = vmatprep.subr.bf16.mxu1 %v10238_v12 }
 0xa75   : > { %7060 = vmatpush1.bf16.msra.mxu0 %v10242_v13  ;;  %7092 = vmatpush1.bf16.msra.mxu1 %v10244_v14 }
 0xa76   : > { %7062 = vmatprep.subr.bf16.mxu0 %v10248_v27  ;;  %7094 = vmatprep.subr.bf16.mxu1 %v10250_v36 }
 0xa79   : > { %7064 = vmatpush1.bf16.msra.mxu0 %v10254_v15  ;;  %7096 = vmatpush1.bf16.msra.mxu1 %v10256_v16 }
 0xa7a   : > { %7098 = vmatprep.subr.bf16.mxu0 %v10162_v60  ;;  %7130 = vmatprep.subr.bf16.mxu1 %v10164_v62 }
 0xaef   : > { %v3127_v22 = vpop.f32.mrb[20].mxu0  ;;  %v3198_v23 = vpop.f32.mrb[20].mxu1 }
 0xaf0   : > { %v3128_v43 = vadd.f32 %v3127_v22, %v3044_v18  ;;  %v3199_v46 = vadd.f32 %v3198_v23, %v3052_v19  ;;  %v3129_v47 = vpop.f32.mrb[21].mxu0  ;;  %v3200_v48 = vpop.f32.mrb[21].mxu1 }
 0xaf1   : > { %v3130_v49 = vadd.f32 %v3129_v47, %v3048_v20  ;;  %v3201_v50 = vadd.f32 %v3200_v48, %v3056_v21 }
 0xaf2   : > { %3203 = vst [vmem:[#allocation2] sm:$0xff] %v3128_v43  ;;  %3205 = vst [vmem:[#allocation2 + $0x10] sm:$0xff] %v3199_v46 }
 0xaf3   : > { %3204 = vst [vmem:[#allocation2 + $0x8] sm:$0xff] %v3130_v49  ;;  %3206 = vst [vmem:[#allocation2 + $0x18] sm:$0xff] %v3201_v50 }
 0xafa   : > { %v3454_v37 = vld [vmem:[#allocation2 + $0x1] ss:$8 sm:$0xf]  ;;  %v3459_v42 = vld [vmem:[#allocation2 + $0x2] ss:$8 sm:$0xf] }
 0xafb   : > { %v3464_v53 = vld [vmem:[#allocation2 + $0x3] ss:$8 sm:$0xf]  ;;  %v3469_v54 = vld [vmem:[#allocation2 + $0x4] ss:$8 sm:$0xf] }
 0xafc   : > { %v3474_v57 = vld [vmem:[#allocation2 + $0x5] ss:$8 sm:$0xf]  ;;  %v3479_v4 = vld [vmem:[#allocation2 + $0x6] ss:$8 sm:$0xf] }
 0xafd   : > { %v3484_v19 = vld [vmem:[#allocation2 + $0x7] ss:$8 sm:$0xf]  ;;  %v3449_v20 = vld [vmem:[#allocation2] ss:$8 sm:$0xf] }
 0xb0f   : > { %v3369_v51 = vpop.f32.mrb[22].mxu0  ;;  %v3440_v39 = vpop.f32.mrb[22].mxu1 }
 0xb10   : > { %3445 = vst [vmem:[#allocation3] sm:$0xff] %v3369_v51  ;;  %3447 = vst [vmem:[#allocation3 + $0x10] sm:$0xff] %v3440_v39  ;;  %v3371_v41 = vpop.f32.mrb[23].mxu0  ;;  %v3442_v52 = vpop.f32.mrb[23].mxu1 }
 0xb11   : > { %3446 = vst [vmem:[#allocation3 + $0x8] sm:$0xff] %v3371_v41  ;;  %3448 = vst [vmem:[#allocation3 + $0x18] sm:$0xff] %v3442_v52 }
 0xb18   : > { %v3455_v55 = vld [vmem:[#allocation3 + $0x6] ss:$8 sm:$0xf]  ;;  %v3460_v56 = vld [vmem:[#allocation3 + $0x5] ss:$8 sm:$0xf] }
 0xb19   : > { %v3456_v58 = vadd.f32 %v3455_v55, %v3454_v37  ;;  %v3461_v5 = vadd.f32 %v3460_v56, %v3459_v42  ;;  %v3465_v17 = vld [vmem:[#allocation3 + $0x4] ss:$8 sm:$0xf]  ;;  %v3470_v18 = vld [vmem:[#allocation3 + $0x3] ss:$8 sm:$0xf] }
 0xb1a   : > { %v3466_v21 = vadd.f32 %v3465_v17, %v3464_v53  ;;  %v3471_v22 = vadd.f32 %v3470_v18, %v3469_v54  ;;  %v3475_v23 = vld [vmem:[#allocation3 + $0x2] ss:$8 sm:$0xf]  ;;  %v3480_v43 = vld [vmem:[#allocation3 + $0x1] ss:$8 sm:$0xf] }
 0xb1b   : > { %v3476_v46 = vadd.f32 %v3475_v23, %v3474_v57  ;;  %v3481_v47 = vadd.f32 %v3480_v43, %v3479_v4  ;;  %v3485_v48 = vld [vmem:[#allocation3] ss:$8 sm:$0xf]  ;;  %3457 = vst.msk [vmem:[#allocation2 + $0x1] ss:$8 sm:$0xf] %vm9842_vm0, %v3456_v58 }
 0xb1c   : > { %3462 = vst.msk [vmem:[#allocation2 + $0x2] ss:$8 sm:$0xf] %vm9842_vm0, %v3461_v5  ;;  %v3450_v49 = vld [vmem:[#allocation3 + $0x7] ss:$8 sm:$0xf]  ;;  %v3486_v50 = vadd.f32 %v3485_v48, %v3484_v19 }
 0xb1d   : > { %3467 = vst.msk [vmem:[#allocation2 + $0x3] ss:$8 sm:$0xf] %vm9842_vm0, %v3466_v21  ;;  %3472 = vst.msk [vmem:[#allocation2 + $0x4] ss:$8 sm:$0xf] %vm9842_vm0, %v3471_v22  ;;  %v3451_v51 = vadd.f32 %v3450_v49, %v3449_v20 }
 0xb1e   : > { %3477 = vst.msk [vmem:[#allocation2 + $0x5] ss:$8 sm:$0xf] %vm9842_vm0, %v3476_v46  ;;  %3482 = vst.msk [vmem:[#allocation2 + $0x6] ss:$8 sm:$0xf] %vm9842_vm0, %v3481_v47 }
 0xb1f   : > { %3487 = vst.msk [vmem:[#allocation2 + $0x7] ss:$8 sm:$0xf] %vm9842_vm0, %v3486_v50  ;;  %3452 = vst.msk [vmem:[#allocation2] ss:$8 sm:$0xf] %vm9842_vm0, %v3451_v51 }
 0xb26   : > { %v3585_v4 = vld [vmem:[#allocation2] ss:$8 sm:$0xf] }
 0xb2f   : > { %v3652_v39 = vpop.f32.mrb[24].mxu0  ;;  %v3723_v41 = vpop.f32.mrb[24].mxu1 }
 0xb30   : > { %v3654_v52 = vpop.f32.mrb[25].mxu0  ;;  %v3725_v37 = vpop.f32.mrb[25].mxu1 }
 0xb31   : > { %v3732_v42 = vcombine.low %v3652_v39, %v3654_v52  ;;  %v3733_v53 = vcombine.low %v3723_v41, %v3725_v37 }
 0xb33   : > { %v3740_v54 = vrot.slane %v3732_v42, %v9863_v63  ;;  %v3747_v55 = vrot.slane %v3733_v53, %v9863_v63 }
 0xb35   : > { %v3748_v56 = vcombine.low %v3740_v54, %v3747_v55  ;;  %v3780_v55 = vld [vmem:[#allocation2 + $0x1] ss:$8 sm:$0xf] }
 0xb37   : > { %v3755_v57 = vrot.slane %v3748_v56, %v9863_v63 }
 0xb39   : > { %v3757_v58 = vadd.f32 %v3755_v57, %v3585_v4 }
 0xb3b   : > { %v5893_v5 = vmul.f32 -1.442695, %v3757_v58  ;;  %v3765_v18 = vrot.slane %v3757_v58, 3 }
 0xb3d   : > { %8690 = vpow2.f32 %v5893_v5 }
 0xb47   : > { %v8691_v17 = vpop.eup %8690 }
 0xb48   : > { %v3761_v59 = vadd.f32 1.0, %v8691_v17 }
 0xb4a   : > { %8692 = vrcp.f32 %v3761_v59 }
 0xb4b   : > { %8694 = vtanh.f32 %v3765_v18 }
 0xb54   : > { %v8693_v19 = vpop.eup %8692 }
 0xb55   : > { %v3769_v20 = vrot.slane %v8693_v19, 1  ;;  %v8695_v21 = vpop.eup %8694  ;;  %v3775_v46 = vrot.slane %v8693_v19, 2 }
 0xb56   : > { %v3772_v22 = vmul.f32 %v8695_v21, %v8693_v19 }
 0xb57   : > { %v3771_v23 = vmul.f32 0.0, %v3769_v20 }
 0xb59   : > { %v10326_v43 = vadd.f32 %v3772_v22, %v3771_v23 }
 0xb5b   : > { %8696 = vtanh.f32 %v10326_v43 }
 0xb65   : > { %v8697_v47 = vpop.eup %8696 }
 0xb66   : > { %v3777_v48 = vmul.f32 %v8697_v47, %v3775_v46 }
 0xb68   : > { %3778 = vst [vmem:[#allocation4] sm:$0x1] %v3777_v48  ;;  %3779 = vst [vmem:[#allocation5 + $0x7] sm:$0x1] %v3777_v48  ;;  %3846 = vmatmul.mubr.f32.vlgmr.msra.gmra.mrb[26].mxu0 %v3777_v48  ;;  %3917 = vmatmul.mubr.f32.vlgmr.msra.gmra.mrb[26].mxu1 %v3777_v48 }
 0xb69   : > { %7100 = vmatpush1.bf16.msra.mxu0 %v10166_v0  ;;  %7132 = vmatpush1.bf16.msra.mxu1 %v10168_v3 }
 0xb6a   : > { %7102 = vmatprep.subr.bf16.mxu0 %v10172_v40  ;;  %7134 = vmatprep.subr.bf16.mxu1 %v10174_v61 }
 0xb6b   : > { %4040 = vmatprep.mubr.f32.mxu0 %v9200_v1  ;;  %4111 = vmatprep.mubr.f32.mxu1 %v9200_v1 }
 0xb6d   : > { %7104 = vmatpush1.bf16.msra.mxu0 %v10180_v44  ;;  %7136 = vmatpush1.bf16.msra.mxu1 %v10182_v45 }
 0xb6e   : > { %7106 = vmatprep.subr.bf16.mxu0 %v10186_v2  ;;  %7138 = vmatprep.subr.bf16.mxu1 %v10188_v8 }
 0xb71   : > { %7108 = vmatpush1.bf16.msra.mxu0 %v10194_v9  ;;  %7140 = vmatpush1.bf16.msra.mxu1 %v10196_v24 }
 0xb72   : > { %7110 = vmatprep.subr.bf16.mxu0 %v10200_v25  ;;  %7142 = vmatprep.subr.bf16.mxu1 %v10202_v26 }
 0xb75   : > { %7112 = vmatpush1.bf16.msra.mxu0 %v10206_v28  ;;  %7144 = vmatpush1.bf16.msra.mxu1 %v10208_v29 }
 0xb76   : > { %7114 = vmatprep.subr.bf16.mxu0 %v10212_v30  ;;  %7146 = vmatprep.subr.bf16.mxu1 %v10214_v31 }
 0xb79   : > { %7116 = vmatpush1.bf16.msra.mxu0 %v10218_v32  ;;  %7148 = vmatpush1.bf16.msra.mxu1 %v10220_v33 }
 0xb7a   : > { %7118 = vmatprep.subr.bf16.mxu0 %v10224_v34  ;;  %7150 = vmatprep.subr.bf16.mxu1 %v10226_v10 }
 0xb7d   : > { %7120 = vmatpush1.bf16.msra.mxu0 %v10230_v6  ;;  %7152 = vmatpush1.bf16.msra.mxu1 %v10232_v11 }
 0xb7e   : > { %7122 = vmatprep.subr.bf16.mxu0 %v10236_v7  ;;  %7154 = vmatprep.subr.bf16.mxu1 %v10238_v12 }
 0xb81   : > { %7124 = vmatpush1.bf16.msra.mxu0 %v10242_v13  ;;  %7156 = vmatpush1.bf16.msra.mxu1 %v10244_v14 }
 0xb82   : > { %7126 = vmatprep.subr.bf16.mxu0 %v10248_v27  ;;  %7158 = vmatprep.subr.bf16.mxu1 %v10250_v36 }
 0xb85   : > { %7128 = vmatpush1.bf16.msra.mxu0 %v10254_v15  ;;  %7160 = vmatpush1.bf16.msra.mxu1 %v10256_v16 }
 0xb86   : > { %7162 = vmatprep.subr.bf16.mxu0 %v10162_v60  ;;  %7194 = vmatprep.subr.bf16.mxu1 %v10164_v62 }
 0xc3b   : > { %v3847_v49 = vpop.f32.mrb[26].mxu0  ;;  %v3918_v50 = vpop.f32.mrb[26].mxu1 }
 0xc3c   : > { %v3849_v51 = vpop.f32.mrb[27].mxu0  ;;  %v3920_v39 = vpop.f32.mrb[27].mxu1 }
 0xc3d   : > { %v3927_v41 = vcombine.low %v3847_v49, %v3849_v51  ;;  %v3928_v52 = vcombine.low %v3918_v50, %v3920_v39 }
 0xc3f   : > { %v3935_v37 = vrot.slane %v3927_v41, %v9863_v63  ;;  %v3942_v42 = vrot.slane %v3928_v52, %v9863_v63 }
 0xc41   : > { %v3943_v53 = vcombine.low %v3935_v37, %v3942_v42  ;;  %v3975_v42 = vld [vmem:[#allocation2 + $0x2] ss:$8 sm:$0xf] }
 0xc43   : > { %v3950_v54 = vrot.slane %v3943_v53, %v9863_v63 }
 0xc45   : > { %v3952_v56 = vadd.f32 %v3950_v54, %v3780_v55 }
 0xc47   : > { %v5894_v57 = vmul.f32 -1.442695, %v3952_v56  ;;  %v3960_v5 = vrot.slane %v3952_v56, 3 }
 0xc49   : > { %8698 = vpow2.f32 %v5894_v57 }
 0xc53   : > { %v8699_v4 = vpop.eup %8698 }
 0xc54   : > { %v3956_v58 = vadd.f32 1.0, %v8699_v4 }
 0xc56   : > { %8700 = vrcp.f32 %v3956_v58 }
 0xc57   : > { %8702 = vtanh.f32 %v3960_v5 }
 0xc60   : > { %v8701_v17 = vpop.eup %8700 }
 0xc61   : > { %v3964_v59 = vrot.slane %v8701_v17, 1  ;;  %v8703_v18 = vpop.eup %8702  ;;  %v3970_v22 = vrot.slane %v8701_v17, 2 }
 0xc62   : > { %v3967_v19 = vmul.f32 %v8703_v18, %v8701_v17 }
 0xc63   : > { %v3966_v20 = vmul.f32 %v3964_v59, %v10326_v43 }
 0xc65   : > { %v10367_v21 = vadd.f32 %v3967_v19, %v3966_v20 }
 0xc67   : > { %8704 = vtanh.f32 %v10367_v21 }
 0xc71   : > { %v8705_v23 = vpop.eup %8704 }
 0xc72   : > { %v3972_v46 = vmul.f32 %v8705_v23, %v3970_v22 }
 0xc74   : > { %3973 = vst [vmem:[#allocation4 + $0x1] sm:$0x1] %v3972_v46  ;;  %3974 = vst [vmem:[#allocation5 + $0x6] sm:$0x1] %v3972_v46  ;;  %4041 = vmatmul.mubr.f32.vlgmr.msra.gmra.mrb[28].mxu0 %v3972_v46  ;;  %4112 = vmatmul.mubr.f32.vlgmr.msra.gmra.mrb[28].mxu1 %v3972_v46 }
 0xc75   : > { %7164 = vmatpush1.bf16.msra.mxu0 %v10166_v0  ;;  %7196 = vmatpush1.bf16.msra.mxu1 %v10168_v3 }
 0xc76   : > { %7166 = vmatprep.subr.bf16.mxu0 %v10172_v40  ;;  %7198 = vmatprep.subr.bf16.mxu1 %v10174_v61 }
 0xc77   : > { %4235 = vmatprep.mubr.f32.mxu0 %v9200_v1  ;;  %4306 = vmatprep.mubr.f32.mxu1 %v9200_v1 }
 0xc79   : > { %7168 = vmatpush1.bf16.msra.mxu0 %v10180_v44  ;;  %7200 = vmatpush1.bf16.msra.mxu1 %v10182_v45 }
 0xc7a   : > { %7170 = vmatprep.subr.bf16.mxu0 %v10186_v2  ;;  %7202 = vmatprep.subr.bf16.mxu1 %v10188_v8 }
 0xc7d   : > { %7172 = vmatpush1.bf16.msra.mxu0 %v10194_v9  ;;  %7204 = vmatpush1.bf16.msra.mxu1 %v10196_v24 }
 0xc7e   : > { %7174 = vmatprep.subr.bf16.mxu0 %v10200_v25  ;;  %7206 = vmatprep.subr.bf16.mxu1 %v10202_v26 }
 0xc81   : > { %7176 = vmatpush1.bf16.msra.mxu0 %v10206_v28  ;;  %7208 = vmatpush1.bf16.msra.mxu1 %v10208_v29 }
 0xc82   : > { %7178 = vmatprep.subr.bf16.mxu0 %v10212_v30  ;;  %7210 = vmatprep.subr.bf16.mxu1 %v10214_v31 }
 0xc85   : > { %7180 = vmatpush1.bf16.msra.mxu0 %v10218_v32  ;;  %7212 = vmatpush1.bf16.msra.mxu1 %v10220_v33 }
 0xc86   : > { %7182 = vmatprep.subr.bf16.mxu0 %v10224_v34  ;;  %7214 = vmatprep.subr.bf16.mxu1 %v10226_v10 }
 0xc89   : > { %7184 = vmatpush1.bf16.msra.mxu0 %v10230_v6  ;;  %7216 = vmatpush1.bf16.msra.mxu1 %v10232_v11 }
 0xc8a   : > { %7186 = vmatprep.subr.bf16.mxu0 %v10236_v7  ;;  %7218 = vmatprep.subr.bf16.mxu1 %v10238_v12 }
 0xc8d   : > { %7188 = vmatpush1.bf16.msra.mxu0 %v10242_v13  ;;  %7220 = vmatpush1.bf16.msra.mxu1 %v10244_v14 }
 0xc8e   : > { %7190 = vmatprep.subr.bf16.mxu0 %v10248_v27  ;;  %7222 = vmatprep.subr.bf16.mxu1 %v10250_v36 }
 0xc91   : > { %7192 = vmatpush1.bf16.msra.mxu0 %v10254_v15  ;;  %7224 = vmatpush1.bf16.msra.mxu1 %v10256_v16 }
 0xc92   : > { %7226 = vmatprep.subr.bf16.mxu0 %v10162_v60  ;;  %7258 = vmatprep.subr.bf16.mxu1 %v10164_v62 }
 0xd47   : > { %v4042_v43 = vpop.f32.mrb[28].mxu0  ;;  %v4113_v47 = vpop.f32.mrb[28].mxu1 }
 0xd48   : > { %v4044_v48 = vpop.f32.mrb[29].mxu0  ;;  %v4115_v49 = vpop.f32.mrb[29].mxu1 }
 0xd49   : > { %v4122_v50 = vcombine.low %v4042_v43, %v4044_v48  ;;  %v4123_v51 = vcombine.low %v4113_v47, %v4115_v49 }
 0xd4b   : > { %v4130_v39 = vrot.slane %v4122_v50, %v9863_v63  ;;  %v4137_v41 = vrot.slane %v4123_v51, %v9863_v63 }
 0xd4d   : > { %v4138_v52 = vcombine.low %v4130_v39, %v4137_v41  ;;  %v4170_v41 = vld [vmem:[#allocation2 + $0x3] ss:$8 sm:$0xf] }
 0xd4f   : > { %v4145_v37 = vrot.slane %v4138_v52, %v9863_v63 }
 0xd51   : > { %v4147_v53 = vadd.f32 %v4145_v37, %v3975_v42 }
 0xd53   : > { %v5895_v54 = vmul.f32 -1.442695, %v4147_v53  ;;  %v4155_v57 = vrot.slane %v4147_v53, 3 }
 0xd55   : > { %8706 = vpow2.f32 %v5895_v54 }
 0xd5f   : > { %v8707_v55 = vpop.eup %8706 }
 0xd60   : > { %v4151_v56 = vadd.f32 1.0, %v8707_v55 }
 0xd62   : > { %8708 = vrcp.f32 %v4151_v56 }
 0xd63   : > { %8710 = vtanh.f32 %v4155_v57 }
 0xd6c   : > { %v8709_v4 = vpop.eup %8708 }
 0xd6d   : > { %v4159_v58 = vrot.slane %v8709_v4, 1  ;;  %v8711_v5 = vpop.eup %8710  ;;  %v4165_v19 = vrot.slane %v8709_v4, 2 }
 0xd6e   : > { %v4162_v17 = vmul.f32 %v8711_v5, %v8709_v4 }
 0xd6f   : > { %v4161_v59 = vmul.f32 %v4159_v58, %v10367_v21 }
 0xd71   : > { %v10408_v18 = vadd.f32 %v4162_v17, %v4161_v59 }
 0xd73   : > { %8712 = vtanh.f32 %v10408_v18 }
 0xd7d   : > { %v8713_v20 = vpop.eup %8712 }
 0xd7e   : > { %v4167_v22 = vmul.f32 %v8713_v20, %v4165_v19 }
 0xd80   : > { %4168 = vst [vmem:[#allocation4 + $0x2] sm:$0x1] %v4167_v22  ;;  %4169 = vst [vmem:[#allocation5 + $0x5] sm:$0x1] %v4167_v22  ;;  %4236 = vmatmul.mubr.f32.vlgmr.msra.gmra.mrb[30].mxu0 %v4167_v22  ;;  %4307 = vmatmul.mubr.f32.vlgmr.msra.gmra.mrb[30].mxu1 %v4167_v22 }
 0xd81   : > { %7228 = vmatpush1.bf16.msra.mxu0 %v10166_v0  ;;  %7260 = vmatpush1.bf16.msra.mxu1 %v10168_v3 }
 0xd82   : > { %7230 = vmatprep.subr.bf16.mxu0 %v10172_v40  ;;  %7262 = vmatprep.subr.bf16.mxu1 %v10174_v61 }
 0xd83   : > { %4430 = vmatprep.mubr.f32.mxu0 %v9200_v1  ;;  %4501 = vmatprep.mubr.f32.mxu1 %v9200_v1 }
 0xd85   : > { %7232 = vmatpush1.bf16.msra.mxu0 %v10180_v44  ;;  %7264 = vmatpush1.bf16.msra.mxu1 %v10182_v45 }
 0xd86   : > { %7234 = vmatprep.subr.bf16.mxu0 %v10186_v2  ;;  %7266 = vmatprep.subr.bf16.mxu1 %v10188_v8 }
 0xd89   : > { %7236 = vmatpush1.bf16.msra.mxu0 %v10194_v9  ;;  %7268 = vmatpush1.bf16.msra.mxu1 %v10196_v24 }
 0xd8a   : > { %7238 = vmatprep.subr.bf16.mxu0 %v10200_v25  ;;  %7270 = vmatprep.subr.bf16.mxu1 %v10202_v26 }
 0xd8d   : > { %7240 = vmatpush1.bf16.msra.mxu0 %v10206_v28  ;;  %7272 = vmatpush1.bf16.msra.mxu1 %v10208_v29 }
 0xd8e   : > { %7242 = vmatprep.subr.bf16.mxu0 %v10212_v30  ;;  %7274 = vmatprep.subr.bf16.mxu1 %v10214_v31 }
 0xd91   : > { %7244 = vmatpush1.bf16.msra.mxu0 %v10218_v32  ;;  %7276 = vmatpush1.bf16.msra.mxu1 %v10220_v33 }
 0xd92   : > { %7246 = vmatprep.subr.bf16.mxu0 %v10224_v34  ;;  %7278 = vmatprep.subr.bf16.mxu1 %v10226_v10 }
 0xd95   : > { %7248 = vmatpush1.bf16.msra.mxu0 %v10230_v6  ;;  %7280 = vmatpush1.bf16.msra.mxu1 %v10232_v11 }
 0xd96   : > { %7250 = vmatprep.subr.bf16.mxu0 %v10236_v7  ;;  %7282 = vmatprep.subr.bf16.mxu1 %v10238_v12 }
 0xd99   : > { %7252 = vmatpush1.bf16.msra.mxu0 %v10242_v13  ;;  %7284 = vmatpush1.bf16.msra.mxu1 %v10244_v14 }
 0xd9a   : > { %7254 = vmatprep.subr.bf16.mxu0 %v10248_v27  ;;  %7286 = vmatprep.subr.bf16.mxu1 %v10250_v36 }
 0xd9d   : > { %7256 = vmatpush1.bf16.msra.mxu0 %v10254_v15  ;;  %7288 = vmatpush1.bf16.msra.mxu1 %v10256_v16 }
 0xd9e   : > { %7290 = vmatprep.subr.bf16.mxu0 %v10162_v60  ;;  %7322 = vmatprep.subr.bf16.mxu1 %v10164_v62 }
 0xe53   : > { %v4237_v21 = vpop.f32.mrb[30].mxu0  ;;  %v4308_v23 = vpop.f32.mrb[30].mxu1 }
 0xe54   : > { %v4239_v46 = vpop.f32.mrb[31].mxu0  ;;  %v4310_v43 = vpop.f32.mrb[31].mxu1 }
 0xe55   : > { %v4317_v47 = vcombine.low %v4237_v21, %v4239_v46  ;;  %v4318_v48 = vcombine.low %v4308_v23, %v4310_v43 }
 0xe57   : > { %v4325_v49 = vrot.slane %v4317_v47, %v9863_v63  ;;  %v4332_v50 = vrot.slane %v4318_v48, %v9863_v63 }
 0xe59   : > { %v4333_v51 = vcombine.low %v4325_v49, %v4332_v50  ;;  %v4365_v50 = vld [vmem:[#allocation2 + $0x4] ss:$8 sm:$0xf] }
 0xe5b   : > { %v4340_v39 = vrot.slane %v4333_v51, %v9863_v63 }
 0xe5d   : > { %v4342_v52 = vadd.f32 %v4340_v39, %v4170_v41 }
 0xe5f   : > { %v5896_v37 = vmul.f32 -1.442695, %v4342_v52  ;;  %v4350_v54 = vrot.slane %v4342_v52, 3 }
 0xe61   : > { %8714 = vpow2.f32 %v5896_v37 }
 0xe6b   : > { %v8715_v42 = vpop.eup %8714 }
 0xe6c   : > { %v4346_v53 = vadd.f32 1.0, %v8715_v42 }
 0xe6e   : > { %8716 = vrcp.f32 %v4346_v53 }
 0xe6f   : > { %8718 = vtanh.f32 %v4350_v54 }
 0xe78   : > { %v8717_v55 = vpop.eup %8716 }
 0xe79   : > { %v4354_v56 = vrot.slane %v8717_v55, 1  ;;  %v8719_v57 = vpop.eup %8718  ;;  %v4360_v17 = vrot.slane %v8717_v55, 2 }
 0xe7a   : > { %v4357_v4 = vmul.f32 %v8719_v57, %v8717_v55 }
 0xe7b   : > { %v4356_v58 = vmul.f32 %v4354_v56, %v10408_v18 }
 0xe7d   : > { %v10449_v5 = vadd.f32 %v4357_v4, %v4356_v58 }
 0xe7f   : > { %8720 = vtanh.f32 %v10449_v5 }
 0xe89   : > { %v8721_v59 = vpop.eup %8720 }
 0xe8a   : > { %v4362_v19 = vmul.f32 %v8721_v59, %v4360_v17 }
 0xe8c   : > { %4363 = vst [vmem:[#allocation4 + $0x3] sm:$0x1] %v4362_v19  ;;  %4364 = vst [vmem:[#allocation5 + $0x4] sm:$0x1] %v4362_v19  ;;  %4431 = vmatmul.mubr.f32.vlgmr.msra.gmra.mrb[32].mxu0 %v4362_v19  ;;  %4502 = vmatmul.mubr.f32.vlgmr.msra.gmra.mrb[32].mxu1 %v4362_v19 }
 0xe8d   : > { %7292 = vmatpush1.bf16.msra.mxu0 %v10166_v0  ;;  %7324 = vmatpush1.bf16.msra.mxu1 %v10168_v3 }
 0xe8e   : > { %7294 = vmatprep.subr.bf16.mxu0 %v10172_v40  ;;  %7326 = vmatprep.subr.bf16.mxu1 %v10174_v61 }
 0xe8f   : > { %4625 = vmatprep.mubr.f32.mxu0 %v9200_v1  ;;  %4696 = vmatprep.mubr.f32.mxu1 %v9200_v1 }
 0xe91   : > { %7296 = vmatpush1.bf16.msra.mxu0 %v10180_v44  ;;  %7328 = vmatpush1.bf16.msra.mxu1 %v10182_v45 }
 0xe92   : > { %7298 = vmatprep.subr.bf16.mxu0 %v10186_v2  ;;  %7330 = vmatprep.subr.bf16.mxu1 %v10188_v8 }
 0xe95   : > { %7300 = vmatpush1.bf16.msra.mxu0 %v10194_v9  ;;  %7332 = vmatpush1.bf16.msra.mxu1 %v10196_v24 }
 0xe96   : > { %7302 = vmatprep.subr.bf16.mxu0 %v10200_v25  ;;  %7334 = vmatprep.subr.bf16.mxu1 %v10202_v26 }
 0xe99   : > { %7304 = vmatpush1.bf16.msra.mxu0 %v10206_v28  ;;  %7336 = vmatpush1.bf16.msra.mxu1 %v10208_v29 }
 0xe9a   : > { %7306 = vmatprep.subr.bf16.mxu0 %v10212_v30  ;;  %7338 = vmatprep.subr.bf16.mxu1 %v10214_v31 }
 0xe9d   : > { %7308 = vmatpush1.bf16.msra.mxu0 %v10218_v32  ;;  %7340 = vmatpush1.bf16.msra.mxu1 %v10220_v33 }
 0xe9e   : > { %7310 = vmatprep.subr.bf16.mxu0 %v10224_v34  ;;  %7342 = vmatprep.subr.bf16.mxu1 %v10226_v10 }
 0xea1   : > { %7312 = vmatpush1.bf16.msra.mxu0 %v10230_v6  ;;  %7344 = vmatpush1.bf16.msra.mxu1 %v10232_v11 }
 0xea2   : > { %7314 = vmatprep.subr.bf16.mxu0 %v10236_v7  ;;  %7346 = vmatprep.subr.bf16.mxu1 %v10238_v12 }
 0xea5   : > { %7316 = vmatpush1.bf16.msra.mxu0 %v10242_v13  ;;  %7348 = vmatpush1.bf16.msra.mxu1 %v10244_v14 }
 0xea6   : > { %7318 = vmatprep.subr.bf16.mxu0 %v10248_v27  ;;  %7350 = vmatprep.subr.bf16.mxu1 %v10250_v36 }
 0xea9   : > { %7320 = vmatpush1.bf16.msra.mxu0 %v10254_v15  ;;  %7352 = vmatpush1.bf16.msra.mxu1 %v10256_v16 }
 0xeaa   : > { %7354 = vmatprep.subr.bf16.mxu0 %v10162_v60  ;;  %7386 = vmatprep.subr.bf16.mxu1 %v10164_v62 }
 0xf5f   : > { %v4432_v18 = vpop.f32.mrb[32].mxu0  ;;  %v4503_v20 = vpop.f32.mrb[32].mxu1 }
 0xf60   : > { %v4434_v22 = vpop.f32.mrb[33].mxu0  ;;  %v4505_v21 = vpop.f32.mrb[33].mxu1 }
 0xf61   : > { %v4512_v23 = vcombine.low %v4432_v18, %v4434_v22  ;;  %v4513_v46 = vcombine.low %v4503_v20, %v4505_v21 }
 0xf63   : > { %v4520_v43 = vrot.slane %v4512_v23, %v9863_v63  ;;  %v4527_v47 = vrot.slane %v4513_v46, %v9863_v63  ;;  %v8796_v23 = vld [vmem:[#allocation22] ss:$16 sps:$4 sm:$0xff]   ;;  %v8797_v46 = vld [vmem:[#allocation22 + $0x8] ss:$16 sps:$4 sm:$0xff]  }
 0xf65   : > { %v4528_v48 = vcombine.low %v4520_v43, %v4527_v47  ;;  %v8798_v43 = vld [vmem:[#allocation22 + $0x24] ss:$16 sps:$4 sm:$0xff]   ;;  %v8799_v47 = vld [vmem:[#allocation22 + $0x2c] ss:$16 sps:$4 sm:$0xff]  }
 0xf67   : > { %v4535_v49 = vrot.slane %v4528_v48, %v9863_v63  ;;  %v8800_v48 = vld [vmem:[#allocation22 + $0x20] ss:$16 sps:$4 sm:$0xff]  }
 0xf69   : > { %v4537_v51 = vadd.f32 %v4535_v49, %v4365_v50  ;;  %v8801_v49 = vld [vmem:[#allocation22 + $0x28] ss:$16 sps:$4 sm:$0xff]   ;;  %v8802_v50 = vld [vmem:[#allocation22 + $0x44] ss:$16 sps:$4 sm:$0xff]  }
 0xf6b   : > { %v5897_v39 = vmul.f32 -1.442695, %v4537_v51  ;;  %v4545_v37 = vrot.slane %v4537_v51, 3  ;;  %v8803_v51 = vld [vmem:[#allocation22 + $0x4c] ss:$16 sps:$4 sm:$0xff]  }
 0xf6d   : > { %8722 = vpow2.f32 %v5897_v39  ;;  %v8804_v39 = vld [vmem:[#allocation22 + $0x40] ss:$16 sps:$4 sm:$0xff]  }
 0xf77   : > { %v8723_v41 = vpop.eup %8722 }
 0xf78   : > { %v4541_v52 = vadd.f32 1.0, %v8723_v41  ;;  %v8805_v41 = vld [vmem:[#allocation22 + $0x48] ss:$16 sps:$4 sm:$0xff]  }
 0xf7a   : > { %8724 = vrcp.f32 %v4541_v52  ;;  %v8806_v52 = vld [vmem:[#allocation22 + $0x64] ss:$16 sps:$4 sm:$0xff]  }
 0xf7b   : > { %8726 = vtanh.f32 %v4545_v37  ;;  %v8807_v37 = vld [vmem:[#allocation22 + $0x6c] ss:$16 sps:$4 sm:$0xff]  }
 0xf84   : > { %v8725_v42 = vpop.eup %8724 }
 0xf85   : > { %v4549_v53 = vrot.slane %v8725_v42, 1  ;;  %v8727_v54 = vpop.eup %8726  ;;  %v4555_v4 = vrot.slane %v8725_v42, 2 }
 0xf86   : > { %v4552_v55 = vmul.f32 %v8727_v54, %v8725_v42  ;;  %v8808_v42 = vld [vmem:[#allocation22 + $0x60] ss:$16 sps:$4 sm:$0xff]   ;;  %v8810_v54 = vld [vmem:[#allocation22 + $0x84] ss:$16 sps:$4 sm:$0xff]  }
 0xf87   : > { %v4551_v56 = vmul.f32 %v4549_v53, %v10449_v5  ;;  %v8809_v53 = vld [vmem:[#allocation22 + $0x68] ss:$16 sps:$4 sm:$0xff]  }
 0xf89   : > { %v10490_v57 = vadd.f32 %v4552_v55, %v4551_v56  ;;  %v8811_v55 = vld [vmem:[#allocation22 + $0x8c] ss:$16 sps:$4 sm:$0xff]  }
 0xf8b   : > { %8728 = vtanh.f32 %v10490_v57 }
 0xf95   : > { %v8729_v58 = vpop.eup %8728 }
 0xf96   : > { %v4557_v17 = vmul.f32 %v8729_v58, %v4555_v4 }
 0xf98   : > { %4558 = vst [vmem:[#allocation4 + $0x4] sm:$0x1] %v4557_v17  ;;  %4559 = vst [vmem:[#allocation5 + $0x3] sm:$0x1] %v4557_v17  ;;  %4626 = vmatmul.mubr.f32.vlgmr.msra.gmra.mrb[34].mxu0 %v4557_v17  ;;  %4697 = vmatmul.mubr.f32.vlgmr.msra.gmra.mrb[34].mxu1 %v4557_v17 }
 0xf99   : > { %7356 = vmatpush1.bf16.msra.mxu0 %v10166_v0  ;;  %7388 = vmatpush1.bf16.msra.mxu1 %v10168_v3 }
 0xf9a   : > { %7358 = vmatprep.subr.bf16.mxu0 %v10172_v40  ;;  %7390 = vmatprep.subr.bf16.mxu1 %v10174_v61 }
 0xf9b   : > { %4820 = vmatprep.mubr.f32.mxu0 %v9200_v1  ;;  %4891 = vmatprep.mubr.f32.mxu1 %v9200_v1 }
 0xf9d   : > { %7360 = vmatpush1.bf16.msra.mxu0 %v10180_v44  ;;  %7392 = vmatpush1.bf16.msra.mxu1 %v10182_v45 }
 0xf9e   : > { %7362 = vmatprep.subr.bf16.mxu0 %v10186_v2  ;;  %7394 = vmatprep.subr.bf16.mxu1 %v10188_v8 }
 0xfa1   : > { %7364 = vmatpush1.bf16.msra.mxu0 %v10194_v9  ;;  %7396 = vmatpush1.bf16.msra.mxu1 %v10196_v24 }
 0xfa2   : > { %7366 = vmatprep.subr.bf16.mxu0 %v10200_v25  ;;  %7398 = vmatprep.subr.bf16.mxu1 %v10202_v26  ;;  %v4560_v25 = vld [vmem:[#allocation2 + $0x5] ss:$8 sm:$0xf] }
 0xfa5   : > { %7368 = vmatpush1.bf16.msra.mxu0 %v10206_v28  ;;  %7400 = vmatpush1.bf16.msra.mxu1 %v10208_v29 }
 0xfa6   : > { %7370 = vmatprep.subr.bf16.mxu0 %v10212_v30  ;;  %7402 = vmatprep.subr.bf16.mxu1 %v10214_v31 }
 0xfa9   : > { %7372 = vmatpush1.bf16.msra.mxu0 %v10218_v32  ;;  %7404 = vmatpush1.bf16.msra.mxu1 %v10220_v33 }
 0xfaa   : > { %7374 = vmatprep.subr.bf16.mxu0 %v10224_v34  ;;  %7406 = vmatprep.subr.bf16.mxu1 %v10226_v10 }
 0xfad   : > { %7376 = vmatpush1.bf16.msra.mxu0 %v10230_v6  ;;  %7408 = vmatpush1.bf16.msra.mxu1 %v10232_v11 }
 0xfae   : > { %7378 = vmatprep.subr.bf16.mxu0 %v10236_v7  ;;  %7410 = vmatprep.subr.bf16.mxu1 %v10238_v12 }
 0xfb1   : > { %7380 = vmatpush1.bf16.msra.mxu0 %v10242_v13  ;;  %7412 = vmatpush1.bf16.msra.mxu1 %v10244_v14 }
 0xfb2   : > { %7382 = vmatprep.subr.bf16.mxu0 %v10248_v27  ;;  %7414 = vmatprep.subr.bf16.mxu1 %v10250_v36 }
 0xfb5   : > { %7384 = vmatpush1.bf16.msra.mxu0 %v10254_v15  ;;  %7416 = vmatpush1.bf16.msra.mxu1 %v10256_v16 }
 0xfb6   : > { %7418 = vmatprep.subr.bf16.mxu0 %v10162_v60  ;;  %7450 = vmatprep.subr.bf16.mxu1 %v10164_v62 }
0x106b   : > { %v4627_v0 = vpop.f32.mrb[34].mxu0  ;;  %v4698_v3 = vpop.f32.mrb[34].mxu1 }
0x106c   : > { %v4629_v40 = vpop.f32.mrb[35].mxu0  ;;  %v4700_v61 = vpop.f32.mrb[35].mxu1 }
0x106d   : > { %v4707_v44 = vcombine.low %v4627_v0, %v4629_v40  ;;  %v4708_v45 = vcombine.low %v4698_v3, %v4700_v61 }
0x106f   : > { %v4715_v2 = vrot.slane %v4707_v44, %v9863_v63  ;;  %v4722_v8 = vrot.slane %v4708_v45, %v9863_v63 }
0x1071   : > { %v4723_v9 = vcombine.low %v4715_v2, %v4722_v8  ;;  %v5941_v2 = vld [vmem:[%s10754_s11] sm:$0xff]   ;;  %v9203_v8 = vmov 0.0|0.0  }
0x1073   : > { %v4730_v24 = vrot.slane %v4723_v9, %v9863_v63  ;;  %v6011_v9 = vld [vmem:[%s10754_s11 + $0x8] sm:$0xff]  }
0x1075   : > { %v4732_v26 = vadd.f32 %v4730_v24, %v4560_v25  ;;  %v6012_v24 = vld [vmem:[%s10754_s11 + $0x10] sm:$0xff]   ;;  %v6013_v25 = vld [vmem:[%s10754_s11 + $0x18] sm:$0xff]  }
0x1077   : > { %v5898_v28 = vmul.f32 -1.442695, %v4732_v26  ;;  %v4740_v62 = vrot.slane %v4732_v26, 3  ;;  %v6014_v26 = vld [vmem:[%s10754_s11 + $0x20] sm:$0xff]  }
0x1079   : > { %8730 = vpow2.f32 %v5898_v28  ;;  %v6015_v28 = vld [vmem:[%s10754_s11 + $0x28] sm:$0xff]  }
0x1083   : > { %v8731_v60 = vpop.eup %8730 }
0x1084   : > { %v4736_v29 = vadd.f32 1.0, %v8731_v60  ;;  %v6016_v60 = vld [vmem:[%s10754_s11 + $0x30] sm:$0xff]  }
0x1086   : > { %8732 = vrcp.f32 %v4736_v29  ;;  %v6017_v29 = vld [vmem:[%s10754_s11 + $0x38] sm:$0xff]  }
0x1087   : > { %8734 = vtanh.f32 %v4740_v62 }
0x1090   : > { %v8733_v30 = vpop.eup %8732 }
0x1091   : > { %v4744_v31 = vrot.slane %v8733_v30, 1  ;;  %v8735_v5 = vpop.eup %8734  ;;  %v4750_v20 = vrot.slane %v8733_v30, 2 }
0x1092   : > { %v4747_v59 = vmul.f32 %v8735_v5, %v8733_v30 }
0x1093   : > { %v4746_v19 = vmul.f32 %v4744_v31, %v10490_v57 }
0x1095   : > { %v10531_v18 = vadd.f32 %v4747_v59, %v4746_v19 }
0x1097   : > { %8736 = vtanh.f32 %v10531_v18 }
0x10a1   : > { %v8737_v22 = vpop.eup %8736 }
0x10a2   : > { %v4752_v21 = vmul.f32 %v8737_v22, %v4750_v20 }
0x10a4   : > { %4753 = vst [vmem:[#allocation4 + $0x5] sm:$0x1] %v4752_v21  ;;  %4754 = vst [vmem:[#allocation5 + $0x2] sm:$0x1] %v4752_v21  ;;  %4821 = vmatmul.mubr.f32.vlgmr.msra.gmra.mrb[36].mxu0 %v4752_v21  ;;  %4892 = vmatmul.mubr.f32.vlgmr.msra.gmra.mrb[36].mxu1 %v4752_v21 }
0x10a5   : > { %7420 = vmatpush1.bf16.msra.mxu0 %v8796_v23  ;;  %7452 = vmatpush1.bf16.msra.mxu1 %v8797_v46  ;;  %v4950_v23 = vld [vmem:[#allocation2 + $0x7] ss:$8 sm:$0xf] }
0x10a6   : > { %7422 = vmatprep.subr.bf16.mxu0 %v8798_v43  ;;  %7454 = vmatprep.subr.bf16.mxu1 %v8799_v47 }
0x10a7   : > { %5015 = vmatprep.mubr.f32.mxu0 %v9200_v1  ;;  %5086 = vmatprep.mubr.f32.mxu1 %v9200_v1 }
0x10a9   : > { %7424 = vmatpush1.bf16.msra.mxu0 %v8800_v48  ;;  %7456 = vmatpush1.bf16.msra.mxu1 %v8801_v49 }
0x10aa   : > { %7426 = vmatprep.subr.bf16.mxu0 %v8802_v50  ;;  %7458 = vmatprep.subr.bf16.mxu1 %v8803_v51 }
0x10ad   : > { %7428 = vmatpush1.bf16.msra.mxu0 %v8804_v39  ;;  %7460 = vmatpush1.bf16.msra.mxu1 %v8805_v41 }
0x10ae   : > { %7430 = vmatprep.subr.bf16.mxu0 %v8806_v52  ;;  %7462 = vmatprep.subr.bf16.mxu1 %v8807_v37 }
0x10b1   : > { %7432 = vmatpush1.bf16.msra.mxu0 %v8808_v42  ;;  %7464 = vmatpush1.bf16.msra.mxu1 %v8809_v53  ;;  %v5150_v42 = vld [vmem:[%s9652_s24] sm:$0x3] }
0x10b2   : > { %7434 = vmatprep.subr.bf16.mxu0 %v8810_v54  ;;  %7466 = vmatprep.subr.bf16.mxu1 %v8811_v55  ;;  %v5151_v53 = vadd.f32 1e-13, %v5150_v42 }
0x10b5   : > { %7436 = vmatpush1.bf16.msra.mxu0 %v10218_v32  ;;  %7468 = vmatpush1.bf16.msra.mxu1 %v10220_v33 }
0x10b6   : > { %7438 = vmatprep.subr.bf16.mxu0 %v10224_v34  ;;  %7470 = vmatprep.subr.bf16.mxu1 %v10226_v10 }
0x10b9   : > { %7440 = vmatpush1.bf16.msra.mxu0 %v10230_v6  ;;  %7472 = vmatpush1.bf16.msra.mxu1 %v10232_v11 }
0x10ba   : > { %7442 = vmatprep.subr.bf16.mxu0 %v10236_v7  ;;  %7474 = vmatprep.subr.bf16.mxu1 %v10238_v12 }
0x10bd   : > { %7444 = vmatpush1.bf16.msra.mxu0 %v10242_v13  ;;  %7476 = vmatpush1.bf16.msra.mxu1 %v10244_v14 }
0x10be   : > { %7446 = vmatprep.subr.bf16.mxu0 %v10248_v27  ;;  %7478 = vmatprep.subr.bf16.mxu1 %v10250_v36  ;;  %v4755_v27 = vld [vmem:[#allocation2 + $0x6] ss:$8 sm:$0xf] }
0x10c1   : > { %7448 = vmatpush1.bf16.msra.mxu0 %v10254_v15  ;;  %7480 = vmatpush1.bf16.msra.mxu1 %v10256_v16 }
0x10c2   : > { %6082 = vmatprep.subr.mxu0 %v9200_v1  ;;  %7481 = vmatprep.subr.bf16.mxu1 %v9203_v8 }
0x1177   : > { %v4822_v32 = vpop.f32.mrb[36].mxu0  ;;  %v4893_v33 = vpop.f32.mrb[36].mxu1 }
0x1178   : > { %v4824_v34 = vpop.f32.mrb[37].mxu0  ;;  %v4895_v10 = vpop.f32.mrb[37].mxu1 }
0x1179   : > { %v4902_v6 = vcombine.low %v4822_v32, %v4824_v34  ;;  %v4903_v11 = vcombine.low %v4893_v33, %v4895_v10 }
0x117b   : > { %v4910_v7 = vrot.slane %v4902_v6, %v9863_v63  ;;  %v4917_v12 = vrot.slane %v4903_v11, %v9863_v63 }
0x117d   : > { %v4918_v13 = vcombine.low %v4910_v7, %v4917_v12 }
0x117f   : > { %v4925_v14 = vrot.slane %v4918_v13, %v9863_v63  ;;  %v5909_v13 = vld [vmem:[%s10818_s1] sm:$0xff]  }
0x1181   : > { %v4927_v36 = vadd.f32 %v4925_v14, %v4755_v27  ;;  %v6005_v14 = vld [vmem:[%s10818_s1 + $0x10] sm:$0xff]   ;;  %v6006_v27 = vld [vmem:[%s10818_s1 + $0x18] sm:$0xff]  }
0x1183   : > { %v5899_v15 = vmul.f32 -1.442695, %v4927_v36  ;;  %v4935_v57 = vrot.slane %v4927_v36, 3  ;;  %v6007_v36 = vld [vmem:[%s10818_s1 + $0x20] sm:$0xff]  }
0x1185   : > { %8738 = vpow2.f32 %v5899_v15  ;;  %v6008_v15 = vld [vmem:[%s10818_s1 + $0x28] sm:$0xff]  }
0x118f   : > { %v8739_v16 = vpop.eup %8738 }
0x1190   : > { %v4931_v56 = vadd.f32 1.0, %v8739_v16  ;;  %v6009_v16 = vld [vmem:[%s10818_s1 + $0x30] sm:$0xff]  }
0x1192   : > { %8740 = vrcp.f32 %v4931_v56  ;;  %v6010_v56 = vld [vmem:[%s10818_s1 + $0x38] sm:$0xff]  }
0x1193   : > { %8742 = vtanh.f32 %v4935_v57 }
0x119c   : > { %v8741_v4 = vpop.eup %8740 }
0x119d   : > { %v4939_v58 = vrot.slane %v8741_v4, 1  ;;  %v8743_v17 = vpop.eup %8742  ;;  %v4945_v61 = vrot.slane %v8741_v4, 2 }
0x119e   : > { %v4942_v0 = vmul.f32 %v8743_v17, %v8741_v4 }
0x119f   : > { %v4941_v3 = vmul.f32 %v4939_v58, %v10531_v18 }
0x11a1   : > { %v4943_v40 = vadd.f32 %v4942_v0, %v4941_v3  ;;  %v9204_v0 = vmov 0   ;;  %v5973_v3 = vld [vmem:[%s10819_s17] sm:$0xff]  }
0x11a2   : > { %8337 = vset.pattern.permute.xlu0 %v9204_v0 }
0x11a3   : > { %8744 = vtanh.f32 %v4943_v40 }
0x11ad   : > { %v8745_v44 = vpop.eup %8744 }
0x11ae   : > { %v4947_v45 = vmul.f32 %v8745_v44, %v4945_v61  ;;  %v6020_v61 = vld [vmem:[%s10819_s17 + $0x18] sm:$0xff]   ;;  %v6021_v44 = vld [vmem:[%s10819_s17 + $0x20] sm:$0xff]  }
0x11b0   : > { %4948 = vst [vmem:[#allocation4 + $0x6] sm:$0x1] %v4947_v45  ;;  %4949 = vst [vmem:[#allocation5 + $0x1] sm:$0x1] %v4947_v45  ;;  %5016 = vmatmul.mubr.f32.vlgmr.msra.gmra.mrb[38].mxu0 %v4947_v45  ;;  %5087 = vmatmul.mubr.f32.vlgmr.msra.gmra.mrb[38].mxu1 %v4947_v45  ;;  %v5902_v45 = vld [vmem:[#allocation6] ss:$0 sm:$0xff] }
0x11b1   : > { %6084 = vmatprep.mubr.msk.f32.mxu0 %vm9202_vm2, %v9200_v1  ;;  %6119 = vmatprep.mubr.msk.f32.mxu1 %vm9202_vm2, %v9200_v1 }
0x11b2   : > { %7483 = vmatpush3.bf16.msra.mxu1 %v5941_v2 }
0x11b3   : > { %7484 = vmatprep.subr.bf16.mxu1 %v9203_v8 }
0x11b6   : > { %7486 = vmatpush3.bf16.msra.mxu1 %v6011_v9 }
0x11b7   : > { %7487 = vmatprep.subr.bf16.mxu1 %v9203_v8 }
0x11ba   : > { %7489 = vmatpush3.bf16.msra.mxu1 %v6012_v24 }
0x11bb   : > { %7490 = vmatprep.subr.bf16.mxu1 %v9203_v8 }
0x11be   : > { %7492 = vmatpush3.bf16.msra.mxu1 %v6013_v25 }
0x11bf   : > { %7493 = vmatprep.subr.bf16.mxu1 %v9203_v8 }
0x11c2   : > { %7495 = vmatpush3.bf16.msra.mxu1 %v6014_v26 }
0x11c3   : > { %7496 = vmatprep.subr.bf16.mxu1 %v9203_v8 }
0x11c6   : > { %7498 = vmatpush3.bf16.msra.mxu1 %v6015_v28 }
0x11c7   : > { %7499 = vmatprep.subr.bf16.mxu1 %v9203_v8 }
0x11ca   : > { %7501 = vmatpush3.bf16.msra.mxu1 %v6016_v60 }
0x11cb   : > { %7502 = vmatprep.subr.bf16.mxu1 %v9203_v8 }
0x11ce   : > { %7504 = vmatpush3.bf16.msra.mxu1 %v6017_v29 }
0x11cf   : > { %7505 = vmatprep.subr.bf16.mxu1 %v9203_v8 }
0x1283   : > { %v5017_v62 = vpop.f32.mrb[38].mxu0  ;;  %v5088_v30 = vpop.f32.mrb[38].mxu1 }
0x1284   : > { %v5019_v31 = vpop.f32.mrb[39].mxu0  ;;  %v5090_v5 = vpop.f32.mrb[39].mxu1 }
0x1285   : > { %v5097_v59 = vcombine.low %v5017_v62, %v5019_v31  ;;  %v5098_v19 = vcombine.low %v5088_v30, %v5090_v5 }
0x1287   : > { %v5105_v18 = vrot.slane %v5097_v59, %v9863_v63  ;;  %v5112_v20 = vrot.slane %v5098_v19, %v9863_v63 }
0x1289   : > { %v5113_v22 = vcombine.low %v5105_v18, %v5112_v20 }
0x128b   : > { %v5120_v21 = vrot.slane %v5113_v22, %v9863_v63 }
0x128d   : > { %v5122_v46 = vadd.f32 %v5120_v21, %v4950_v23 }
0x128f   : > { %v5900_v43 = vmul.f32 -1.442695, %v5122_v46  ;;  %v5130_v49 = vrot.slane %v5122_v46, 3 }
0x1291   : > { %8746 = vpow2.f32 %v5900_v43 }
0x129b   : > { %v8747_v47 = vpop.eup %8746 }
0x129c   : > { %v5126_v48 = vadd.f32 1.0, %v8747_v47  ;;  %v6022_v47 = vld [vmem:[%s10819_s17 + $0x28] sm:$0xff]  }
0x129e   : > { %8748 = vrcp.f32 %v5126_v48  ;;  %v6023_v48 = vld [vmem:[%s10819_s17 + $0x30] sm:$0xff]  }
0x129f   : > { %8750 = vtanh.f32 %v5130_v49  ;;  %v6024_v49 = vld [vmem:[%s10819_s17 + $0x38] sm:$0xff]  }
0x12a8   : > { %v8749_v50 = vpop.eup %8748 }
0x12a9   : > { %v5134_v51 = vrot.slane %v8749_v50, 1  ;;  %v8751_v39 = vpop.eup %8750  ;;  %v5140_v63 = vrot.slane %v8749_v50, 2 }
0x12aa   : > { %v5137_v52 = vmul.f32 %v8751_v39, %v8749_v50 }
0x12ab   : > { %v5136_v41 = vmul.f32 %v5134_v51, %v4943_v40  ;;  %v6018_v40 = vld [vmem:[%s10819_s17 + $0x8] sm:$0xff]  }
0x12ad   : > { %v5138_v37 = vadd.f32 %v5137_v52, %v5136_v41 }
0x12af   : > { %8752 = vtanh.f32 %v5138_v37 }
0x12b0   : > { %8754 = vrcp.f32 %v5151_v53 }
0x12b9   : > { %v8753_v54 = vpop.eup %8752 }
0x12ba   : > { %v5142_v55 = vmul.f32 %v8753_v54, %v5140_v63  ;;  %v8755_v32 = vpop.eup %8754  ;;  %v5586_v63 = vld [vmem:[%s10820_s10] sm:$0xff] }
0x12bb   : > { %v5153_v33 = vmul.f32 %v8755_v32, %v5150_v42  ;;  %v5514_v32 = vld [vmem:[%s10821_s18] sm:$0x1]  ;;  %s9100_s18 = sshll.u32 %s9205_s30, 4  ;;  %s9101_s18 = int_to_ptr.vmem [resolvable:$false] %s9100_s18 }
0x12bc   : > { %5143 = vst [vmem:[#allocation4 + $0x7] sm:$0x1] %v5142_v55  ;;  %5144 = vst [vmem:[#allocation5] sm:$0x1] %v5142_v55  ;;  %v5588_v55 = vld [vmem:[%s10820_s10 + $0x10] sm:$0xf]  ;;  %p9103_p11 = scmp.lt.s32.totalorder %s10700_s25, %s9101_s18 }
0x12bd   : > { %s9102_s23 = scalar_lea.vmem %s9101_s18, 32 }
0x12be   : > { %p9104_p8 = scmp.lt.s32.totalorder %s9102_s23, %s9096_s6 }
0x12c0   : > { %p9105_p9 = por %p9104_p8, %p9103_p11 }
0x12c2   : > { %p9106_p12 = pnand %p9105_p9, %p9099_p6 }
0x12c3   : > { %v5145_v34 = vld [vmem:[#allocation4] sm:$0xff]  ;;  %v5146_v10 = vld [vmem:[#allocation5] sm:$0xff] }
0x12c4   : > { %v10598_v6 = vsel %vm2937_vm1, %v5145_v34, %v5146_v10 }
0x12c5   : > { %5148 = vst [vmem:[#allocation4] sm:$0xff] %v10598_v6  ;;  %6083 = vmatpush3.msra.mxu0 %v10598_v6 }
0x12c6   : > { %6085 = vmatmul.mubr.msk.f32.vlgmr.msra.gmra.mrb[40].mxu0 %vm5154_vm3, %v5153_v33  ;;  %7529 = vmatprep.subr.bf16.mxu0 %v9203_v8 }
0x12c7   : > { %6189 = vmatprep.mubr.msk.f32.mxu0 %vm9202_vm2, %v9200_v1  ;;  %7531 = vmatpush3.bf16.msra.mxu0 %v5973_v3 }
0x12c8   : > { %7532 = vmatprep.subr.bf16.mxu0 %v9203_v8 }
0x12cb   : > { %7534 = vmatpush3.bf16.msra.mxu0 %v6018_v40 }
0x12cc   : > { %7535 = vmatprep.subr.bf16.mxu0 %v9203_v8 }
0x1399   : > { %v5224_v11 = vpop.f32.mrb[40].mxu0 }
0x139a   : > { %v5293_v7 = vrot.slane %v5224_v11, 1  ;;  %v6086_v12 = vpop.f32.mrb[41].mxu0 }
0x139c   : > { %6120 = vmatmul.mubr.f32.vlgmr.msra.gmra.mrb[40].mxu1 %v5293_v7 }
0x139d   : > { %7507 = vmatpush3.bf16.msra.mxu1 %v5909_v13  ;;  %6154 = vmatprep.mubr.msk.f32.mxu1 %vm9202_vm2, %v9200_v1 }
0x139e   : > { %7508 = vmatprep.subr.bf16.mxu1 %v9203_v8 }
0x13a1   : > { %7510 = vmatpush3.bf16.msra.mxu1 %v6004_v35 }
0x13a2   : > { %7511 = vmatprep.subr.bf16.mxu1 %v9203_v8 }
0x13a5   : > { %7513 = vmatpush3.bf16.msra.mxu1 %v6005_v14 }
0x13a6   : > { %7514 = vmatprep.subr.bf16.mxu1 %v9203_v8 }
0x13a9   : > { %7516 = vmatpush3.bf16.msra.mxu1 %v6006_v27 }
0x13aa   : > { %7517 = vmatprep.subr.bf16.mxu1 %v9203_v8 }
0x13ad   : > { %7519 = vmatpush3.bf16.msra.mxu1 %v6007_v36 }
0x13ae   : > { %7520 = vmatprep.subr.bf16.mxu1 %v9203_v8 }
0x13b1   : > { %7522 = vmatpush3.bf16.msra.mxu1 %v6008_v15 }
0x13b2   : > { %7523 = vmatprep.subr.bf16.mxu1 %v9203_v8 }
0x13b5   : > { %7525 = vmatpush3.bf16.msra.mxu1 %v6009_v16 }
0x13b6   : > { %7526 = vmatprep.subr.bf16.mxu1 %v9203_v8 }
0x13b9   : > { %7528 = vmatpush3.bf16.msra.mxu1 %v6010_v56 }
0x13bc   : > { %6155 = vmatmul.mubr.f32.vlgmr.msra.gmra.mrb[40].mxu1 %v5224_v11 }
0x148f   : > { %v5431_v57 = vpop.f32.mrb[40].mxu1 }
0x1490   : > { %v5438_v4 = vrot.slane %v5431_v57, %v9829_v38  ;;  %v6156_v58 = vpop.f32.mrb[41].mxu1  ;;  %v6019_v38 = vld [vmem:[%s10819_s17 + $0x10] sm:$0xff]  }
0x1491   : > { %7537 = vmatpush3.bf16.msra.mxu0 %v6019_v38 }
0x1492   : > { %v5439_v17 = vmul.f32 %v5438_v4, %v10598_v6  ;;  %7538 = vmatprep.subr.bf16.mxu0 %v9203_v8 }
0x1494   : > { %5440 = vadd.xlane.f32.xlu0 %v5439_v17 }
0x1495   : > { %7540 = vmatpush3.bf16.msra.mxu0 %v6020_v61 }
0x1496   : > { %7541 = vmatprep.subr.bf16.mxu0 %v9203_v8 }
0x1499   : > { %7543 = vmatpush3.bf16.msra.mxu0 %v6021_v44 }
0x149a   : > { %7544 = vmatprep.subr.bf16.mxu0 %v9203_v8 }
0x149d   : > { %7546 = vmatpush3.bf16.msra.mxu0 %v6022_v47 }
0x149e   : > { %7547 = vmatprep.subr.bf16.mxu0 %v9203_v8 }
0x14a1   : > { %7549 = vmatpush3.bf16.msra.mxu0 %v6023_v48 }
0x14a2   : > { %7550 = vmatprep.subr.bf16.mxu0 %v9203_v8 }
0x14a5   : > { %7552 = vmatpush3.bf16.msra.mxu0 %v6024_v49 }
0x14a6   : > { %7553 = vmatprep.subr.bf16.mxu0 %v9203_v8  ;;  %v5587_v8 = vld [vmem:[%s10820_s10 + $0x8] sm:$0xff] }
0x14a7   : > { %v7554_v54 = vpack.c.bf16 %v5587_v8, %v5586_v63 }
0x1521   : > { %v5441_v2 = vpop.xlane.xlu0 %5440 }
0x1522   : > { %v5449_v9 = vadd.f32 %v5902_v45, %v5441_v2 }
0x1524   : > { %v5451_v24 = vsel %vm5450_vm4, %v5449_v9, -inf }
0x1525   : > { %v5452_v25 = vrot.slane %v5451_v24, 4 }
0x1527   : > { %v5453_v26 = vmax.f32 %v5451_v24, %v5452_v25 }
0x1529   : > { %v5454_v28 = vrot.slane %v5453_v26, 2 }
0x152b   : > { %v5455_v60 = vmax.f32 %v5453_v26, %v5454_v28 }
0x152d   : > { %v5456_v29 = vrot.slane %v5455_v60, 1 }
0x152f   : > { %v5457_v62 = vmax.f32 %v5455_v60, %v5456_v29 }
0x1531   : > { %v5458_v30 = vsub.f32 %v5449_v9, %v5457_v62 }
0x1533   : > { %v5459_v31 = vmul.f32 1.442695, %v5458_v30 }
0x1535   : > { %8756 = vpow2.f32 %v5459_v31 }
0x153f   : > { %v8757_v5 = vpop.eup %8756 }
0x1540   : > { %v5461_v59 = vsel %vm5450_vm4, %v8757_v5, 0.0 }
0x1541   : > { %v5462_v19 = vrot.slane %v5461_v59, 4 }
0x1543   : > { %v5463_v18 = vadd.f32 %v5462_v19, %v5461_v59 }
0x1545   : > { %v5464_v20 = vrot.slane %v5463_v18, 2 }
0x1547   : > { %v5465_v22 = vadd.f32 %v5464_v20, %v5463_v18 }
0x1549   : > { %v5466_v21 = vrot.slane %v5465_v22, 1 }
0x154b   : > { %v5467_v23 = vadd.f32 %v5466_v21, %v5465_v22 }
0x154d   : > { %8758 = vrcp.f32 %v5467_v23 }
0x1557   : > { %v8759_v46 = vpop.eup %8758 }
0x1558   : > { %v5469_v43 = vmul.f32 %v8759_v46, %v8757_v5 }
0x155a   : > { %5472 = vperm.xlu0 %8337, %v5469_v43  }
0x15d9   : > { %v5473_v50 = vpop.permute.xlu0 %5472 }
0x15da   : > { %v5475_v51 = vmul.f32 %v5473_v50, %v10598_v6 }
0x15dc   : > { %v5476_v39 = vrot.slane %v5475_v51, 4 }
0x15de   : > { %v5477_v41 = vadd.f32 %v5476_v39, %v5475_v51 }
0x15e0   : > { %v5478_v52 = vrot.slane %v5477_v41, 2 }
0x15e2   : > { %v5479_v37 = vadd.f32 %v5478_v52, %v5477_v41 }
0x15e4   : > { %v5480_v42 = vrot.slane %v5479_v37, 1 }
0x15e6   : > { %v5481_v53 = vadd.f32 %v5480_v42, %v5479_v37 }
0x15e8   : > { %6190 = vmatmul.mubr.f32.vlgmr.msra.gmra.mrb[42].mxu0 %v5481_v53 }
0x15e9   : > { %6198 = vmatprep.mubr.msk.f32.mxu0 %vm9202_vm2, %v9200_v1  ;;  %7555 = vmatpush3.bf16.msra.mxu0 %v7554_v54 }
0x15ea   : > { %6196 = vmatprep.subr.mxu0 %v9200_v1  ;;  %v5589_v1 = vld [vmem:[%s10822_s4] sm:$0x1] }
0x15ed   : > { %6197 = vmatpush3.msk.msra.mxu0 %vm5594_vm5, %v5588_v55 }
0x16bb   : > { %v5581_v33 = vpop.f32.mrb[42].mxu0 }
0x16bc   : > { %v5582_v34 = vadd.f32 %v5581_v33, %v5514_v32  ;;  %v6191_v10 = vpop.f32.mrb[43].mxu0 }
0x16be   : > { %v5585_v6 = vmax.f32 %v5582_v34, 0.0 }
0x16c0   : > { %6199 = vmatmul.mubr.msk.f32.vlgmr.msra.gmra.mrb[44].mxu0 %vm5590_vm6, %v5585_v6 }
0x1793   : > { %v5664_v11 = vpop.f32.mrb[44].mxu0 }
0x1794   : > { %v5665_v7 = vadd.f32 %v5664_v11, %v5589_v1  ;;  %v6200_v12 = vpop.f32.mrb[45].mxu0 }
0x1796   : > { %v5669_v13 = vsel %vm5668_vm7, %v5665_v7, -inf }
0x1797   : > { %5670 = vmax.xlane.f32.xlu1 %v5669_v13 }
0x1824   : > { %v5671_v35 = vpop.xlane.xlu1 %5670 }
0x1825   : > { %v5672_v14 = vsub.f32 %v5665_v7, %v5671_v35 }
0x1827   : > { %v5673_v27 = vmul.f32 1.442695, %v5672_v14 }
0x1829   : > { %8760 = vpow2.f32 %v5673_v27 }
0x1833   : > { %v8761_v36 = vpop.eup %8760 }
0x1834   : > { %v5675_v15 = vsel %vm5668_vm7, %v8761_v36, 0.0 }
0x1835   : > { %5676 = vadd.xlane.f32.xlu1 %v5675_v15 }
0x18c2   : > { %v5677_v16 = vpop.xlane.xlu1 %5676 }
0x18c3   : > { %8762 = vrcp.f32 %v5677_v16 }
0x18cd   : > { %v8763_v56 = vpop.eup %8762 }
0x18ce   : > { %v5679_v57 = vmul.f32 %v8763_v56, %v8761_v36 }
0x18d0   : > { %5680 = vst.msk [vmem:[%s713_s5] sm:$0x1] %vm5668_vm7, %v5679_v57 }
0x18d1   : > { %9109 = shalt.err (!%p9106_p12)
}
0x18d2   : > { %s9110_s7 = scalar_lea.hbm %s10698_s20, 16  ;;  %s9114_s16 = scalar_lea.hbm %s10823_s14, 32 }
0x18d3   : > { %p9111_p1 = scmp.ne.s32.totalorder %s10698_s20, %s9110_s7  ;;  %p9115_p2 = scmp.lt.u32.totalorder %s10698_s20, %s10823_s14 }
0x18d4   : > { %p9116_p4 = scmp.lt.u32.totalorder %s9114_s16, %s9110_s7  ;;  %p9118_p5 = scmp.lt.u32.totalorder %s9110_s7, %s10698_s20 }
0x18d5   : > { %p9112_p13 = pnand %p9111_p1, %p10824_p7 }
0x18d6   : > { %p9117_p10 = por %p9116_p4, %p9115_p2 }
0x18d7   : > { %p9113_p0 = pneg %p9112_p13 }
0x18d8   : > { %p9119_p3 = por %p9118_p5, %p9117_p10 }
0x18da   : > { %p9120_p6 = pnand %p9119_p3, %p9113_p0 }
0x18dc   : > { %9123 = shalt.err (!%p9120_p6)
}
0x18dd   : > { %8234 = dma.vmem_to_hbm [thread:$0]  (%p10824_p7), %s10700_s25, 16, %s10698_s20, %s5682_s3  }
0x18de PF: > { %s5706_s22 = sand.u32 1, %s9174_s26   ;;  %p10825_p11 = scmp.ne.s32.totalorder %s10798_s12, 0 }
0x18df   : > { %p10826_p8 = scmp.ge.s32.totalorder %s9186_s29, 2  ;;  %s5707_s6 = scalar_lea.sflag [#allocation9], %s5706_s22 }
0x18e1   : > { %p8269_p9 = pnand %p10826_p8, %p10825_p11 }
0x18e3   : > { %9169 = dma.done.wait (!%p8269_p9), %s5707_s6, 16  }
0x18e4   : > { %9171 = vsyncadd (!%p8269_p9), %s5707_s6, 4294967280  ;;  %p39_p12 = scmp.ge.s32.totalorder %s9529_s19, 4   ;;  %s10827_s26 = smov %s9178_s27 }
0x18e5   : > { %s10828_s27 = smov %s9182_s28  ;;  %s10829_s28 = smov %s9540_s13 }
0x18e6   : > { %s10830_s29 = smov %s9529_s19  ;;  %41 = sbr.rel (!%p39_p12) target bundleno = 26 (0x1a), region = 192 }
0x18ed   :  { %5711 = vsyncpa [#allocation8], 1 }
0x18ee   :  { %5713 = vsyncpa [#allocation8 + $0x1], 1 }
0x18ef   :  { %5714 = vsyncpa [#allocation11], 1 }
0x18f0   :  { %5716 = vsyncpa [#allocation11 + $0x1], 1 }
0x18f1   :  { %5717 = vsyncpa [#allocation14], 1 }
0x18f2   :  { %5718 = vsyncpa [#allocation17], 1 }
0x18f3   :  { %5719 = vsyncpa [#allocation20], 1 }
0x18f4   :  { %5720 = vsyncpa [#allocation23], 1 }
0x18f5   :  { %5721 = vsyncpa [#allocation9], 1 }
0x18f6   :  { %5723 = vsyncpa [#allocation9 + $0x1], 1 }

</bundles_post_ra>
